<compile_context>
chip_gen: v5e
topology: v5e:2x2
jax: 0.10.0
libtpu: 0.0.40
codegen_flags: <defaults>
</compile_context>

<pallas_src>
import functools

import jax
import jax.numpy as jnp
from jax import lax
from jax.experimental import pallas as pl
from jax.experimental.pallas import tpu as pltpu

LEAKY_SLOPE = 0.2
DILATIONS = (1, 3, 9)
HALO = sum(DILATIONS)                 # 13: input halo per side for the fused stack
EDGE = DILATIONS[1] + DILATIONS[2]    # 12: edge columns needing per-stage reflection
LANE = 128


def _leaky(x):
    return jnp.where(x > 0, x, LEAKY_SLOPE * x)


# ---------------------------------------------------------------------------
# Fused kernel: all 3 residual stages over one (C, T_TILE) output tile.
# ---------------------------------------------------------------------------
def _fused_stack_kernel(xm_ref, xh_ref, wm_ref, w1_ref, bias_ref,
                        o_ref, stk_ref, *, matmul_dtype):
    """Refs:
      xm_ref : (1, C, tt)    main slab of the reflection-padded input (hbm dtype)
      xh_ref : (1, C, 128)   next 128 columns (right halo; first 26 are used)
      wm_ref : (3, 2C, 4C)   merged LHS per stage: [[w3_t0 w3_t1 w3_t2 0],[0 0 0 ws]]
      w1_ref : (3, C, C)     1x1 block conv weights, per stage
      bias_ref: (C, 9)       packed biases; column 3*s + {0,1,2} = b3 / b1 / bs
      o_ref  : (1, C, tt)
      stk_ref: (4C, tt+128)  stacked matmul RHS scratch (matmul dtype)

    Width bookkeeping (Wp = tt + 128, lane-aligned): each stage's matmuls run
    over the full lane-aligned width, so columns past the stage's valid prefix
    hold junk.  Valid prefixes shrink tt+24 -> tt+18 -> tt; the rolls only move
    junk columns further right (or wrap them to the far end), so the final tt
    output columns are never contaminated.  Matmul columns are independent, so
    junk (even NaN from uninitialized scratch) stays column-local.
    """
    C = o_ref.shape[1]
    tt = o_ref.shape[2]
    Wp = stk_ref.shape[1]                       # tt + 128
    mm = matmul_dtype
    nh = 2 * HALO                               # 26 seam columns
    bias = bias_ref[...]                        # (C, 9) f32

    # ---- stage 0: stack straight from the input refs (no window assembly) ----
    x_main = xm_ref[0].astype(jnp.float32)              # (C, tt)
    x_halo = xh_ref[0][:, :nh].astype(jnp.float32)      # (C, 26)
    h_main = _leaky(x_main)
    h_halo = _leaky(x_halo).astype(mm)
    r_halo = x_halo.astype(mm)
    d0 = DILATIONS[0]                                    # 1
    for k in range(3):                                   # taps at shifts 0, d0, 2*d0
        sh = k * d0
        rolled = h_main if sh == 0 else pltpu.roll(h_main, tt - sh, 1)
        stk_ref[k * C:(k + 1) * C, :tt] = rolled.astype(mm)       # lane-dense store
        stk_ref[k * C:(k + 1) * C, tt - sh:tt - sh + nh] = h_halo  # 26-col seam patch
    stk_ref[3 * C:4 * C, :tt] = pltpu.roll(x_main, tt - d0, 1).astype(mm)
    stk_ref[3 * C:4 * C, tt - d0:tt - d0 + nh] = r_halo

    cur = None
    for s, d in enumerate(DILATIONS):
        if s > 0:
            # stages 1, 2: stack from the full-width f32 `cur` value via rolls.
            h = _leaky(cur)
            for k in range(3):
                sh = k * d
                rolled = h if sh == 0 else pltpu.roll(h, Wp - sh, 1)
                stk_ref[k * C:(k + 1) * C, :] = rolled.astype(mm)
            stk_ref[3 * C:4 * C, :] = pltpu.roll(cur, Wp - d, 1).astype(mm)

        w_cols = tt if s == len(DILATIONS) - 1 else Wp   # last stage only needs tt
        rhs = stk_ref[:, :w_cols]
        # Merged (2C, 4C) matmul: rows 0:C = dilated k=3 conv, rows C:2C = shortcut.
        res = jnp.dot(wm_ref[s], rhs, preferred_element_type=jnp.float32)
        acc = _leaky(res[:C] + bias[:, 3 * s:3 * s + 1]).astype(mm)
        y = jnp.dot(w1_ref[s], acc, preferred_element_type=jnp.float32)
        y = y + bias[:, 3 * s + 1:3 * s + 2]
        sc = res[C:] + bias[:, 3 * s + 2:3 * s + 3]
        cur = sc + y                                      # f32 residual add

    o_ref[0] = cur.astype(o_ref.dtype)


# ---------------------------------------------------------------------------
# Wrapper
# ---------------------------------------------------------------------------
def _pack_params(params, matmul_dtype):
    C = params[0]["w3"].shape[0]
    z_cc = jnp.zeros((C, C), jnp.float32)
    z_c3c = jnp.zeros((C, 3 * C), jnp.float32)
    # Merged LHS (2C, 4C): [[w3_tap0 w3_tap1 w3_tap2 0], [0 0 0 ws]].
    # NOTE: at C=64 the merged K=4C exactly fills the 256-wide v6e/v7x MXU;
    # for C >= 128 Mosaic splits K into 256-chunks automatically.
    wm = jnp.stack([
        jnp.concatenate([
            jnp.concatenate([p["w3"][:, :, 0], p["w3"][:, :, 1],
                             p["w3"][:, :, 2], z_cc], axis=1),
            jnp.concatenate([z_c3c, p["ws"][:, :, 0]], axis=1),
        ], axis=0)
        for p in params]).astype(matmul_dtype)                       # (3, 2C, 4C)
    w1 = jnp.stack([p["w1"][:, :, 0] for p in params]).astype(matmul_dtype)
    bias = jnp.stack(sum([[p["b3"], p["b1"], p["bs"]] for p in params], []),
                     axis=1).astype(jnp.float32)                     # (C, 9)
    return wm, w1, bias


def melgan_resstack(x, params, *, time_tile=4096, matmul_dtype=jnp.bfloat16,
                    vmem_limit_bytes=32 * 1024 * 1024):
    """MelGANResStack forward.  x: (B, C, T) in NCL layout (like PyTorch)."""
    B, C, T = x.shape
    if T < 2 * HALO:
        raise ValueError("time dimension too short for the fused kernel")
    if C % 8 != 0:
        raise ValueError("channel count must be a multiple of 8")
    if time_tile <= 0 or time_tile % LANE != 0:
        raise ValueError("time_tile must be a positive multiple of 128")

    wm, w1, bias = _pack_params(params, matmul_dtype)
    hbm_dtype = matmul_dtype      # padded input lives in HBM in the matmul dtype

    # ---- time-tile selection (sweepable via `time_tile`) --------------------
    # Pick the biggest tile that (a) the caller asked for, (b) fits a
    # conservative VMEM budget (v7x: 64 MiB physical / 32 MiB scoped per TC),
    # and (c) still leaves >= 2 grid steps so both v7x TensorCores get work.
    tt = min(time_tile, LANE * pl.cdiv(T, LANE))
    bytes_per_col = C * (
        2 * 2 * jnp.dtype(hbm_dtype).itemsize        # xm block, double buffered
        + 2 * 4                                      # out block (f32), double buffered
        + 4 * jnp.dtype(matmul_dtype).itemsize       # stacked scratch (4C rows)
        + 12 * 4)                                    # f32 temporaries (cur/h/res/rolls)
    max_tt = max(LANE, int(0.6 * vmem_limit_bytes) // bytes_per_col // LANE * LANE)
    tt = max(LANE, min(tt, max_tt))
    while B * pl.cdiv(T, tt) < 2 and tt > LANE:      # keep >=2 grid steps (megacore)
        tt = max(LANE, (tt // 2) // LANE * LANE)
    n_t = pl.cdiv(T, tt)
    t_pad = n_t * tt
    halo_blocks = tt // LANE

    # ---- reflection-padded input, built in ONE pass, stored in bf16 ---------
    # Reflect by HALO on both sides (ReflectionPad1d semantics), then zero-fill
    # on the right up to n_t*tt + 128 so the halo BlockSpec always reads
    # in-bounds.  The zeros only influence discarded (>= T) output columns.
    left = x[:, :, 1:HALO + 1][:, :, ::-1]
    right = x[:, :, T - HALO - 1:T - 1][:, :, ::-1]
    tail = jnp.zeros((B, C, t_pad + LANE - (T + 2 * HALO)), x.dtype)
    xp = jnp.concatenate([left, x, right, tail], axis=-1).astype(hbm_dtype)

    # 3 stages x (merged (2C,4C) matmul + (C,C) matmul) per output column.
    flops = 3 * (2 * (2 * C) * (4 * C) + 2 * C * C) * B * t_pad
    bytes_accessed = (B * C * (t_pad + n_t * LANE) * xp.dtype.itemsize   # reads
                      + B * C * t_pad * x.dtype.itemsize                 # output write
                      + wm.size * wm.dtype.itemsize
                      + w1.size * w1.dtype.itemsize + bias.size * 4)

    # TODO(synk): when B > 1 and T is short, fold the batch axis into the
    # matmul RHS (stk -> (4C, B*w)) to amortize MXU weight loads across B.
    out = pl.pallas_call(
        functools.partial(_fused_stack_kernel, matmul_dtype=matmul_dtype),
        out_shape=jax.ShapeDtypeStruct((B, C, t_pad), x.dtype),
        grid=(B, n_t),
        in_specs=[
            pl.BlockSpec((1, C, tt), lambda b, j: (b, 0, j)),            # main slab
            pl.BlockSpec((1, C, LANE),
                         lambda b, j: (b, 0, (j + 1) * halo_blocks)),    # right halo
            pl.BlockSpec((3, 2 * C, 4 * C), lambda b, j: (0, 0, 0)),     # merged LHS
            pl.BlockSpec((3, C, C), lambda b, j: (0, 0, 0)),             # w1
            pl.BlockSpec((C, 9), lambda b, j: (0, 0)),                   # biases
        ],
        out_specs=pl.BlockSpec((1, C, tt), lambda b, j: (b, 0, j)),
        scratch_shapes=[pltpu.VMEM((4 * C, tt + LANE), matmul_dtype)],
        compiler_params=pltpu.CompilerParams(
            dimension_semantics=("parallel", "parallel"),
            vmem_limit_bytes=vmem_limit_bytes),
        cost_estimate=pl.CostEstimate(flops=int(flops), transcendentals=0,
                                      bytes_accessed=int(bytes_accessed)),
    )(xp, xp, wm, w1, bias)
    out = out[:, :, :T]

    # ---- exact signal-edge columns ------------------------------------------
    # The module reflects each stage's *output* at the signal edges; the fused
    # kernel only has the reflected *input* halo.  Only the outer EDGE=12
    # columns per side differ; compute them with the tiny plain-JAX path.
    # TODO(synk): fold this 12-column edge patch into the kernel if it matters.
    strip = EDGE + HALO + 1                                 # 26 columns suffice
    left_cols = melgan_resstack_ref(
        x[:, :, :strip], params, matmul_dtype=matmul_dtype)[:, :, :EDGE]
    right_cols = melgan_resstack_ref(
        x[:, :, T - strip:], params, matmul_dtype=matmul_dtype)[:, :, -EDGE:]
    out = out.at[:, :, :EDGE].set(left_cols.astype(out.dtype))
    out = out.at[:, :, T - EDGE:].set(right_cols.astype(out.dtype))
    return out


# ---------------------------------------------------------------------------
# Pure-JAX reference (module semantics) for verification
# ---------------------------------------------------------------------------
def melgan_resstack_ref(x, params, *, matmul_dtype=None):
    """matmul_dtype=None -> full f32 convs.  A dtype (e.g. bf16) quantizes the
    input once and casts conv operands with f32 accumulation, matching what the
    Pallas kernel does (bf16 padded input in HBM + bf16 MXU operands)."""
    dn = ("NCH", "OIH", "NCH")
    if matmul_dtype is not None:
        x = x.astype(matmul_dtype).astype(jnp.float32)

    def conv(u, w, dil):
        if matmul_dtype is not None:
            u = u.astype(matmul_dtype)
            w = w.astype(matmul_dtype)
        return lax.conv_general_dilated(
            u, w, (1,), "VALID", rhs_dilation=(dil,), dimension_numbers=dn,
            preferred_element_type=jnp.float32)

    for p, d in zip(params, DILATIONS):
        h = _leaky(x)
        h = jnp.pad(h, ((0, 0), (0, 0), (d, d)), mode="reflect")
        h = conv(h, p["w3"], d) + p["b3"][None, :, None]
        h = _leaky(h)
        h = conv(h, p["w1"], 1) + p["b1"][None, :, None]
        s = conv(x, p["ws"], 1) + p["bs"][None, :, None]
        x = s + h
    return x


# ---------------------------------------------------------------------------
# Parameter construction (weight-norm reparameterization, deterministic init)
# ---------------------------------------------------------------------------
def _weight_norm(v, g):
    # v: (Cout, Cin, K), g: (Cout,) ; w = g * v / ||v||_(per out channel)
    norm = jnp.sqrt(jnp.sum(v * v, axis=(1, 2), keepdims=True))
    return g[:, None, None] * v / norm


def make_params(key, channel):
    params = []
    for i in range(3):
        keys = jax.random.split(jax.random.fold_in(key, i), 9)
        v3 = 0.1 * jax.random.normal(keys[0], (channel, channel, 3), jnp.float32)
        g3 = 1.0 + 0.1 * jax.random.normal(keys[1], (channel,), jnp.float32)
        b3 = 0.1 * jax.random.normal(keys[2], (channel,), jnp.float32)
        v1 = 0.1 * jax.random.normal(keys[3], (channel, channel, 1), jnp.float32)
        g1 = 1.0 + 0.1 * jax.random.normal(keys[4], (channel,), jnp.float32)
        b1 = 0.1 * jax.random.normal(keys[5], (channel,), jnp.float32)
        vs = 0.1 * jax.random.normal(keys[6], (channel, channel, 1), jnp.float32)
        gs = 1.0 + 0.1 * jax.random.normal(keys[7], (channel,), jnp.float32)
        bs = 0.1 * jax.random.normal(keys[8], (channel,), jnp.float32)
        params.append({
            "w3": _weight_norm(v3, g3), "b3": b3,
            "w1": _weight_norm(v1, g1), "b1": b1,
            "ws": _weight_norm(vs, gs), "bs": bs,
        })
    return params


if __name__ == "__main__":
    key = jax.random.PRNGKey(0)
    B, C, T = 2, 32, 500                  # (batch, channel, time) — NCL like PyTorch
    kx, kp = jax.random.split(key)
    x = jax.random.normal(kx, (B, C, T), jnp.float32)
    params = make_params(kp, C)

    out = jax.block_until_ready(melgan_resstack(x, params))
    assert out.shape == (B, C, T)

    # Numerically matched reference (bf16 input + bf16 operands, f32 accumulation).
    ref_bf16 = jax.block_until_ready(
        melgan_resstack_ref(x, params, matmul_dtype=jnp.bfloat16))
    assert jnp.allclose(out, ref_bf16, rtol=1e-2, atol=1e-2), (
        "mismatch vs matched reference: "
        f"{float(jnp.max(jnp.abs(out - ref_bf16)))}")

    # Full-precision module semantics (loose: kernel uses bf16 MXU operands).
    ref_f32 = jax.block_until_ready(melgan_resstack_ref(x, params))
    assert jnp.allclose(out, ref_f32, rtol=2e-1, atol=2e-1), (
        "mismatch vs f32 reference: "
        f"{float(jnp.max(jnp.abs(out - ref_f32)))}")

    print("KERNEL_OK")
</pallas_src>

<mosaic_0001>
module attributes {stable_mosaic.version = 11 : i64} {
  func.func @_fused_stack_kernel(%arg0: i32, %arg1: i32, %arg2: memref<1x32x512xbf16, #tpu.memory_space<vmem>>, %arg3: memref<1x32x128xbf16, #tpu.memory_space<vmem>>, %arg4: memref<3x64x128xbf16, #tpu.memory_space<vmem>>, %arg5: memref<3x32x32xbf16, #tpu.memory_space<vmem>>, %arg6: memref<32x9xf32, #tpu.memory_space<vmem>>, %arg7: memref<1x32x512xf32, #tpu.memory_space<vmem>>, %arg8: memref<128x640xbf16, #tpu.memory_space<vmem>>) attributes {dimension_semantics = [#tpu.dimension_semantics<parallel>, #tpu.dimension_semantics<parallel>], iteration_bounds = array<i64: 2, 1>, scalar_prefetch = 0 : i64, scratch_operands = 1 : i64, tpu.core_type = #tpu.core_type<tc>, window_params = [{transform_indices = @transform_0, window_bounds = array<i64: 1, 32, 512>}, {transform_indices = @transform_1, window_bounds = array<i64: 1, 32, 128>}, {pipeline_mode = #tpu.pipeline_mode<synchronous>, transform_indices = @transform_2, window_bounds = array<i64: 3, 64, 128>}, {pipeline_mode = #tpu.pipeline_mode<synchronous>, transform_indices = @transform_3, window_bounds = array<i64: 3, 32, 32>}, {pipeline_mode = #tpu.pipeline_mode<synchronous>, transform_indices = @transform_4, window_bounds = array<i64: 32, 9>}, {transform_indices = @transform_5, window_bounds = array<i64: 1, 32, 512>}]} {
    %c0 = arith.constant 0 : index
    %c0_0 = arith.constant 0 : index
    %0 = vector.load %arg6[%c0, %c0_0] : memref<32x9xf32, #tpu.memory_space<vmem>>, vector<32x9xf32>
    %c0_1 = arith.constant 0 : index
    %c0_2 = arith.constant 0 : index
    %c0_3 = arith.constant 0 : index
    %1 = vector.load %arg2[%c0_1, %c0_2, %c0_3] : memref<1x32x512xbf16, #tpu.memory_space<vmem>>, vector<1x32x512xbf16>
    %2 = vector.shape_cast %1 : vector<1x32x512xbf16> to vector<32x512xbf16>
    %3 = arith.extf %2 : vector<32x512xbf16> to vector<32x512xf32>
    %c0_4 = arith.constant 0 : index
    %c0_5 = arith.constant 0 : index
    %c0_6 = arith.constant 0 : index
    %4 = vector.load %arg3[%c0_4, %c0_5, %c0_6] : memref<1x32x128xbf16, #tpu.memory_space<vmem>>, vector<1x32x128xbf16>
    %5 = vector.shape_cast %4 : vector<1x32x128xbf16> to vector<32x128xbf16>
    %6 = vector.extract_strided_slice %5 {offsets = [0, 0], sizes = [32, 26], strides = [1, 1]} : vector<32x128xbf16> to vector<32x26xbf16>
    %7 = arith.extf %6 : vector<32x26xbf16> to vector<32x26xf32>
    %cst = arith.constant 0.000000e+00 : f32
    %8 = vector.broadcast %cst : f32 to vector<32x512xf32>
    %9 = arith.cmpf ogt, %3, %8 : vector<32x512xf32>
    %cst_7 = arith.constant 2.000000e-01 : f32
    %10 = vector.broadcast %cst_7 : f32 to vector<32x512xf32>
    %11 = arith.mulf %10, %3 : vector<32x512xf32>
    %12 = arith.select %9, %3, %11 : vector<32x512xi1>, vector<32x512xf32>
    %cst_8 = arith.constant 0.000000e+00 : f32
    %13 = vector.broadcast %cst_8 : f32 to vector<32x26xf32>
    %14 = arith.cmpf ogt, %7, %13 : vector<32x26xf32>
    %cst_9 = arith.constant 2.000000e-01 : f32
    %15 = vector.broadcast %cst_9 : f32 to vector<32x26xf32>
    %16 = arith.mulf %15, %7 : vector<32x26xf32>
    %17 = arith.select %14, %7, %16 : vector<32x26xi1>, vector<32x26xf32>
    %18 = arith.truncf %17 : vector<32x26xf32> to vector<32x26xbf16>
    %19 = arith.truncf %7 : vector<32x26xf32> to vector<32x26xbf16>
    %20 = arith.truncf %12 : vector<32x512xf32> to vector<32x512xbf16>
    %c0_10 = arith.constant 0 : index
    %c0_11 = arith.constant 0 : index
    %21 = vector.load %arg8[%c0_10, %c0_11] : memref<128x640xbf16, #tpu.memory_space<vmem>>, vector<32x512xbf16>
    tpu.vector_store %arg8[%c0_10, %c0_11], %20 {strides = array<i32>} : memref<128x640xbf16, #tpu.memory_space<vmem>>, vector<32x512xbf16>,
    %c0_12 = arith.constant 0 : index
    %c512 = arith.constant 512 : index
    %22 = vector.load %arg8[%c0_12, %c512] : memref<128x640xbf16, #tpu.memory_space<vmem>>, vector<32x26xbf16>
    tpu.vector_store %arg8[%c0_12, %c512], %18 {strides = array<i32>} : memref<128x640xbf16, #tpu.memory_space<vmem>>, vector<32x26xbf16>,
    %c511_i32 = arith.constant 511 : i32
    %23 = tpu.dynamic_rotate %12 by %c511_i32 dim 1 : vector<32x512xf32>, i32 -> vector<32x512xf32>
    %24 = arith.truncf %23 : vector<32x512xf32> to vector<32x512xbf16>
    %c32 = arith.constant 32 : index
    %c0_13 = arith.constant 0 : index
    %25 = vector.load %arg8[%c32, %c0_13] : memref<128x640xbf16, #tpu.memory_space<vmem>>, vector<32x512xbf16>
    tpu.vector_store %arg8[%c32, %c0_13], %24 {strides = array<i32>} : memref<128x640xbf16, #tpu.memory_space<vmem>>, vector<32x512xbf16>,
    %c32_14 = arith.constant 32 : index
    %c511 = arith.constant 511 : index
    %26 = vector.load %arg8[%c32_14, %c511] : memref<128x640xbf16, #tpu.memory_space<vmem>>, vector<32x26xbf16>
    tpu.vector_store %arg8[%c32_14, %c511], %18 {strides = array<i32>} : memref<128x640xbf16, #tpu.memory_space<vmem>>, vector<32x26xbf16>,
    %c510_i32 = arith.constant 510 : i32
    %27 = tpu.dynamic_rotate %12 by %c510_i32 dim 1 : vector<32x512xf32>, i32 -> vector<32x512xf32>
    %28 = arith.truncf %27 : vector<32x512xf32> to vector<32x512xbf16>
    %c64 = arith.constant 64 : index
    %c0_15 = arith.constant 0 : index
    %29 = vector.load %arg8[%c64, %c0_15] : memref<128x640xbf16, #tpu.memory_space<vmem>>, vector<32x512xbf16>
    tpu.vector_store %arg8[%c64, %c0_15], %28 {strides = array<i32>} : memref<128x640xbf16, #tpu.memory_space<vmem>>, vector<32x512xbf16>,
    %c64_16 = arith.constant 64 : index
    %c510 = arith.constant 510 : index
    %30 = vector.load %arg8[%c64_16, %c510] : memref<128x640xbf16, #tpu.memory_space<vmem>>, vector<32x26xbf16>
    tpu.vector_store %arg8[%c64_16, %c510], %18 {strides = array<i32>} : memref<128x640xbf16, #tpu.memory_space<vmem>>, vector<32x26xbf16>,
    %c511_i32_17 = arith.constant 511 : i32
    %31 = tpu.dynamic_rotate %3 by %c511_i32_17 dim 1 : vector<32x512xf32>, i32 -> vector<32x512xf32>
    %32 = arith.truncf %31 : vector<32x512xf32> to vector<32x512xbf16>
    %c96 = arith.constant 96 : index
    %c0_18 = arith.constant 0 : index
    %33 = vector.load %arg8[%c96, %c0_18] : memref<128x640xbf16, #tpu.memory_space<vmem>>, vector<32x512xbf16>
    tpu.vector_store %arg8[%c96, %c0_18], %32 {strides = array<i32>} : memref<128x640xbf16, #tpu.memory_space<vmem>>, vector<32x512xbf16>,
    %c96_19 = arith.constant 96 : index
    %c511_20 = arith.constant 511 : index
    %34 = vector.load %arg8[%c96_19, %c511_20] : memref<128x640xbf16, #tpu.memory_space<vmem>>, vector<32x26xbf16>
    tpu.vector_store %arg8[%c96_19, %c511_20], %19 {strides = array<i32>} : memref<128x640xbf16, #tpu.memory_space<vmem>>, vector<32x26xbf16>,
    %c0_21 = arith.constant 0 : index
    %c0_22 = arith.constant 0 : index
    %35 = vector.load %arg8[%c0_21, %c0_22] : memref<128x640xbf16, #tpu.memory_space<vmem>>, vector<128x640xbf16>
    %c0_23 = arith.constant 0 : index
    %c0_24 = arith.constant 0 : index
    %c0_25 = arith.constant 0 : index
    %36 = vector.load %arg4[%c0_23, %c0_24, %c0_25] : memref<3x64x128xbf16, #tpu.memory_space<vmem>>, vector<1x64x128xbf16>
    %37 = vector.shape_cast %36 : vector<1x64x128xbf16> to vector<64x128xbf16>
    %cst_26 = arith.constant dense<0.000000e+00> : vector<64x640xf32>
    %38 = tpu.matmul %37, %35, %cst_26 {dimension_numbers = #tpu.dot_dimension_numbers<[1], [0], [0], [1], [0, 0, 1, 1], [], []>} : vector<64x128xbf16>, vector<128x640xbf16>, vector<64x640xf32> -> vector<64x640xf32>
    %39 = vector.extract_strided_slice %38 {offsets = [0, 0], sizes = [32, 640], strides = [1, 1]} : vector<64x640xf32> to vector<32x640xf32>
    %40 = vector.extract_strided_slice %0 {offsets = [0, 0], sizes = [32, 1], strides = [1, 1]} : vector<32x9xf32> to vector<32x1xf32>
    %41 = vector.broadcast %40 : vector<32x1xf32> to vector<32x640xf32>
    %42 = arith.addf %39, %41 : vector<32x640xf32>
    %cst_27 = arith.constant 0.000000e+00 : f32
    %43 = vector.broadcast %cst_27 : f32 to vector<32x640xf32>
    %44 = arith.cmpf ogt, %42, %43 : vector<32x640xf32>
    %cst_28 = arith.constant 2.000000e-01 : f32
    %45 = vector.broadcast %cst_28 : f32 to vector<32x640xf32>
    %46 = arith.mulf %45, %42 : vector<32x640xf32>
    %47 = arith.select %44, %42, %46 : vector<32x640xi1>, vector<32x640xf32>
    %48 = arith.truncf %47 : vector<32x640xf32> to vector<32x640xbf16>
    %c0_29 = arith.constant 0 : index
    %c0_30 = arith.constant 0 : index
    %c0_31 = arith.constant 0 : index
    %49 = vector.load %arg5[%c0_29, %c0_30, %c0_31] : memref<3x32x32xbf16, #tpu.memory_space<vmem>>, vector<1x32x32xbf16>
    %50 = vector.shape_cast %49 : vector<1x32x32xbf16> to vector<32x32xbf16>
    %cst_32 = arith.constant dense<0.000000e+00> : vector<32x640xf32>
    %51 = tpu.matmul %50, %48, %cst_32 {dimension_numbers = #tpu.dot_dimension_numbers<[1], [0], [0], [1], [0, 0, 1, 1], [], []>} : vector<32x32xbf16>, vector<32x640xbf16>, vector<32x640xf32> -> vector<32x640xf32>
    %52 = vector.extract_strided_slice %0 {offsets = [0, 1], sizes = [32, 1], strides = [1, 1]} : vector<32x9xf32> to vector<32x1xf32>
    %53 = vector.broadcast %52 : vector<32x1xf32> to vector<32x640xf32>
    %54 = arith.addf %51, %53 : vector<32x640xf32>
    %55 = vector.extract_strided_slice %38 {offsets = [32, 0], sizes = [32, 640], strides = [1, 1]} : vector<64x640xf32> to vector<32x640xf32>
    %56 = vector.extract_strided_slice %0 {offsets = [0, 2], sizes = [32, 1], strides = [1, 1]} : vector<32x9xf32> to vector<32x1xf32>
    %57 = vector.broadcast %56 : vector<32x1xf32> to vector<32x640xf32>
    %58 = arith.addf %55, %57 : vector<32x640xf32>
    %59 = arith.addf %58, %54 : vector<32x640xf32>
    %cst_33 = arith.constant 0.000000e+00 : f32
    %60 = vector.broadcast %cst_33 : f32 to vector<32x640xf32>
    %61 = arith.cmpf ogt, %59, %60 : vector<32x640xf32>
    %cst_34 = arith.constant 2.000000e-01 : f32
    %62 = vector.broadcast %cst_34 : f32 to vector<32x640xf32>
    %63 = arith.mulf %62, %59 : vector<32x640xf32>
    %64 = arith.select %61, %59, %63 : vector<32x640xi1>, vector<32x640xf32>
    %65 = arith.truncf %64 : vector<32x640xf32> to vector<32x640xbf16>
    %c0_35 = arith.constant 0 : index
    %c0_36 = arith.constant 0 : index
    %66 = vector.load %arg8[%c0_35, %c0_36] : memref<128x640xbf16, #tpu.memory_space<vmem>>, vector<32x640xbf16>
    tpu.vector_store %arg8[%c0_35, %c0_36], %65 {strides = array<i32>} : memref<128x640xbf16, #tpu.memory_space<vmem>>, vector<32x640xbf16>,
    %c637_i32 = arith.constant 637 : i32
    %67 = tpu.dynamic_rotate %64 by %c637_i32 dim 1 : vector<32x640xf32>, i32 -> vector<32x640xf32>
    %68 = arith.truncf %67 : vector<32x640xf32> to vector<32x640xbf16>
    %c32_37 = arith.constant 32 : index
    %c0_38 = arith.constant 0 : index
    %69 = vector.load %arg8[%c32_37, %c0_38] : memref<128x640xbf16, #tpu.memory_space<vmem>>, vector<32x640xbf16>
    tpu.vector_store %arg8[%c32_37, %c0_38], %68 {strides = array<i32>} : memref<128x640xbf16, #tpu.memory_space<vmem>>, vector<32x640xbf16>,
    %c634_i32 = arith.constant 634 : i32
    %70 = tpu.dynamic_rotate %64 by %c634_i32 dim 1 : vector<32x640xf32>, i32 -> vector<32x640xf32>
    %71 = arith.truncf %70 : vector<32x640xf32> to vector<32x640xbf16>
    %c64_39 = arith.constant 64 : index
    %c0_40 = arith.constant 0 : index
    %72 = vector.load %arg8[%c64_39, %c0_40] : memref<128x640xbf16, #tpu.memory_space<vmem>>, vector<32x640xbf16>
    tpu.vector_store %arg8[%c64_39, %c0_40], %71 {strides = array<i32>} : memref<128x640xbf16, #tpu.memory_space<vmem>>, vector<32x640xbf16>,
    %c637_i32_41 = arith.constant 637 : i32
    %73 = tpu.dynamic_rotate %59 by %c637_i32_41 dim 1 : vector<32x640xf32>, i32 -> vector<32x640xf32>
    %74 = arith.truncf %73 : vector<32x640xf32> to vector<32x640xbf16>
    %c96_42 = arith.constant 96 : index
    %c0_43 = arith.constant 0 : index
    %75 = vector.load %arg8[%c96_42, %c0_43] : memref<128x640xbf16, #tpu.memory_space<vmem>>, vector<32x640xbf16>
    tpu.vector_store %arg8[%c96_42, %c0_43], %74 {strides = array<i32>} : memref<128x640xbf16, #tpu.memory_space<vmem>>, vector<32x640xbf16>,
    %c0_44 = arith.constant 0 : index
    %c0_45 = arith.constant 0 : index
    %76 = vector.load %arg8[%c0_44, %c0_45] : memref<128x640xbf16, #tpu.memory_space<vmem>>, vector<128x640xbf16>
    %c1 = arith.constant 1 : index
    %c0_46 = arith.constant 0 : index
    %c0_47 = arith.constant 0 : index
    %77 = vector.load %arg4[%c1, %c0_46, %c0_47] : memref<3x64x128xbf16, #tpu.memory_space<vmem>>, vector<1x64x128xbf16>
    %78 = vector.shape_cast %77 : vector<1x64x128xbf16> to vector<64x128xbf16>
    %cst_48 = arith.constant dense<0.000000e+00> : vector<64x640xf32>
    %79 = tpu.matmul %78, %76, %cst_48 {dimension_numbers = #tpu.dot_dimension_numbers<[1], [0], [0], [1], [0, 0, 1, 1], [], []>} : vector<64x128xbf16>, vector<128x640xbf16>, vector<64x640xf32> -> vector<64x640xf32>
    %80 = vector.extract_strided_slice %79 {offsets = [0, 0], sizes = [32, 640], strides = [1, 1]} : vector<64x640xf32> to vector<32x640xf32>
    %81 = vector.extract_strided_slice %0 {offsets = [0, 3], sizes = [32, 1], strides = [1, 1]} : vector<32x9xf32> to vector<32x1xf32>
    %82 = vector.broadcast %81 : vector<32x1xf32> to vector<32x640xf32>
    %83 = arith.addf %80, %82 : vector<32x640xf32>
    %cst_49 = arith.constant 0.000000e+00 : f32
    %84 = vector.broadcast %cst_49 : f32 to vector<32x640xf32>
    %85 = arith.cmpf ogt, %83, %84 : vector<32x640xf32>
    %cst_50 = arith.constant 2.000000e-01 : f32
    %86 = vector.broadcast %cst_50 : f32 to vector<32x640xf32>
    %87 = arith.mulf %86, %83 : vector<32x640xf32>
    %88 = arith.select %85, %83, %87 : vector<32x640xi1>, vector<32x640xf32>
    %89 = arith.truncf %88 : vector<32x640xf32> to vector<32x640xbf16>
    %c1_51 = arith.constant 1 : index
    %c0_52 = arith.constant 0 : index
    %c0_53 = arith.constant 0 : index
    %90 = vector.load %arg5[%c1_51, %c0_52, %c0_53] : memref<3x32x32xbf16, #tpu.memory_space<vmem>>, vector<1x32x32xbf16>
    %91 = vector.shape_cast %90 : vector<1x32x32xbf16> to vector<32x32xbf16>
    %cst_54 = arith.constant dense<0.000000e+00> : vector<32x640xf32>
    %92 = tpu.matmul %91, %89, %cst_54 {dimension_numbers = #tpu.dot_dimension_numbers<[1], [0], [0], [1], [0, 0, 1, 1], [], []>} : vector<32x32xbf16>, vector<32x640xbf16>, vector<32x640xf32> -> vector<32x640xf32>
    %93 = vector.extract_strided_slice %0 {offsets = [0, 4], sizes = [32, 1], strides = [1, 1]} : vector<32x9xf32> to vector<32x1xf32>
    %94 = vector.broadcast %93 : vector<32x1xf32> to vector<32x640xf32>
    %95 = arith.addf %92, %94 : vector<32x640xf32>
    %96 = vector.extract_strided_slice %79 {offsets = [32, 0], sizes = [32, 640], strides = [1, 1]} : vector<64x640xf32> to vector<32x640xf32>
    %97 = vector.extract_strided_slice %0 {offsets = [0, 5], sizes = [32, 1], strides = [1, 1]} : vector<32x9xf32> to vector<32x1xf32>
    %98 = vector.broadcast %97 : vector<32x1xf32> to vector<32x640xf32>
    %99 = arith.addf %96, %98 : vector<32x640xf32>
    %100 = arith.addf %99, %95 : vector<32x640xf32>
    %cst_55 = arith.constant 0.000000e+00 : f32
    %101 = vector.broadcast %cst_55 : f32 to vector<32x640xf32>
    %102 = arith.cmpf ogt, %100, %101 : vector<32x640xf32>
    %cst_56 = arith.constant 2.000000e-01 : f32
    %103 = vector.broadcast %cst_56 : f32 to vector<32x640xf32>
    %104 = arith.mulf %103, %100 : vector<32x640xf32>
    %105 = arith.select %102, %100, %104 : vector<32x640xi1>, vector<32x640xf32>
    %106 = arith.truncf %105 : vector<32x640xf32> to vector<32x640xbf16>
    %c0_57 = arith.constant 0 : index
    %c0_58 = arith.constant 0 : index
    %107 = vector.load %arg8[%c0_57, %c0_58] : memref<128x640xbf16, #tpu.memory_space<vmem>>, vector<32x640xbf16>
    tpu.vector_store %arg8[%c0_57, %c0_58], %106 {strides = array<i32>} : memref<128x640xbf16, #tpu.memory_space<vmem>>, vector<32x640xbf16>,
    %c631_i32 = arith.constant 631 : i32
    %108 = tpu.dynamic_rotate %105 by %c631_i32 dim 1 : vector<32x640xf32>, i32 -> vector<32x640xf32>
    %109 = arith.truncf %108 : vector<32x640xf32> to vector<32x640xbf16>
    %c32_59 = arith.constant 32 : index
    %c0_60 = arith.constant 0 : index
    %110 = vector.load %arg8[%c32_59, %c0_60] : memref<128x640xbf16, #tpu.memory_space<vmem>>, vector<32x640xbf16>
    tpu.vector_store %arg8[%c32_59, %c0_60], %109 {strides = array<i32>} : memref<128x640xbf16, #tpu.memory_space<vmem>>, vector<32x640xbf16>,
    %c622_i32 = arith.constant 622 : i32
    %111 = tpu.dynamic_rotate %105 by %c622_i32 dim 1 : vector<32x640xf32>, i32 -> vector<32x640xf32>
    %112 = arith.truncf %111 : vector<32x640xf32> to vector<32x640xbf16>
    %c64_61 = arith.constant 64 : index
    %c0_62 = arith.constant 0 : index
    %113 = vector.load %arg8[%c64_61, %c0_62] : memref<128x640xbf16, #tpu.memory_space<vmem>>, vector<32x640xbf16>
    tpu.vector_store %arg8[%c64_61, %c0_62], %112 {strides = array<i32>} : memref<128x640xbf16, #tpu.memory_space<vmem>>, vector<32x640xbf16>,
    %c631_i32_63 = arith.constant 631 : i32
    %114 = tpu.dynamic_rotate %100 by %c631_i32_63 dim 1 : vector<32x640xf32>, i32 -> vector<32x640xf32>
    %115 = arith.truncf %114 : vector<32x640xf32> to vector<32x640xbf16>
    %c96_64 = arith.constant 96 : index
    %c0_65 = arith.constant 0 : index
    %116 = vector.load %arg8[%c96_64, %c0_65] : memref<128x640xbf16, #tpu.memory_space<vmem>>, vector<32x640xbf16>
    tpu.vector_store %arg8[%c96_64, %c0_65], %115 {strides = array<i32>} : memref<128x640xbf16, #tpu.memory_space<vmem>>, vector<32x640xbf16>,
    %c0_66 = arith.constant 0 : index
    %c0_67 = arith.constant 0 : index
    %117 = vector.load %arg8[%c0_66, %c0_67] : memref<128x640xbf16, #tpu.memory_space<vmem>>, vector<128x512xbf16>
    %c2 = arith.constant 2 : index
    %c0_68 = arith.constant 0 : index
    %c0_69 = arith.constant 0 : index
    %118 = vector.load %arg4[%c2, %c0_68, %c0_69] : memref<3x64x128xbf16, #tpu.memory_space<vmem>>, vector<1x64x128xbf16>
    %119 = vector.shape_cast %118 : vector<1x64x128xbf16> to vector<64x128xbf16>
    %cst_70 = arith.constant dense<0.000000e+00> : vector<64x512xf32>
    %120 = tpu.matmul %119, %117, %cst_70 {dimension_numbers = #tpu.dot_dimension_numbers<[1], [0], [0], [1], [0, 0, 1, 1], [], []>} : vector<64x128xbf16>, vector<128x512xbf16>, vector<64x512xf32> -> vector<64x512xf32>
    %121 = vector.extract_strided_slice %120 {offsets = [0, 0], sizes = [32, 512], strides = [1, 1]} : vector<64x512xf32> to vector<32x512xf32>
    %122 = vector.extract_strided_slice %0 {offsets = [0, 6], sizes = [32, 1], strides = [1, 1]} : vector<32x9xf32> to vector<32x1xf32>
    %123 = vector.broadcast %122 : vector<32x1xf32> to vector<32x512xf32>
    %124 = arith.addf %121, %123 : vector<32x512xf32>
    %cst_71 = arith.constant 0.000000e+00 : f32
    %125 = vector.broadcast %cst_71 : f32 to vector<32x512xf32>
    %126 = arith.cmpf ogt, %124, %125 : vector<32x512xf32>
    %cst_72 = arith.constant 2.000000e-01 : f32
    %127 = vector.broadcast %cst_72 : f32 to vector<32x512xf32>
    %128 = arith.mulf %127, %124 : vector<32x512xf32>
    %129 = arith.select %126, %124, %128 : vector<32x512xi1>, vector<32x512xf32>
    %130 = arith.truncf %129 : vector<32x512xf32> to vector<32x512xbf16>
    %c2_73 = arith.constant 2 : index
    %c0_74 = arith.constant 0 : index
    %c0_75 = arith.constant 0 : index
    %131 = vector.load %arg5[%c2_73, %c0_74, %c0_75] : memref<3x32x32xbf16, #tpu.memory_space<vmem>>, vector<1x32x32xbf16>
    %132 = vector.shape_cast %131 : vector<1x32x32xbf16> to vector<32x32xbf16>
    %cst_76 = arith.constant dense<0.000000e+00> : vector<32x512xf32>
    %133 = tpu.matmul %132, %130, %cst_76 {dimension_numbers = #tpu.dot_dimension_numbers<[1], [0], [0], [1], [0, 0, 1, 1], [], []>} : vector<32x32xbf16>, vector<32x512xbf16>, vector<32x512xf32> -> vector<32x512xf32>
    %134 = vector.extract_strided_slice %0 {offsets = [0, 7], sizes = [32, 1], strides = [1, 1]} : vector<32x9xf32> to vector<32x1xf32>
    %135 = vector.broadcast %134 : vector<32x1xf32> to vector<32x512xf32>
    %136 = arith.addf %133, %135 : vector<32x512xf32>
    %137 = vector.extract_strided_slice %120 {offsets = [32, 0], sizes = [32, 512], strides = [1, 1]} : vector<64x512xf32> to vector<32x512xf32>
    %138 = vector.extract_strided_slice %0 {offsets = [0, 8], sizes = [32, 1], strides = [1, 1]} : vector<32x9xf32> to vector<32x1xf32>
    %139 = vector.broadcast %138 : vector<32x1xf32> to vector<32x512xf32>
    %140 = arith.addf %137, %139 : vector<32x512xf32>
    %141 = arith.addf %140, %136 : vector<32x512xf32>
    %c0_77 = arith.constant 0 : index
    %c0_78 = arith.constant 0 : index
    %c0_79 = arith.constant 0 : index
    %142 = vector.load %arg7[%c0_77, %c0_78, %c0_79] : memref<1x32x512xf32, #tpu.memory_space<vmem>>, vector<1x32x512xf32>
    %143 = vector.shape_cast %142 : vector<1x32x512xf32> to vector<32x512xf32>
    %144 = vector.shape_cast %141 : vector<32x512xf32> to vector<1x32x512xf32>
    tpu.vector_store %arg7[%c0_77, %c0_78, %c0_79], %144 {strides = array<i32>} : memref<1x32x512xf32, #tpu.memory_space<vmem>>, vector<1x32x512xf32>,
    return
  }
  func.func @transform_0(%arg0: i32, %arg1: i32) -> (i32, i32, i32) {
    %c0_i32 = arith.constant 0 : i32
    %c0_i32_0 = arith.constant 0 : i32
    return %arg0, %c0_i32, %arg1 : i32, i32, i32
  }
  func.func @transform_1(%arg0: i32, %arg1: i32) -> (i32, i32, i32) {
    %c1_i32 = arith.constant 1 : i32
    %0 = arith.addi %arg1, %c1_i32 : i32
    %c4_i32 = arith.constant 4 : i32
    %1 = arith.muli %0, %c4_i32 : i32
    %c0_i32 = arith.constant 0 : i32
    %c0_i32_0 = arith.constant 0 : i32
    return %arg0, %c0_i32, %1 : i32, i32, i32
  }
  func.func @transform_2(%arg0: i32, %arg1: i32) -> (i32, i32, i32) {
    %c0_i32 = arith.constant 0 : i32
    %c0_i32_0 = arith.constant 0 : i32
    %c0_i32_1 = arith.constant 0 : i32
    %c0_i32_2 = arith.constant 0 : i32
    return %c0_i32, %c0_i32_0, %c0_i32_1 : i32, i32, i32
  }
  func.func @transform_3(%arg0: i32, %arg1: i32) -> (i32, i32, i32) {
    %c0_i32 = arith.constant 0 : i32
    %c0_i32_0 = arith.constant 0 : i32
    %c0_i32_1 = arith.constant 0 : i32
    %c0_i32_2 = arith.constant 0 : i32
    return %c0_i32, %c0_i32_0, %c0_i32_1 : i32, i32, i32
  }
  func.func @transform_4(%arg0: i32, %arg1: i32) -> (i32, i32) {
    %c0_i32 = arith.constant 0 : i32
    %c0_i32_0 = arith.constant 0 : i32
    %c0_i32_1 = arith.constant 0 : i32
    return %c0_i32, %c0_i32_0 : i32, i32
  }
  func.func @transform_5(%arg0: i32, %arg1: i32) -> (i32, i32, i32) {
    %c0_i32 = arith.constant 0 : i32
    %c0_i32_0 = arith.constant 0 : i32
    return %arg0, %c0_i32, %arg1 : i32, i32, i32
  }
}

</mosaic_0001>

<bundles_post_ra>
// kernel: tpu_custom_call.1
= control target key start
LH: loop header
LB: loop body
LE: loop exit
PB: predicated region body
PF: predicated region fallthrough
CT: control target
= control target key end

     0   :  { %s6890_s0 = inlined_call_operand.hbm [shape: bf16[2,32,640], index: 0, kind: input, shape index: {}]   ;;  %s6891_s1 = inlined_call_operand.hbm [shape: bf16[2,32,640], index: 1, kind: input, shape index: {}]   ;;  %s6892_s2 = inlined_call_operand.hbm [shape: bf16[3,64,128], index: 2, kind: input, shape index: {}]   ;;  %s6893_s3 = inlined_call_operand.vmem [shape: bf16[3,32,32], index: 3, kind: input, shape index: {}]   ;;  %s6894_s4 = inlined_call_operand.vmem [shape: f32[32,9], index: 4, kind: input, shape index: {}]   ;;  %s6895_s5 = inlined_call_operand.hbm [shape: f32[2,32,512], index: 5, kind: output, shape index: {}]  }
   0x1   :  { %6905 = sst [smem:[#allocation21_spill]] %s6890_s0 }
   0x2   :  { %6906 = sst [smem:[#allocation22_spill]] %s6892_s2 }
   0x3   :  { %10 = vsyncpa [#allocation4], 0 }
   0x4   :  { %12 = vsyncpa [#allocation4 + $0x1], 0 }
   0x5   :  { %13 = vsyncpa [#allocation7], 0 }
   0x6   :  { %15 = vsyncpa [#allocation7 + $0x1], 0 }
   0x7   :  { %16 = vsyncpa [#allocation5], 0 }
   0x8   :  { %18 = vsyncpa [#allocation5 + $0x1], 0  ;;  %s5145_s18 = smov 0   ;;  %s5147_s19 = smov 0  }
   0x9   :  { %s5149_s20 = smov 0   ;;  %s5151_s21 = smov 0  }
   0xa   :  { %s5153_s22 = smov 0   ;;  %s5155_s23 = smov 0  }
   0xb LB: > { %6907 = sst [smem:[#allocation14_spill]] %s5070_s18  ;;  %s5176_s24 = sadd.s32 4294967295, %s5090_s23   ;;  %s5090_s23 = sphi %s5155_s23, %s24_s23   ;;  %s5086_s22 = sphi %s5153_s22, %s6933_s22   ;;  %s5082_s21 = sphi %s5151_s21, %s6932_s21   ;;  %s5078_s20 = sphi %s5149_s20, %s6931_s20   ;;  %s5074_s19 = sphi %s5147_s19, %s6935_s19   ;;  %s5070_s18 = sphi %s5145_s18, %s6934_s18  }
   0xc   : > { %6908 = sst [smem:[#allocation15_spill]] %s5078_s20  ;;  %s3635_s25 = sadd.s32 4294967294, %s5090_s23  }
   0xd   : > { %6909 = sst [smem:[#allocation16_spill]] %s5086_s22  ;;  %p58_p0 = scmp.ne.s32.totalorder %s5074_s19, %s5070_s18 }
   0xe   : > { %p59_p1 = scmp.eq.s32.totalorder %s5176_s24, 0  ;;  %p179_p2 = scmp.eq.s32.totalorder %s5176_s24, 1 }
   0xf   : > { %p185_p3 = scmp.eq.s32.totalorder %s3635_s25, 1  ;;  %p3636_p5 = scmp.ge.s32.totalorder %s5090_s23, 1 }
  0x10   : > { %p5185_p4 = por %p59_p1, %p58_p0  ;;  %p192_p7 = scmp.lt.s32.totalorder %s5090_s23, 3 }
  0x11   : > { %p5190_p6 = por %p185_p3, %p58_p0  ;;  %s6913_s2 = sld [smem:[#allocation22_spill]] }
  0x12   : > { %p5198_p8 = pnand %p3636_p5, %p192_p7  ;;  %s5092_s7 = smov [#allocation8]  }
  0x13   : > { %s6911_s27 = scalar_select %p5190_p6, 1, 0 }
  0x14   : > { %p4361_p9 = pneg %p5198_p8  ;;  %s205_s8 = sshll.u32 %s5092_s7, 4  ;;  %s206_s8 = int_to_ptr.vmem [resolvable:$true] %s205_s8 }
  0x15   : > { %6912 = sst [smem:[#allocation17_spill]] %s6911_s27  ;;  %p3638_p11 = scmp.ge.s32.totalorder %s5090_s23, 2 }
  0x16   : > { %p4362_p10 = pnand %p4361_p9, %p59_p1  ;;  %s6896_s9 = smov 64  }
  0x17   : > { %s203_s30 = sshll.u32 %s6913_s2, 4  ;;  %s6897_s10 = smov 4   ;;  %s204_s30 = int_to_ptr.hbm [resolvable:$true] %s203_s30 }
  0x18   : > { %4364 = dma.hbm_to_vmem [thread:$0]  (!%p4362_p10), %s204_s30, 1536, %s206_s8, [#allocation7], %s6896_s9, %s6896_s9, %s6897_s10  }
  0x19   : > { %s36_s11 = sadd.s32 1, %s5086_s22  ;;  %s45_s12 = sadd.s32 1, %s5078_s20 }
  0x1a   : > { %p38_p12 = scmp.ge.s32.totalorder %s36_s11, 2  ;;  %p52_p13 = scmp.ne.s32.totalorder %s5078_s20, %s5074_s19 }
  0x1b   : > { %p53_p0 = scmp.eq.s32.totalorder %s5090_s23, 0  ;;  %p4377_p7 = scmp.lt.s32.totalorder %s5090_s23, 2 }
  0x1c   : > { %s6937_s11 = smov (%p38_p12, %s36_s11), 0  ;;  %p5219_p5 = por %p179_p2, %p52_p13 }
  0x1d   : > { %6915 = sst [smem:[#allocation18_spill]] %s6937_s11  ;;  %p54_p3 = por %p53_p0, %p52_p13 }
  0x1e   : > { %s6916_s13 = scalar_select %p5219_p5, 1, 0 }
  0x1f   : > { %s40_s14 = ssub.s32 %s5086_s22, %s6937_s11  ;;  %s225_s15 = sand.u32 1, %s5078_s20  }
  0x20   : > { %6917 = sst [smem:[#allocation19_spill]] %s6916_s13  ;;  %p43_p9 = scmp.eq.s32.totalorder %s40_s14, 0 }
  0x21   : > { %s3639_s16 = sshll.u32 %s225_s15, 6  ;;  %s4350_s25 = smul.u32 80, %s5086_s22 }
  0x22   : > { %s5228_s17 = scalar_select %p43_p9, %s5078_s20, %s45_s12  }
  0x23   : > { %s229_s28 = scalar_lea.vmem [#allocation3], %s3639_s16  ;;  %p5231_p10 = pnand %p4377_p7, %p54_p3 }
  0x24   : > { %6918 = sst [smem:[#allocation20_spill]] %s5228_s17  ;;  %s247_s29 = sshll.u32 %s229_s28, 4  ;;  %s248_s29 = int_to_ptr.vmem [resolvable:$true] %s247_s29 }
  0x25   : > { %s6920_s0 = sld [smem:[#allocation21_spill]]  ;;  %s226_s14 = scalar_lea.sflag [#allocation4], %s225_s15 }
  0x26   : > { %s5095_s2 = smov 320   ;;  %s5096_s12 = smov 256  }
  0x27   : > { %s5097_s11 = smov 16   ;;  %s257_s16 = sand.u32 1, %s5090_s23  }
  0x28   : > { %s3641_s28 = sshll.u32 %s225_s15, 4  ;;  %s3556_s20 = scalar_lea.hbm %s6891_s1, %s4350_s25 }
  0x29   : > { %s261_s27 = scalar_lea.vmem [#allocation6], %s3641_s28  ;;  %s3557_s8 = scalar_lea.hbm %s3556_s20, 16 }
  0x2a   : > { %s272_s7 = sshll.u32 %s261_s27, 4  ;;  %s6921_s18 = smov 4   ;;  %s273_s7 = int_to_ptr.vmem [resolvable:$true] %s272_s7 }
  0x2b   : > { %s242_s9 = scalar_lea.hbm %s6920_s0, %s4350_s25  ;;  %s270_s0 = sshll.u32 %s3557_s8, 4  ;;  %s271_s0 = int_to_ptr.hbm [resolvable:$true] %s270_s0 }
  0x2c   : > { %s245_s10 = sshll.u32 %s242_s9, 4  ;;  %s258_s9 = scalar_lea.sflag [#allocation7], %s257_s16  ;;  %s246_s10 = int_to_ptr.hbm [resolvable:$true] %s245_s10 }
  0x2d   : > { %4368 = dma.hbm_to_vmem [thread:$0]  (!%p5231_p10), %s246_s10, 1024, %s248_s29, %s226_s14, %s5095_s2, %s5096_s12, %s5097_s11  }
  0x2e   : > { %s6922_s13 = smov 64   ;;  %284 = sbr.rel (%p5198_p8) target bundleno = 1641 (0x669), region = 40 }
  0x2f   : > { %4371 = dma.hbm_to_vmem [thread:$0]  (!%p5231_p10), %s271_s0, 256, %s273_s7, %s258_s9, %s5095_s2, %s6922_s13, %s6921_s18  }
  0x30   : > { %s5251_s10 = sand.u32 (!%p5198_p8), 1, %s5074_s19  }
  0x31   : > { %s3644_s22 = sshll.u32 (!%p5198_p8), %s5251_s10, 6  ;;  %s287_s27 = scalar_lea.sflag (!%p5198_p8), [#allocation4], %s5251_s10 }
  0x32   : > { %s290_s20 = scalar_lea.vmem (!%p5198_p8), [#allocation3], %s3644_s22 }
  0x33   : > { %5053 = dma.done.wait (%p5185_p4), %s287_s27, 1024  }
  0x34   : > { %5055 = vsyncadd (%p5185_p4), %s287_s27, 4294966272  ;;  %s296_s0 = sand.u32 1, %s5176_s24   ;;  %s3645_s2 = sshll.u32 %s5251_s10, 4 }
  0x35   : > { %s297_s18 = scalar_lea.sflag [#allocation7], %s296_s0  ;;  %s5261_s6 = scalar_lea.vmem [#allocation6], %s3645_s2 }
  0x36   : > { %5057 = dma.done.wait (%p5185_p4), %s297_s18, 256  }
  0x37   : > { %5059 = vsyncadd (%p5185_p4), %s297_s18, 4294967040 }
  0x38   : > { %5061 = dma.done.wait (%p59_p1), [#allocation7], 1536  }
  0x39   : > { %5063 = vsyncadd (%p59_p1), [#allocation7], 4294965760  ;;  %v356_v0 = vld [vmem:[%s290_s20 + $0x28] sm:$0xff]  ;;  %v5271_v1 = vld [vmem:[%s290_s20 + $0x38] sm:$0xff]  ;;  %s5098_s24 = smov 127   ;;  %s5099_s26 = smov 126  }
  0x3a   : > { %v355_v2 = vld [vmem:[%s290_s20 + $0x20] sm:$0xff]  ;;  %v369_v3 = vunpack.c.l.bf16 %v356_v0  ;;  %v373_v4 = vunpack.c.l.bf16 %v5271_v1  ;;  %v357_v5 = vld [vmem:[%s290_s20 + $0x30] sm:$0xff]  ;;  %v5274_v15 = vld [vmem:[%s290_s20 + $0x8] sm:$0xff]  ;;  %v370_v42 = vunpack.c.h.bf16 %v356_v0  ;;  %v374_v49 = vunpack.c.h.bf16 %v5271_v1  ;;  %s5103_s8 = smov 125   ;;  %s5104_s9 = smov 122  }
  0x3b   : > { %v351_v6 = vld [vmem:[%s290_s20] sm:$0xff]  ;;  %v353_v7 = vld [vmem:[%s290_s20 + $0x10] sm:$0xff]  ;;  %v367_v8 = vunpack.c.l.bf16 %v355_v2  ;;  %v368_v9 = vunpack.c.h.bf16 %v355_v2  ;;  %v371_v10 = vunpack.c.l.bf16 %v357_v5  ;;  %v372_v12 = vunpack.c.h.bf16 %v357_v5  ;;  %v5276_v16 = vld [vmem:[%s290_s20 + $0x18] sm:$0xff]  ;;  %s5108_s17 = smov 119   ;;  %s5109_s25 = smov 110  }
  0x3c   : > { %v4461_v11 = vpack.i.bf16 %v373_v4, %v369_v3  ;;  %v360_v13 = vunpack.c.h.bf16 %v351_v6  ;;  %v364_v14 = vunpack.c.h.bf16 %v353_v7  ;;  %v363_v18 = vunpack.c.l.bf16 %v353_v7  ;;  %s3647_s0 = sshll.u32 %s5251_s10, 7  ;;  %s4339_s18 = sshll.u32 %s5082_s21, 7 }
  0x3d   : > { %v4451_v17 = vpack.i.bf16 %v371_v10, %v367_v8  ;;  %v359_v19 = vunpack.c.l.bf16 %v351_v6  ;;  %v5281_v21 = vunpack.c.l.bf16 %v5274_v15  ;;  %v5284_v22 = vunpack.c.l.bf16 %v5276_v16  ;;  %s6817_s2 = scalar_lea.vmem [#allocation9], %s3647_s0  ;;  %s3494_s21 = scalar_lea.sflag [#allocation5], %s5251_s10 }
  0x3e   : > { %4462 = vrot.lane.b32.xlu1 %v4461_v11, %s5098_s24  ;;  %v4471_v20 = vpack.i.bf16 %v364_v14, %v360_v13  ;;  %v4456_v23 = vpack.i.bf16 %v372_v12, %v368_v9  ;;  %v407_v24 = vmul.f32 0.2, %v367_v8  ;;  %v411_v25 = vmul.f32 0.2, %v371_v10  ;;  %s3508_s11 = sshll.u32 %s6817_s2, 4  ;;  %s5020_s14 = scalar_lea.hbm %s6895_s5, 256  ;;  %s3509_s11 = int_to_ptr.vmem [resolvable:$true] %s3508_s11 }
  0x3f   : > { %4452 = vrot.lane.b32.xlu0 %v4451_v17, %s5098_s24  ;;  %v4466_v26 = vpack.i.bf16 %v363_v18, %v359_v19  ;;  %vm391_vm0 = vcmp.gt.f32.partialorder %v367_v8, 0.0  ;;  %vm395_vm1 = vcmp.gt.f32.partialorder %v371_v10, 0.0  ;;  %vm392_vm2 = vcmp.gt.f32.partialorder %v368_v9, 0.0 }
  0x40   : > { %4472 = vrot.lane.b32.xlu2 %v4471_v20, %s5098_s24  ;;  %vm393_vm3 = vcmp.gt.f32.partialorder %v369_v3, 0.0  ;;  %vm397_vm4 = vcmp.gt.f32.partialorder %v373_v4, 0.0  ;;  %vm396_vm5 = vcmp.gt.f32.partialorder %v372_v12, 0.0  ;;  %v408_v27 = vmul.f32 0.2, %v368_v9 }
  0x41   : > { %v4476_v28 = vpack.i.bf16 %v5284_v22, %v5281_v21  ;;  %v409_v29 = vmul.f32 0.2, %v369_v3  ;;  %v413_v30 = vmul.f32 0.2, %v373_v4  ;;  %v412_v31 = vmul.f32 0.2, %v372_v12 }
  0x42   : > { %v423_v32 = vsel %vm391_vm0, %v367_v8, %v407_v24  ;;  %v427_v33 = vsel %vm395_vm1, %v371_v10, %v411_v25  ;;  %v424_v34 = vsel %vm392_vm2, %v368_v9, %v408_v27  ;;  %vm384_vm6 = vcmp.gt.f32.partialorder %v360_v13, 0.0  ;;  %v376_v20 = vld [vmem:[%s5261_s6 + $0x4] sm:$0xf] }
  0x43   : > { %v428_v35 = vsel %vm396_vm5, %v372_v12, %v412_v31  ;;  %v451_v36 = vpack.c.bf16 %v424_v34, %v423_v32  ;;  %v400_v37 = vmul.f32 0.2, %v360_v13  ;;  %v404_v38 = vmul.f32 0.2, %v364_v14 }
  0x44   : > { %v453_v39 = vpack.c.bf16 %v428_v35, %v427_v33  ;;  %vm388_vm7 = vcmp.gt.f32.partialorder %v364_v14, 0.0  ;;  %vm383_vm8 = vcmp.gt.f32.partialorder %v359_v19, 0.0  ;;  %vm387_vm9 = vcmp.gt.f32.partialorder %v363_v18, 0.0 }
  0x45   : > { %459 = vst [vmem:[#allocation2 + $0x28] sm:$0xff] %v451_v36  ;;  %v399_v40 = vmul.f32 0.2, %v359_v19  ;;  %v403_v41 = vmul.f32 0.2, %v363_v18  ;;  %v425_v43 = vsel %vm393_vm3, %v369_v3, %v409_v29  ;;  %v429_v44 = vsel %vm397_vm4, %v373_v4, %v413_v30 }
  0x46   : > { %4467 = vrot.lane.b32.xlu1 %v4466_v26, %s5098_s24  ;;  %461 = vst [vmem:[#allocation2 + $0x3c] sm:$0xff] %v453_v39  ;;  %v416_v45 = vsel %vm384_vm6, %v360_v13, %v400_v37  ;;  %v420_v46 = vsel %vm388_vm7, %v364_v14, %v404_v38  ;;  %v4486_v50 = vpack.i.bf16 %v428_v35, %v424_v34  ;;  %vm394_vm10 = vcmp.gt.f32.partialorder %v370_v42, 0.0  ;;  %v377_v14 = vld [vmem:[%s5261_s6 + $0x8] sm:$0xf] }
  0x47   : > { %4457 = vrot.lane.b32.xlu0 %v4456_v23, %s5098_s24  ;;  %v415_v47 = vsel %vm383_vm8, %v359_v19, %v399_v40  ;;  %v419_v48 = vsel %vm387_vm9, %v363_v18, %v403_v41  ;;  %v4481_v53 = vpack.i.bf16 %v427_v33, %v423_v32  ;;  %v4491_v54 = vpack.i.bf16 %v429_v44, %v425_v43  ;;  %v378_v18 = vld [vmem:[%s5261_s6 + $0xc] sm:$0xf] }
  0x48   : > { %4477 = vrot.lane.b32.xlu2 %v4476_v28, %s5098_s24  ;;  %v449_v51 = vpack.c.bf16 %v420_v46, %v419_v48  ;;  %v447_v52 = vpack.c.bf16 %v416_v45, %v415_v47  ;;  %vm398_vm11 = vcmp.gt.f32.partialorder %v374_v49, 0.0  ;;  %v410_v55 = vmul.f32 0.2, %v370_v42 }
  0x49   : > { %v414_v56 = vmul.f32 0.2, %v374_v49  ;;  %vm385_vm12 = vcmp.gt.f32.partialorder %v5281_v21, 0.0  ;;  %v401_v57 = vmul.f32 0.2, %v5281_v21  ;;  %v362_v58 = vunpack.c.h.bf16 %v5274_v15 }
  0x4a   : > { %457 = vst [vmem:[#allocation2 + $0x14] sm:$0xff] %v449_v51  ;;  %v405_v59 = vmul.f32 0.2, %v5284_v22  ;;  %v366_v60 = vunpack.c.h.bf16 %v5276_v16  ;;  %v426_v61 = vsel %vm394_vm10, %v370_v42, %v410_v55  ;;  %vm389_vm13 = vcmp.gt.f32.partialorder %v5284_v22, 0.0 }
  0x4b   : > { %455 = vst [vmem:[#allocation2] sm:$0xff] %v447_v52  ;;  %v430_v62 = vsel %vm398_vm11, %v374_v49, %v414_v56  ;;  %v452_v0 = vpack.c.bf16 %v426_v61, %v425_v43  ;;  %vm386_vm14 = vcmp.gt.f32.partialorder %v362_v58, 0.0  ;;  %v402_v1 = vmul.f32 0.2, %v362_v58 }
  0x4c   : > { %v454_v63 = vpack.c.bf16 %v430_v62, %v429_v44  ;;  %vm390_vm15 = vcmp.gt.f32.partialorder %v366_v60, 0.0  ;;  %v406_v2 = vmul.f32 0.2, %v366_v60  ;;  %v4501_v3 = vpack.i.bf16 %v419_v48, %v415_v47 }
  0x4d   : > { %v417_v4 = vsel %vm385_vm12, %v5281_v21, %v401_v57  ;;  %v421_v5 = vsel %vm389_vm13, %v5284_v22, %v405_v59  ;;  %460 = vst [vmem:[#allocation2 + $0x30] sm:$0xff] %v452_v0  ;;  %v418_v6 = vsel %vm386_vm14, %v362_v58, %v402_v1  ;;  %v4496_v8 = vpack.i.bf16 %v374_v49, %v370_v42  ;;  %v375_v21 = vld [vmem:[%s5261_s6] sm:$0xf] }
  0x4e   : > { %4487 = vrot.lane.b32.xlu1 %v4486_v50, %s5099_s26  ;;  %462 = vst [vmem:[#allocation2 + $0x44] sm:$0xff] %v454_v63  ;;  %v422_v7 = vsel %vm390_vm15, %v366_v60, %v406_v2  ;;  %v448_v10 = vpack.c.bf16 %v418_v6, %v417_v4  ;;  %v4506_v11 = vpack.i.bf16 %v420_v46, %v416_v45  ;;  %v381_v15 = vunpack.c.l.bf16 %v377_v14 }
  0x4f   : > { %4482 = vrot.lane.b32.xlu0 %v4481_v53, %s5099_s26  ;;  %v450_v9 = vpack.c.bf16 %v422_v7, %v421_v5  ;;  %v4516_v12 = vpack.i.bf16 %v366_v60, %v362_v58  ;;  %v4511_v13 = vpack.i.bf16 %v421_v5, %v417_v4  ;;  %v4536_v16 = vpack.i.bf16 %v430_v62, %v426_v61 }
  0x50   : > { %4492 = vrot.lane.b32.xlu2 %v4491_v54, %s5099_s26  ;;  %456 = vst [vmem:[#allocation2 + $0x8] sm:$0xff] %v448_v10  ;;  %v437_v17 = vmul.f32 0.2, %v381_v15  ;;  %v382_v19 = vunpack.c.l.bf16 %v378_v18  ;;  %vm433_vm0 = vcmp.gt.f32.partialorder %v381_v15, 0.0  ;;  %v380_v22 = vunpack.c.l.bf16 %v376_v20 }
  0x51   : > { %458 = vst [vmem:[#allocation2 + $0x1c] sm:$0xff] %v450_v9  ;;  %vm463_vm1 = vcmask 207872   ;;  %v379_v24 = vunpack.c.l.bf16 %v375_v21  ;;  %v4556_v35 = vpack.i.bf16 %v422_v7, %v418_v6  ;;  %v500_v39 = vlaneseq }
  0x52   : > { %v441_v23 = vsel %vm433_vm0, %v381_v15, %v437_v17  ;;  %v438_v27 = vmul.f32 0.2, %v382_v19  ;;  %v436_v28 = vmul.f32 0.2, %v380_v22  ;;  %vm432_vm3 = vcmp.gt.f32.partialorder %v380_v22, 0.0 }
  0x53   : > { %v445_v25 = vpack.c.bf16 %v441_v23, %v441_v23  ;;  %vm431_vm2 = vcmp.gt.f32.partialorder %v379_v24, 0.0  ;;  %v435_v26 = vmul.f32 0.2, %v379_v24  ;;  %vm434_vm4 = vcmp.gt.f32.partialorder %v382_v19, 0.0 }
  0x54   : > { %v440_v31 = vsel %vm432_vm3, %v380_v22, %v436_v28  ;;  %v442_v32 = vsel %vm434_vm4, %v382_v19, %v438_v27  ;;  %v5352_v43 = vand.u32 127, %v500_v39  ;;  %vm560_vm7 = vcmask 1044472  }
  0x55   : > { %466 = vst.msk [vmem:[#allocation2 + $0x38] sm:$0xf] %vm463_vm1, %v445_v25  ;;  %v439_v29 = vsel %vm431_vm2, %v379_v24, %v435_v26  ;;  %v444_v33 = vpack.c.bf16 %v440_v31, %v440_v31  ;;  %v446_v34 = vpack.c.bf16 %v442_v32, %v442_v32  ;;  %vm561_vm8 = vcmask 203780  }
  0x56   : > { %4502 = vrot.lane.b32.xlu1 %v4501_v3, %s5099_s26  ;;  %v443_v30 = vpack.c.bf16 %v439_v29, %v439_v29  ;;  %vm502_vm5 = vcmp.lt.s32.totalorder %v5352_v43, 127  ;;  %vm599_vm6 = vcmp.lt.s32.totalorder %v5352_v43, 126  ;;  %vm551_vm9 = vcmask 1039360   ;;  %vm5504_vm10 = vmor %vm561_vm8, %vm560_vm7 }
  0x57   : > { %4497 = vrot.lane.b32.xlu0 %v4496_v8, %s5098_s24  ;;  %465 = vst.msk [vmem:[#allocation2 + $0x24] sm:$0xf] %vm463_vm1, %v444_v33  ;;  %vm644_vm11 = vcmask 1031168   ;;  %vm653_vm12 = vcmask 1044464   ;;  %vm654_vm13 = vcmask 195588   ;;  %vm1325_vm7 = vcmask 261120  }
  0x58   : > { %4507 = vrot.lane.b32.xlu2 %v4506_v11, %s5099_s26  ;;  %464 = vst.msk [vmem:[#allocation2 + $0x10] sm:$0xf] %vm463_vm1, %v443_v30  ;;  %vm5536_vm14 = vmor %vm654_vm13, %vm653_vm12 }
  0x59   : > { %467 = vst.msk [vmem:[#allocation2 + $0x4c] sm:$0xf] %vm463_vm1, %v446_v34 }
  0x5e   : > { %4517 = vrot.lane.b32.xlu1 %v4516_v12, %s5098_s24 }
  0x5f   : > { %4512 = vrot.lane.b32.xlu0 %v4511_v13, %s5099_s26 }
  0x60   : > { %4522 = vrot.lane.b32.xlu2 %v4481_v53, %s5098_s24 }
  0x66   : > { %4532 = vrot.lane.b32.xlu1 %v4491_v54, %s5098_s24 }
  0x67   : > { %4527 = vrot.lane.b32.xlu0 %v4486_v50, %s5098_s24 }
  0x68   : > { %4537 = vrot.lane.b32.xlu2 %v4536_v16, %s5099_s26 }
  0x6e   : > { %4547 = vrot.lane.b32.xlu1 %v4506_v11, %s5098_s24 }
  0x6f   : > { %4542 = vrot.lane.b32.xlu0 %v4501_v3, %s5098_s24 }
  0x70   : > { %4552 = vrot.lane.b32.xlu2 %v4511_v13, %s5098_s24 }
  0x76   : > { %4562 = vrot.lane.b32.xlu1 %v4536_v16, %s5098_s24 }
  0x77   : > { %4557 = vrot.lane.b32.xlu0 %v4556_v35, %s5099_s26 }
  0x78   : > { %4567 = vrot.lane.b32.xlu2 %v4556_v35, %s5098_s24 }
  0x7e   : > { %734 = vrot.lane.b32.xlu1 %v378_v18, %s5098_s24 }
  0x7f   : > { %732 = vrot.lane.b32.xlu0 %v377_v14, %s5098_s24 }
  0x80   : > { %728 = vrot.lane.b32.xlu2 %v375_v21, %s5098_s24 }
  0x86   : > { %636 = vrot.lane.b32.xlu1 %v445_v25, %s5099_s26 }
  0x87   : > { %730 = vrot.lane.b32.xlu0 %v376_v20, %s5098_s24 }
  0x88   : > { %638 = vrot.lane.b32.xlu2 %v446_v34, %s5099_s26 }
  0x8e   : > { %634 = vrot.lane.b32.xlu1 %v444_v33, %s5099_s26 }
  0x8f   : > { %632 = vrot.lane.b32.xlu0 %v443_v30, %s5099_s26  ;;  %s3507_s26 = scalar_lea.hbm %s6895_s5, %s4339_s18 }
  0x90   : > { %543 = vrot.lane.b32.xlu2 %v445_v25, %s5098_s24  ;;  %s3510_s13 = sshll.u32 %s3507_s26, 4  ;;  %s3511_s13 = int_to_ptr.hbm [resolvable:$true] %s3510_s13 }
  0x96   : > { %539 = vrot.lane.b32.xlu1 %v443_v30, %s5098_s24 }
  0x97   : > { %545 = vrot.lane.b32.xlu0 %v446_v34, %s5098_s24 }
  0x98   : > { %541 = vrot.lane.b32.xlu2 %v444_v33, %s5098_s24 }
  0x9a   : > { %v4473_v36 = vpop.permute.xlu2 %4472 }
  0x9b   : > { %v4475_v44 = vunpack.i.h.bf16 %v4473_v36  ;;  %v4474_v46 = vunpack.i.l.bf16 %v4473_v36 }
  0xa2   : > { %v5344_v37 = vpop.permute.xlu2 %4477 }
  0xa3   : > { %v4480_v45 = vunpack.i.h.bf16 %v5344_v37  ;;  %v4479_v47 = vunpack.i.l.bf16 %v5344_v37 }
  0xa5   : > { %v697_v59 = vsel %vm502_vm5, %v4475_v44, %v4480_v45  ;;  %v696_v2 = vsel %vm502_vm5, %v4474_v46, %v4479_v47 }
  0xaa   : > { %v4493_v38 = vpop.permute.xlu2 %4492 }
  0xab   : > { %v4495_v7 = vunpack.i.h.bf16 %v4493_v38  ;;  %v4494_v8 = vunpack.i.l.bf16 %v4493_v38 }
  0xb0   : > { %v5346_v40 = vpop.permute.xlu1 %4462 }
  0xb1   : > { %v5348_v41 = vpop.permute.xlu0 %4452  ;;  %v4465_v49 = vunpack.i.h.bf16 %v5346_v40  ;;  %v4464_v50 = vunpack.i.l.bf16 %v5346_v40 }
  0xb2   : > { %v5350_v42 = vpop.permute.xlu2 %4507  ;;  %v4455_v54 = vunpack.i.h.bf16 %v5348_v41  ;;  %v4454_v55 = vunpack.i.l.bf16 %v5348_v41 }
  0xb8   : > { %v5357_v48 = vpop.permute.xlu1 %4467 }
  0xb9   : > { %v4458_v51 = vpop.permute.xlu0 %4457  ;;  %v4470_v52 = vunpack.i.h.bf16 %v5357_v48  ;;  %v4469_v53 = vunpack.i.l.bf16 %v5357_v48 }
  0xba   : > { %v4460_v56 = vunpack.i.h.bf16 %v4458_v51  ;;  %v4459_v57 = vunpack.i.l.bf16 %v4458_v51  ;;  %v5365_v58 = vpop.permute.xlu2 %4522 }
  0xbb   : > { %v701_v60 = vsel %vm502_vm5, %v4470_v52, %v4475_v44  ;;  %v700_v61 = vsel %vm502_vm5, %v4469_v53, %v4474_v46 }
  0xbc   : > { %v699_v62 = vsel %vm502_vm5, %v4460_v56, %v4465_v49  ;;  %v698_v63 = vsel %vm502_vm5, %v4459_v57, %v4464_v50  ;;  %v702_v0 = vsel %vm502_vm5, %v4454_v55, %v4459_v57  ;;  %v703_v1 = vsel %vm502_vm5, %v4455_v54, %v4460_v56 }
  0xbd   : > { %v712_v3 = vpack.c.bf16 %v698_v63, %v702_v0  ;;  %v714_v4 = vpack.c.bf16 %v699_v62, %v703_v1  ;;  %v710_v5 = vpack.c.bf16 %v697_v59, %v701_v60  ;;  %v708_v6 = vpack.c.bf16 %v696_v2, %v700_v61 }
  0xbf   : > { %720 = vst [vmem:[#allocation2 + $0x118] sm:$0xff] %v712_v3 }
  0xc0   : > { %722 = vst [vmem:[#allocation2 + $0x12c] sm:$0xff] %v714_v4  ;;  %v4488_v9 = vpop.permute.xlu1 %4487  ;;  %v4510_v4 = vunpack.i.h.bf16 %v5350_v42 }
  0xc1   : > { %718 = vst [vmem:[#allocation2 + $0x104] sm:$0xff] %v710_v5  ;;  %v4483_v10 = vpop.permute.xlu0 %4482  ;;  %v4490_v11 = vunpack.i.h.bf16 %v4488_v9  ;;  %v4489_v12 = vunpack.i.l.bf16 %v4488_v9 }
  0xc2   : > { %716 = vst [vmem:[#allocation2 + $0xf0] sm:$0xff] %v708_v6  ;;  %v4485_v13 = vunpack.i.h.bf16 %v4483_v10  ;;  %v4484_v14 = vunpack.i.l.bf16 %v4483_v10  ;;  %v4538_v15 = vpop.permute.xlu2 %4537 }
  0xc3   : > { %v4540_v16 = vunpack.i.h.bf16 %v4538_v15  ;;  %v4539_v17 = vunpack.i.l.bf16 %v4538_v15  ;;  %v607_v18 = vsel %vm599_vm6, %v4490_v11, %v4495_v7  ;;  %v606_v20 = vsel %vm599_vm6, %v4489_v12, %v4494_v8 }
  0xc4   : > { %v611_v19 = vsel %vm599_vm6, %v4485_v13, %v4490_v11  ;;  %v610_v21 = vsel %vm599_vm6, %v4484_v14, %v4489_v12 }
  0xc5   : > { %v603_v22 = vsel %vm599_vm6, %v4495_v7, %v4540_v16  ;;  %v615_v23 = vsel %vm599_vm6, %v4540_v16, %v4485_v13  ;;  %v602_v24 = vsel %vm599_vm6, %v4494_v8, %v4539_v17  ;;  %v614_v25 = vsel %vm599_vm6, %v4539_v17, %v4484_v14 }
  0xc6   : > { %v623_v26 = vpack.c.bf16 %v615_v23, %v603_v22  ;;  %v621_v27 = vpack.c.bf16 %v614_v25, %v602_v24  ;;  %v622_v28 = vpack.c.bf16 %v607_v18, %v611_v19  ;;  %v3806_v29 = vld [vmem:[#allocation2 + $0x118] sm:$0xf]  ;;  %v4244_v30 = vld [vmem:[#allocation2 + $0x11c] sm:$0xf]  ;;  %v620_v31 = vpack.c.bf16 %v606_v20, %v610_v21 }
  0xc7   : > { %v4246_v32 = vld [vmem:[#allocation2 + $0x128] sm:$0xf0]  ;;  %v3808_v33 = vld [vmem:[#allocation2 + $0x12c] sm:$0xf0] }
  0xc8   : > { %631 = vst [vmem:[#allocation2 + $0xe4] sm:$0xff] %v623_v26  ;;  %v3807_v34 = vor.u32 %v4246_v32, %v3806_v29  ;;  %v3811_v35 = vor.u32 %v4244_v30, %v3808_v33  ;;  %v5416_v36 = vpop.permute.xlu1 %4502  ;;  %v4241_v38 = vld [vmem:[#allocation2 + $0x100] sm:$0xf0]  ;;  %v3788_v39 = vld [vmem:[#allocation2 + $0x104] sm:$0xf0] }
  0xc9   : > { %629 = vst [vmem:[#allocation2 + $0xd0] sm:$0xff] %v621_v27  ;;  %v4498_v44 = vpop.permute.xlu0 %4497  ;;  %v3786_v46 = vld [vmem:[#allocation2 + $0xf0] sm:$0xf]  ;;  %v4239_v51 = vld [vmem:[#allocation2 + $0xf4] sm:$0xf]  ;;  %v4505_v5 = vunpack.i.h.bf16 %v5416_v36  ;;  %v4524_v27 = vunpack.i.l.bf16 %v5365_v58 }
  0xca   : > { %630 = vst [vmem:[#allocation2 + $0xdc] sm:$0xff] %v622_v28  ;;  %1040 = vmatpush.bf16.msra.mxu0 %v3807_v34  ;;  %1069 = vmatpush.bf16.msra.mxu1 %v3811_v35  ;;  %v4500_v56 = vunpack.i.h.bf16 %v4498_v44  ;;  %v4499_v57 = vunpack.i.l.bf16 %v4498_v44  ;;  %v5418_v59 = vpop.permute.xlu2 %4552  ;;  %v3787_v60 = vor.u32 %v4241_v38, %v3786_v46  ;;  %v3791_v61 = vor.u32 %v4239_v51, %v3788_v39 }
  0xcb   : > { %628 = vst [vmem:[#allocation2 + $0xc8] sm:$0xff] %v620_v31  ;;  %v4555_v32 = vunpack.i.h.bf16 %v5418_v59 }
  0xcc   : > { %v695_v62 = vsel %vm502_vm5, %v4465_v49, %v4500_v56  ;;  %v707_v63 = vsel %vm502_vm5, %v4500_v56, %v4455_v54  ;;  %v694_v0 = vsel %vm502_vm5, %v4464_v50, %v4499_v57  ;;  %v706_v1 = vsel %vm502_vm5, %v4499_v57, %v4454_v55 }
  0xcd   : > { %v715_v2 = vpack.c.bf16 %v707_v63, %v695_v62  ;;  %v713_v3 = vpack.c.bf16 %v706_v1, %v694_v0  ;;  %v4509_v49 = vunpack.i.l.bf16 %v5350_v42  ;;  %v4504_v54 = vunpack.i.l.bf16 %v5416_v36 }
  0xce   : > { %1041 = vmatpush.bf16.msra.mxu0 %v3787_v60  ;;  %1070 = vmatpush.bf16.msra.mxu1 %v3791_v61  ;;  %v609_v42 = vsel %vm599_vm6, %v4505_v5, %v4510_v4  ;;  %v4554_v63 = vunpack.i.l.bf16 %v5418_v59 }
  0xcf   : > { %723 = vst [vmem:[#allocation2 + $0x134] sm:$0xff] %v715_v2  ;;  %v608_v8 = vsel %vm599_vm6, %v4504_v54, %v4509_v49  ;;  %v4237_v44 = vld [vmem:[#allocation2 + $0xe0] sm:$0xf0] }
  0xd0   : > { %721 = vst [vmem:[#allocation2 + $0x120] sm:$0xff] %v713_v3  ;;  %v4518_v40 = vpop.permute.xlu1 %4517  ;;  %v3774_v60 = vld [vmem:[#allocation2 + $0xd0] sm:$0xf] }
  0xd1   : > { %v5440_v50 = vpop.permute.xlu0 %4512  ;;  %v4236_v41 = vld [vmem:[#allocation2 + $0xd8] sm:$0xf0]  ;;  %v3768_v6 = vld [vmem:[#allocation2 + $0xdc] sm:$0xf0]  ;;  %v4520_v55 = vunpack.i.h.bf16 %v4518_v40  ;;  %v4519_v7 = vunpack.i.l.bf16 %v4518_v40 }
  0xd2   : > { %v4515_v9 = vunpack.i.h.bf16 %v5440_v50  ;;  %v4514_v10 = vunpack.i.l.bf16 %v5440_v50  ;;  %v3766_v11 = vld [vmem:[#allocation2 + $0xc8] sm:$0xf]  ;;  %v4234_v12 = vld [vmem:[#allocation2 + $0xcc] sm:$0xf]  ;;  %v5452_v13 = vpop.permute.xlu2 %4567 }
  0xd3   : > { %v3767_v14 = vor.u32 %v4236_v41, %v3766_v11  ;;  %v3771_v15 = vor.u32 %v4234_v12, %v3768_v6  ;;  %v693_v16 = vsel %vm502_vm5, %v4480_v45, %v4520_v55  ;;  %v705_v17 = vsel %vm502_vm5, %v4520_v55, %v4470_v52  ;;  %v3686_v50 = vld [vmem:[#allocation2 + $0x28] sm:$0xf] }
  0xd4   : > { %v604_v18 = vsel %vm599_vm6, %v4509_v49, %v4514_v10  ;;  %v605_v19 = vsel %vm599_vm6, %v4510_v4, %v4515_v9  ;;  %v711_v20 = vpack.c.bf16 %v705_v17, %v693_v16  ;;  %v692_v45 = vsel %vm502_vm5, %v4479_v47, %v4519_v7 }
  0xd5   : > { %v616_v21 = vpack.c.bf16 %v604_v18, %v608_v8  ;;  %v618_v22 = vpack.c.bf16 %v605_v19, %v609_v42  ;;  %1042 = vmatpush.bf16.msra.mxu0 %v3767_v14  ;;  %1071 = vmatpush.bf16.msra.mxu1 %v3771_v15  ;;  %v704_v52 = vsel %vm502_vm5, %v4519_v7, %v4469_v53  ;;  %v4525_v47 = vunpack.i.h.bf16 %v5365_v58 }
  0xd6   : > { %719 = vst [vmem:[#allocation2 + $0x10c] sm:$0xff] %v711_v20  ;;  %v709_v23 = vpack.c.bf16 %v704_v52, %v692_v45  ;;  %v4247_v24 = vld [vmem:[#allocation2 + $0x130] sm:$0xf0]  ;;  %v4570_v56 = vunpack.i.h.bf16 %v5452_v13  ;;  %v4569_v0 = vunpack.i.l.bf16 %v5452_v13  ;;  %v3775_v55 = vor.u32 %v4237_v44, %v3774_v60 }
  0xd7   : > { %624 = vst [vmem:[#allocation2 + $0xa0] sm:$0xff] %v616_v21  ;;  %v3814_v25 = vld [vmem:[#allocation2 + $0x120] sm:$0xf] }
  0xd8   : > { %626 = vst [vmem:[#allocation2 + $0xb4] sm:$0xff] %v618_v22  ;;  %v3815_v26 = vor.u32 %v4247_v24, %v3814_v25  ;;  %v5478_v37 = vpop.permute.xlu1 %4532  ;;  %v504_v7 = vsel %vm502_vm5, %v4555_v32, %v4570_v56  ;;  %v503_v12 = vsel %vm502_vm5, %v4554_v63, %v4569_v0 }
  0xd9   : > { %717 = vst [vmem:[#allocation2 + $0xf8] sm:$0xff] %v709_v23  ;;  %v4528_v28 = vpop.permute.xlu0 %4527  ;;  %v4535_v48 = vunpack.i.h.bf16 %v5478_v37  ;;  %v4534_v29 = vunpack.i.l.bf16 %v5478_v37 }
  0xda   : > { %1098 = vmatpush.bf16.msra.mxu2 %v3815_v26  ;;  %v4530_v53 = vunpack.i.h.bf16 %v4528_v28  ;;  %v4529_v30 = vunpack.i.l.bf16 %v4528_v28  ;;  %v729_v31 = vpop.permute.xlu2 %728  ;;  %v5532_v28 = vld [vmem:[%s6894_s4 + $0x18] sm:$0xff] }
  0xdb   : > { %v736_v33 = vrot.slane %v729_v31, 4 }
  0xdc   : > { %v513_v34 = vsel %vm502_vm5, %v4524_v27, %v4529_v30  ;;  %v514_v35 = vsel %vm502_vm5, %v4525_v47, %v4530_v53  ;;  %v510_v38 = vsel %vm502_vm5, %v4530_v53, %v4535_v48  ;;  %v509_v39 = vsel %vm502_vm5, %v4529_v30, %v4534_v29 }
  0xdd   : > { %v525_v46 = vpack.c.bf16 %v510_v38, %v514_v35  ;;  %v523_v51 = vpack.c.bf16 %v509_v39, %v513_v34  ;;  %v4242_v57 = vld [vmem:[#allocation2 + $0x108] sm:$0xf0]  ;;  %v740_v62 = vsel %vm551_vm9, %v736_v33, %v729_v31  ;;  %v5100_v31 = vmov 0  }
  0xde   : > { %v3746_v1 = vld [vmem:[#allocation2 + $0xa0] sm:$0xf]  ;;  %v4229_v2 = vld [vmem:[#allocation2 + $0xa4] sm:$0xf]  ;;  %748 = vst.msk [vmem:[#allocation2 + $0xfc] sm:$0xff] %vm5504_vm10, %v740_v62  ;;  %4572 = vset.pattern.permute.xlu1 %v5100_v31  ;;  %4571 = vset.pattern.permute.xlu0 %v5100_v31 }
  0xdf   : > { %533 = vst [vmem:[#allocation2 + $0x8c] sm:$0xff] %v525_v46  ;;  %v4231_v3 = vld [vmem:[#allocation2 + $0xb0] sm:$0xf0]  ;;  %v3748_v4 = vld [vmem:[#allocation2 + $0xb4] sm:$0xf0]  ;;  %1202 = vperm.xlu1 %4572, %v5532_v28   ;;  %4573 = vset.pattern.permute.xlu2 %v5100_v31 }
  0xe0   : > { %531 = vst [vmem:[#allocation2 + $0x78] sm:$0xff] %v523_v51  ;;  %v4548_v49 = vpop.permute.xlu1 %4547  ;;  %v3747_v40 = vor.u32 %v4231_v3, %v3746_v1  ;;  %v3751_v41 = vor.u32 %v4229_v2, %v3748_v4  ;;  %v3794_v6 = vld [vmem:[#allocation2 + $0xf8] sm:$0xf]  ;;  %v4216_v3 = vld [vmem:[#allocation2 + $0x38] sm:$0xf0] }
  0xe1   : > { %v4543_v59 = vpop.permute.xlu0 %4542  ;;  %v4550_v42 = vunpack.i.h.bf16 %v4548_v49  ;;  %v4549_v8 = vunpack.i.l.bf16 %v4548_v49  ;;  %v3795_v11 = vor.u32 %v4242_v57, %v3794_v6  ;;  %v4214_v4 = vld [vmem:[#allocation2 + $0x2c] sm:$0xf] }
  0xe2   : > { %v4545_v13 = vunpack.i.h.bf16 %v4543_v59  ;;  %v4544_v14 = vunpack.i.l.bf16 %v4543_v59  ;;  %1043 = vmatpush.bf16.msra.mxu0 %v3747_v40  ;;  %1072 = vmatpush.bf16.msra.mxu1 %v3751_v41  ;;  %v639_v15 = vpop.permute.xlu2 %638  ;;  %v5579_v49 = vld [vmem:[%s6894_s4 + $0x8] sm:$0xff]  ;;  %v5586_v41 = vld [vmem:[%s6894_s4 + $0x10] sm:$0xff] }
  0xe3   : > { %v508_v16 = vsel %vm502_vm5, %v4550_v42, %v4555_v32  ;;  %v507_v17 = vsel %vm502_vm5, %v4549_v8, %v4554_v63  ;;  %1099 = vmatpush.bf16.msra.mxu2 %v3795_v11  ;;  %v643_v18 = vrot.slane %v639_v15, 4  ;;  %1197 = vperm.xlu0 %4571, %v5586_v41  }
  0xe4   : > { %v516_v19 = vsel %vm502_vm5, %v4570_v56, %v4545_v13  ;;  %v515_v20 = vsel %vm502_vm5, %v4569_v0, %v4544_v14  ;;  %v512_v45 = vsel %vm502_vm5, %v4545_v13, %v4550_v42  ;;  %v511_v21 = vsel %vm502_vm5, %v4544_v14, %v4549_v8 }
  0xe5   : > { %v522_v22 = vpack.c.bf16 %v516_v19, %v504_v7  ;;  %v520_v52 = vpack.c.bf16 %v515_v20, %v503_v12  ;;  %v521_v23 = vpack.c.bf16 %v508_v16, %v512_v45  ;;  %v519_v24 = vpack.c.bf16 %v507_v17, %v511_v21  ;;  %v4211_v19 = vld [vmem:[#allocation2 + $0x10] sm:$0xf0]  ;;  %v4209_v20 = vld [vmem:[#allocation2 + $0x4] sm:$0xf]  ;;  %v3668_v45 = vld [vmem:[#allocation2 + $0x14] sm:$0xf0] }
  0xe6   : > { %v4226_v25 = vld [vmem:[#allocation2 + $0x88] sm:$0xf0]  ;;  %v3728_v26 = vld [vmem:[#allocation2 + $0x8c] sm:$0xf0]  ;;  %v648_v38 = vsel %vm644_vm11, %v643_v18, %v639_v15  ;;  %v3687_v16 = vor.u32 %v4216_v3, %v3686_v50  ;;  %v3666_v18 = vld [vmem:[#allocation2] sm:$0xf] }
  0xe7   : > { %530 = vst [vmem:[#allocation2 + $0x6c] sm:$0xff] %v522_v22  ;;  %1100 = vmatpush.bf16.msra.mxu2 %v3775_v55  ;;  %v3726_v53 = vld [vmem:[#allocation2 + $0x78] sm:$0xf]  ;;  %v4224_v30 = vld [vmem:[#allocation2 + $0x7c] sm:$0xf]  ;;  %1192 = vperm.xlu1 %4572, %v5579_v49   ;;  %v5102_v50 = vmov 1  }
  0xe8   : > { %528 = vst [vmem:[#allocation2 + $0x58] sm:$0xff] %v520_v52  ;;  %v4563_v32 = vpop.permute.xlu1 %4562  ;;  %v3727_v33 = vor.u32 %v4226_v25, %v3726_v53  ;;  %v3731_v34 = vor.u32 %v4224_v30, %v3728_v26 }
  0xe9   : > { %529 = vst [vmem:[#allocation2 + $0x64] sm:$0xff] %v521_v23  ;;  %v4558_v39 = vpop.permute.xlu0 %4557  ;;  %v4565_v44 = vunpack.i.h.bf16 %v4563_v32  ;;  %v4564_v46 = vunpack.i.l.bf16 %v4563_v32  ;;  %v3667_v23 = vor.u32 %v4211_v19, %v3666_v18 }
  0xea   : > { %527 = vst [vmem:[#allocation2 + $0x50] sm:$0xff] %v519_v24  ;;  %v4560_v51 = vunpack.i.h.bf16 %v4558_v39  ;;  %v4559_v56 = vunpack.i.l.bf16 %v4558_v39  ;;  %1044 = vmatpush.bf16.msra.mxu0 %v3727_v33  ;;  %1073 = vmatpush.bf16.msra.mxu1 %v3731_v34  ;;  %v544_v57 = vpop.permute.xlu2 %543  ;;  %v3671_v24 = vor.u32 %v4209_v20, %v3668_v45  ;;  %v5600_v34 = vld [vmem:[#allocation8] sm:$0xff]  ;;  %v5624_v20 = vld [vmem:[#allocation8 + $0x8] sm:$0xff] }
  0xeb   : > { %v518_v60 = vsel %vm502_vm5, %v4565_v44, %v4525_v47  ;;  %v505_v62 = vsel %vm502_vm5, %v4534_v29, %v4564_v46  ;;  %v506_v63 = vsel %vm502_vm5, %v4535_v48, %v4565_v44  ;;  %v517_v0 = vsel %vm502_vm5, %v4564_v46, %v4524_v27  ;;  %659 = vst.msk [vmem:[#allocation2 + $0xe8] sm:$0xff] %vm5536_vm14, %v648_v38 }
  0xec   : > { %v601_v47 = vsel %vm599_vm6, %v4515_v9, %v4560_v51  ;;  %v600_v37 = vsel %vm599_vm6, %v4514_v10, %v4559_v56  ;;  %v612_v58 = vsel %vm599_vm6, %v4559_v56, %v4504_v54  ;;  %v613_v27 = vsel %vm599_vm6, %v4560_v51, %v4505_v5  ;;  %v3688_v10 = vld [vmem:[#allocation2 + $0x3c] sm:$0xf0]  ;;  %4575 = vset.pattern.permute.xlu0 %v5102_v50 }
  0xed   : > { %v617_v48 = vpack.c.bf16 %v612_v58, %v600_v37  ;;  %v619_v29 = vpack.c.bf16 %v613_v27, %v601_v47  ;;  %v524_v1 = vpack.c.bf16 %v517_v0, %v505_v62  ;;  %v526_v2 = vpack.c.bf16 %v518_v60, %v506_v63  ;;  %v3694_v47 = vld [vmem:[#allocation2 + $0x30] sm:$0xf]  ;;  %v4217_v37 = vld [vmem:[#allocation2 + $0x40] sm:$0xf0]  ;;  %1312 = vperm.xlu0 %4575, %v5532_v28  }
  0xee   : > { %v549_v9 = vrot.slane %v544_v57, 4  ;;  %v3691_v17 = vor.u32 %v4214_v4, %v3688_v10  ;;  %v4222_v62 = vld [vmem:[#allocation2 + $0x68] sm:$0xf0]  ;;  %v3695_v4 = vor.u32 %v4217_v37, %v3694_v47  ;;  %v4240_v10 = vld [vmem:[#allocation2 + $0xfc] sm:$0xf] }
  0xef   : > { %625 = vst [vmem:[#allocation2 + $0xa8] sm:$0xff] %v617_v48  ;;  %v3714_v60 = vld [vmem:[#allocation2 + $0x58] sm:$0xf]  ;;  %v347_v48 = vld [vmem:[%s6894_s4] sm:$0xff] }
  0xf0   : > { %627 = vst [vmem:[#allocation2 + $0xbc] sm:$0xff] %v619_v29  ;;  %v4221_v36 = vld [vmem:[#allocation2 + $0x60] sm:$0xf0]  ;;  %v3708_v54 = vld [vmem:[#allocation2 + $0x64] sm:$0xf0]  ;;  %v735_v40 = vpop.permute.xlu1 %734  ;;  %v554_v5 = vsel %vm551_vm9, %v549_v9, %v544_v57  ;;  %v3715_v58 = vor.u32 %v4222_v62, %v3714_v60  ;;  %v5101_v9 = vmov 2   ;;  %1187 = vperm.xlu2 %4573, %v347_v48  }
  0xf1   : > { %532 = vst [vmem:[#allocation2 + $0x80] sm:$0xff] %v524_v1  ;;  %v733_v6 = vpop.permute.xlu0 %732  ;;  %v3706_v55 = vld [vmem:[#allocation2 + $0x50] sm:$0xf]  ;;  %v4219_v7 = vld [vmem:[#allocation2 + $0x54] sm:$0xf]  ;;  %v739_v59 = vrot.slane %v735_v40, 4  ;;  %4576 = vset.pattern.permute.xlu1 %v5101_v9 }
  0xf2   : > { %534 = vst [vmem:[#allocation2 + $0x94] sm:$0xff] %v526_v2  ;;  %v738_v42 = vrot.slane %v733_v6, 4  ;;  %v3707_v8 = vor.u32 %v4221_v36, %v3706_v55  ;;  %v3711_v11 = vor.u32 %v4219_v7, %v3708_v54  ;;  %v542_v12 = vpop.permute.xlu2 %541  ;;  %v3674_v2 = vld [vmem:[#allocation2 + $0x8] sm:$0xf]  ;;  %v3802_v36 = vld [vmem:[#allocation2 + $0x100] sm:$0xf]  ;;  %1436 = vperm.xlu1 %4576, %v5586_v41  }
  0xf3   : > { %v743_v13 = vsel %vm551_vm9, %v739_v59, %v735_v40  ;;  %565 = vst.msk [vmem:[#allocation2 + $0x84] sm:$0xff] %vm5504_vm10, %v554_v5  ;;  %v548_v14 = vrot.slane %v542_v12, 4  ;;  %v4212_v40 = vld [vmem:[#allocation2 + $0x18] sm:$0xf0]  ;;  %v4218_v60 = vld [vmem:[#allocation2 + $0x48] sm:$0xf0] }
  0xf4   : > { %v742_v15 = vsel %vm551_vm9, %v738_v42, %v733_v6  ;;  %1045 = vmatpush.bf16.msra.mxu0 %v3707_v8  ;;  %1074 = vmatpush.bf16.msra.mxu1 %v3711_v11  ;;  %751 = vst.msk [vmem:[#allocation2 + $0x138] sm:$0xff] %vm5504_vm10, %v743_v13  ;;  %v3776_v6 = vld [vmem:[#allocation2 + $0xe4] sm:$0xf0]  ;;  %v3675_v13 = vor.u32 %v4212_v40, %v3674_v2  ;;  %v4251_v62 = vld [vmem:[#allocation8 + $0x10] sm:$0xff]  ;;  %v3676_v47 = vld [vmem:[#allocation2 + $0x1c] sm:$0xf0] }
  0xf5   : > { %750 = vst.msk [vmem:[#allocation2 + $0x124] sm:$0xff] %vm5504_vm10, %v742_v15  ;;  %v553_v21 = vsel %vm551_vm9, %v548_v14, %v542_v12  ;;  %v4238_v12 = vld [vmem:[#allocation2 + $0xe8] sm:$0xf0]  ;;  %4580 = vset.pattern.permute.xlu0 %v5101_v9 }
  0xf6   : > { %v3754_v22 = vld [vmem:[#allocation2 + $0xa8] sm:$0xf]  ;;  %564 = vst.msk [vmem:[#allocation2 + $0x70] sm:$0xff] %vm5504_vm10, %v553_v21  ;;  %1428 = vperm.xlu0 %4580, %v347_v48  }
  0xf7   : > { %v4232_v52 = vld [vmem:[#allocation2 + $0xb8] sm:$0xf0] }
  0xf8   : > { %1046 = vmatpush.bf16.msra.mxu0 %v3687_v16  ;;  %1075 = vmatpush.bf16.msra.mxu1 %v3691_v17  ;;  %v3755_v25 = vor.u32 %v4232_v52, %v3754_v22  ;;  %v637_v26 = vpop.permute.xlu1 %636  ;;  %v3734_v31 = vld [vmem:[#allocation2 + $0x80] sm:$0xf] }
  0xf9   : > { %v731_v53 = vpop.permute.xlu0 %730  ;;  %v642_v30 = vrot.slane %v637_v26, 4  ;;  %v4227_v32 = vld [vmem:[#allocation2 + $0x90] sm:$0xf0]  ;;  %4574 = vset.pattern.permute.xlu2 %v5102_v50 }
  0xfa   : > { %v737_v33 = vrot.slane %v731_v53, 4  ;;  %1101 = vmatpush.bf16.msra.mxu2 %v3755_v25  ;;  %v3735_v51 = vor.u32 %v4227_v32, %v3734_v31  ;;  %4578 = vset.pattern.permute.xlu1 %v5102_v50  ;;  %v3742_v61 = vld [vmem:[#allocation2 + $0x88] sm:$0xf] }
  0xfb   : > { %v647_v38 = vsel %vm644_vm11, %v642_v30, %v637_v26  ;;  %v3816_v39 = vld [vmem:[#allocation2 + $0x134] sm:$0xf0]  ;;  %v4248_v44 = vld [vmem:[#allocation2 + $0x138] sm:$0xf0]  ;;  %1300 = vperm.xlu1 %4578, %v347_v48   ;;  %1308 = vperm.xlu2 %4574, %v5586_v41   ;;  %v4225_v26 = vld [vmem:[#allocation2 + $0x84] sm:$0xf] }
  0xfc   : > { %v741_v46 = vsel %vm551_vm9, %v737_v33, %v731_v53  ;;  %1047 = vmatpush.bf16.msra.mxu0 %v3667_v23  ;;  %1076 = vmatpush.bf16.msra.mxu1 %v3671_v24  ;;  %658 = vst.msk [vmem:[#allocation2 + $0xd4] sm:$0xff] %vm5536_vm14, %v647_v38  ;;  %v4245_v56 = vld [vmem:[#allocation2 + $0x124] sm:$0xf]  ;;  %v3822_v57 = vld [vmem:[#allocation2 + $0x128] sm:$0xf] }
  0xfd   : > { %749 = vst.msk [vmem:[#allocation2 + $0x110] sm:$0xff] %vm5504_vm10, %v741_v46  ;;  %v3819_v63 = vor.u32 %v4245_v56, %v3816_v39  ;;  %v3823_v0 = vor.u32 %v4248_v44, %v3822_v57  ;;  %v3716_v30 = vld [vmem:[#allocation2 + $0x6c] sm:$0xf0]  ;;  %v4223_v31 = vld [vmem:[#allocation2 + $0x70] sm:$0xf0] }
  0xfe   : > { %1102 = vmatpush.bf16.msra.mxu2 %v3735_v51  ;;  %v4215_v41 = vld [vmem:[#allocation2 + $0x34] sm:$0xf]  ;;  %v3696_v56 = vld [vmem:[#allocation2 + $0x44] sm:$0xf0]  ;;  %v3702_v57 = vld [vmem:[#allocation2 + $0x38] sm:$0xf] }
  0xff   : > { %1048 = vmatmul.bf16.vlgmr.msra.gmra.mxu0 %v5600_v34  ;;  %1077 = vmatmul.bf16.vlgmr.msra.gmra.mxu1 %v5600_v34  ;;  %v3703_v37 = vor.u32 %v4218_v60, %v3702_v57 }
 0x100   : > { %v635_v27 = vpop.permute.xlu1 %634  ;;  %1127 = vmatpush.bf16.msra.mxu3 %v3819_v63  ;;  %1156 = vmatpush.bf16.msrb.mxu0 %v3823_v0  ;;  %v3699_v63 = vor.u32 %v4215_v41, %v3696_v56 }
 0x101   : > { %v633_v29 = vpop.permute.xlu0 %632  ;;  %v641_v1 = vrot.slane %v635_v27, 4 }
 0x102   : > { %v640_v3 = vrot.slane %v633_v29, 4  ;;  %1103 = vmatpush.bf16.msra.mxu2 %v3715_v58  ;;  %v3682_v58 = vld [vmem:[#allocation2 + $0x10] sm:$0xf] }
 0x103   : > { %v646_v54 = vsel %vm644_vm11, %v641_v1, %v635_v27  ;;  %v4235_v5 = vld [vmem:[#allocation2 + $0xd4] sm:$0xf]  ;;  %v3782_v11 = vld [vmem:[#allocation2 + $0xd8] sm:$0xf]  ;;  %4581 = vset.pattern.permute.xlu1 %v5101_v9  ;;  %4577 = vset.pattern.permute.xlu2 %v5101_v9  ;;  %v4213_v27 = vld [vmem:[#allocation2 + $0x20] sm:$0xf0] }
 0x104   : > { %v645_v55 = vsel %vm644_vm11, %v640_v3, %v633_v29  ;;  %657 = vst.msk [vmem:[#allocation2 + $0xc0] sm:$0xff] %vm5536_vm14, %v646_v54  ;;  %v3796_v7 = vld [vmem:[#allocation2 + $0x10c] sm:$0xf0]  ;;  %v4243_v59 = vld [vmem:[#allocation2 + $0x110] sm:$0xf0]  ;;  %v3779_v14 = vor.u32 %v4235_v5, %v3776_v6  ;;  %v3783_v16 = vor.u32 %v4238_v12, %v3782_v11  ;;  %1432 = vperm.xlu1 %4581, %v5579_v49  }
 0x105   : > { %656 = vst.msk [vmem:[#allocation2 + $0xac] sm:$0xff] %vm5536_vm14, %v645_v55  ;;  %v3799_v42 = vor.u32 %v4240_v10, %v3796_v7  ;;  %v3803_v8 = vor.u32 %v4243_v59, %v3802_v36  ;;  %1440 = vperm.xlu2 %4577, %v5532_v28   ;;  %v3683_v29 = vor.u32 %v4213_v27, %v3682_v58  ;;  %v4252_v28 = vld [vmem:[#allocation8 + $0x18] sm:$0xff] }
 0x106   : > { %1104 = vmatpush.bf16.msra.mxu2 %v3695_v4 }
 0x107   : > { %1128 = vmatpush.bf16.msra.mxu3 %v3799_v42  ;;  %1157 = vmatpush.bf16.msrb.mxu0 %v3803_v8 }
 0x108   : > { %v540_v15 = vpop.permute.xlu1 %539 }
 0x109   : > { %v546_v17 = vpop.permute.xlu0 %545  ;;  %v547_v18 = vrot.slane %v540_v15, 4 }
 0x10a   : > { %v550_v19 = vrot.slane %v546_v17, 4  ;;  %1105 = vmatpush.bf16.msra.mxu2 %v3675_v13 }
 0x10b   : > { %v552_v35 = vsel %vm551_vm9, %v547_v18, %v540_v15  ;;  %1129 = vmatpush.bf16.msra.mxu3 %v3779_v14  ;;  %v3756_v45 = vld [vmem:[#allocation2 + $0xbc] sm:$0xf0]  ;;  %v4233_v21 = vld [vmem:[#allocation2 + $0xc0] sm:$0xf0]  ;;  %1158 = vmatpush.bf16.msrb.mxu0 %v3783_v16 }
 0x10c   : > { %v555_v22 = vsel %vm551_vm9, %v550_v19, %v546_v17  ;;  %563 = vst.msk [vmem:[#allocation2 + $0x5c] sm:$0xff] %vm5504_vm10, %v552_v35  ;;  %v4230_v52 = vld [vmem:[#allocation2 + $0xac] sm:$0xf]  ;;  %v3762_v23 = vld [vmem:[#allocation2 + $0xb0] sm:$0xf] }
 0x10d   : > { %566 = vst.msk [vmem:[#allocation2 + $0x98] sm:$0xff] %vm5504_vm10, %v555_v22  ;;  %1106 = vmatmul.bf16.vlgmr.msra.gmra.mxu2 %v5600_v34  ;;  %v3759_v24 = vor.u32 %v4230_v52, %v3756_v45  ;;  %v3763_v25 = vor.u32 %v4233_v21, %v3762_v23  ;;  %4579 = vset.pattern.permute.xlu2 %v5102_v50 }
 0x10e   : > { %4340 = vmatpush.bf16.msrb.mxu2 %v3823_v0  ;;  %v4210_v0 = vld [vmem:[#allocation2 + $0xc] sm:$0xf]  ;;  %1304 = vperm.xlu2 %4579, %v5579_v49  }
 0x10f   : > { %1053 = vmatmul.bf16.gmra.mxu0 %v5624_v20  ;;  %1082 = vmatmul.bf16.gmra.mxu1 %v5624_v20  ;;  %v3679_v48 = vor.u32 %v4210_v0, %v3676_v47 }
 0x110   : > { %1130 = vmatpush.bf16.msra.mxu3 %v3759_v24  ;;  %1159 = vmatpush.bf16.msrb.mxu0 %v3763_v25 }
 0x112   : > { %4341 = vmatpush.bf16.msrb.mxu2 %v3803_v8 }
 0x113   : > { %v4220_v53 = vld [vmem:[#allocation2 + $0x5c] sm:$0xf]  ;;  %v3722_v38 = vld [vmem:[#allocation2 + $0x60] sm:$0xf] }
 0x114   : > { %v3736_v32 = vld [vmem:[#allocation2 + $0x94] sm:$0xf0]  ;;  %v4228_v33 = vld [vmem:[#allocation2 + $0x98] sm:$0xf0]  ;;  %v3719_v46 = vor.u32 %v4220_v53, %v3716_v30  ;;  %v3723_v51 = vor.u32 %v4223_v31, %v3722_v38  ;;  %v5675_v38 = vld [vmem:[%s6893_s3 + $0x8] sm:$0xff] }
 0x115   : > { %v3739_v39 = vor.u32 %v4225_v26, %v3736_v32  ;;  %v3743_v44 = vor.u32 %v4228_v33, %v3742_v61  ;;  %v5670_v33 = vld [vmem:[%s6893_s3] sm:$0xff] }
 0x116   : > { %4342 = vmatpush.bf16.msrb.mxu2 %v3783_v16 }
 0x117   : > { %1131 = vmatpush.bf16.msra.mxu3 %v3739_v39  ;;  %1160 = vmatpush.bf16.msrb.mxu0 %v3743_v44 }
 0x11a   : > { %4343 = vmatpush.bf16.msrb.mxu2 %v3763_v25 }
 0x11b   : > { %1132 = vmatpush.bf16.msra.mxu3 %v3719_v46  ;;  %1161 = vmatpush.bf16.msrb.mxu0 %v3723_v51 }
 0x11d   : > { %1111 = vmatmul.bf16.gmra.mxu2 %v5624_v20 }
 0x11e   : > { %4344 = vmatpush.bf16.msrb.mxu2 %v3743_v44 }
 0x11f   : > { %1058 = vmatmul.bf16.gmra.mxu0 %v4251_v62  ;;  %1133 = vmatpush.bf16.msra.mxu3 %v3699_v63 }
 0x120   : > { %1162 = vmatpush.bf16.msrb.mxu0 %v3703_v37  ;;  %1087 = vmatmul.bf16.gmra.mxu1 %v4251_v62 }
 0x122   : > { %4345 = vmatpush.bf16.msrb.mxu2 %v3723_v51 }
 0x123   : > { %1134 = vmatpush.bf16.msra.mxu3 %v3679_v48 }
 0x124   : > { %1163 = vmatpush.bf16.msrb.mxu0 %v3683_v29 }
 0x126   : > { %4346 = vmatpush.bf16.msrb.mxu2 %v3703_v37  ;;  %1135 = vmatmul.bf16.vlgmr.msra.gmra.mxu3 %v5600_v34 }
 0x12a   : > { %4347 = vmatpush.bf16.msrb.mxu2 %v3683_v29 }
 0x12d   : > { %1116 = vmatmul.bf16.gmra.mxu2 %v4251_v62 }
 0x12f   : > { %1063 = vmatmul.bf16.gmra.mxu0 %v4252_v28 }
 0x130   : > { %1092 = vmatmul.bf16.gmra.mxu1 %v4252_v28 }
 0x136   : > { %1140 = vmatmul.bf16.gmra.mxu3 %v5624_v20 }
 0x13d   : > { %1121 = vmatmul.bf16.gmra.mxu2 %v4252_v28 }
 0x13f   : > { %1164 = vmatmul.bf16.vlgmr.msrb.gmra.mxu0 %v5600_v34 }
 0x146   : > { %1145 = vmatmul.bf16.gmra.mxu3 %v4251_v62 }
 0x14a   : > { %v5654_v54 = vpop.permute.xlu2 %1187 }
 0x14d   : > { %1179 = vmatmul.bf16.vlgmr.msrb.gmra.mxu2 %v4252_v28 }
 0x14f   : > { %1169 = vmatmul.bf16.gmra.mxu0 %v5624_v20 }
 0x151   : > { %v5649_v50 = vpop.permute.xlu1 %1202 }
 0x155   : > { %v5651_v10 = vpop.permute.xlu0 %1197 }
 0x156   : > { %1150 = vmatmul.bf16.gmra.mxu3 %v4252_v28 }
 0x159   : > { %v5656_v34 = vpop.permute.xlu1 %1192 }
 0x15f   : > { %1174 = vmatmul.bf16.gmra.mxu0 %v4251_v62 }
 0x17c   : > { %v1049_v49 = vpop.f32.mrf.mxu0  ;;  %v1078_v1 = vpop.f32.mrf.mxu1 }
 0x17d   : > { %v1205_v55 = vadd.f32 %v5654_v54, %v1049_v49  ;;  %v1206_v59 = vadd.f32 %v5654_v54, %v1078_v1 }
 0x17f   : > { %v1245_v16 = vmul.f32 0.2, %v1205_v55  ;;  %vm1226_vm4 = vcmp.gt.f32.partialorder %v1206_v59, 0.0  ;;  %v1246_v35 = vmul.f32 0.2, %v1206_v59  ;;  %vm1225_vm6 = vcmp.gt.f32.partialorder %v1205_v55, 0.0 }
 0x181   : > { %v1266_v61 = vsel %vm1226_vm4, %v1206_v59, %v1246_v35  ;;  %v1265_v30 = vsel %vm1225_vm6, %v1205_v55, %v1245_v16 }
 0x184   : > { %v1051_v2 = vpop.f32.mrf.mxu0  ;;  %v1080_v9 = vpop.f32.mrf.mxu1 }
 0x185   : > { %v1210_v7 = vadd.f32 %v5656_v34, %v1051_v2  ;;  %v1211_v42 = vadd.f32 %v5656_v34, %v1080_v9 }
 0x187   : > { %v1250_v17 = vmul.f32 0.2, %v1210_v7  ;;  %vm1230_vm3 = vcmp.gt.f32.partialorder %v1210_v7, 0.0  ;;  %v1251_v45 = vmul.f32 0.2, %v1211_v42  ;;  %vm1231_vm5 = vcmp.gt.f32.partialorder %v1211_v42, 0.0 }
 0x189   : > { %v1270_v25 = vsel %vm1230_vm3, %v1210_v7, %v1250_v17  ;;  %v1271_v53 = vsel %vm1231_vm5, %v1211_v42, %v1251_v45 }
 0x18a   : > { %v1285_v31 = vpack.c.bf16 %v1270_v25, %v1265_v30  ;;  %v1286_v32 = vpack.c.bf16 %v1271_v53, %v1266_v61 }
 0x18c   : > { %v1054_v3 = vpop.f32.mrf.mxu0  ;;  %v1083_v4 = vpop.f32.mrf.mxu1 }
 0x18d   : > { %v1216_v36 = vadd.f32 %v5651_v10, %v1083_v4  ;;  %v1215_v5 = vadd.f32 %v5651_v10, %v1054_v3 }
 0x18f   : > { %v1256_v6 = vmul.f32 0.2, %v1216_v36  ;;  %vm1236_vm15 = vcmp.gt.f32.partialorder %v1216_v36, 0.0  ;;  %v1255_v14 = vmul.f32 0.2, %v1215_v5  ;;  %vm1235_vm0 = vcmp.gt.f32.partialorder %v1215_v5, 0.0 }
 0x190   : > { %v1107_v40 = vpop.f32.mrf.mxu2 }
 0x191   : > { %v1276_v15 = vsel %vm1236_vm15, %v1216_v36, %v1256_v6  ;;  %v1275_v22 = vsel %vm1235_vm0, %v1215_v5, %v1255_v14  ;;  %v1207_v51 = vadd.f32 %v5654_v54, %v1107_v40 }
 0x193   : > { %v1247_v63 = vmul.f32 0.2, %v1207_v51  ;;  %vm1227_vm10 = vcmp.gt.f32.partialorder %v1207_v51, 0.0 }
 0x194   : > { %v1056_v8 = vpop.f32.mrf.mxu0  ;;  %v1085_v11 = vpop.f32.mrf.mxu1 }
 0x195   : > { %v1220_v12 = vadd.f32 %v5649_v50, %v1056_v8  ;;  %v1221_v13 = vadd.f32 %v5649_v50, %v1085_v11  ;;  %v1267_v29 = vsel %vm1227_vm10, %v1207_v51, %v1247_v63 }
 0x197   : > { %v1260_v18 = vmul.f32 0.2, %v1220_v12  ;;  %vm1241_vm1 = vcmp.gt.f32.partialorder %v1221_v13, 0.0  ;;  %v1261_v19 = vmul.f32 0.2, %v1221_v13  ;;  %vm1240_vm2 = vcmp.gt.f32.partialorder %v1220_v12, 0.0 }
 0x198   : > { %v1109_v20 = vpop.f32.mrf.mxu2 }
 0x199   : > { %v1281_v21 = vsel %vm1241_vm1, %v1221_v13, %v1261_v19  ;;  %v1280_v52 = vsel %vm1240_vm2, %v1220_v12, %v1260_v18  ;;  %v1212_v41 = vadd.f32 %v5656_v34, %v1109_v20 }
 0x19a   : > { %v1291_v23 = vpack.c.bf16 %v1281_v21, %v1276_v15  ;;  %v1290_v24 = vpack.c.bf16 %v1280_v52, %v1275_v22 }
 0x19b   : > { %v1252_v0 = vmul.f32 0.2, %v1212_v41  ;;  %vm1232_vm11 = vcmp.gt.f32.partialorder %v1212_v41, 0.0 }
 0x19c   : > { %v5665_v26 = vpop.f32.mrf.mxu0  ;;  %1338 = vmatpush.bf16.msrb.mxu1 %v1290_v24  ;;  %4348 = vmatpush.bf16.msrb.mxu3 %v1290_v24 }
 0x19d   : > { %1357 = vmatpush.bf16.msra.mxu2 %v1291_v23  ;;  %v1272_v28 = vsel %vm1232_vm11, %v1212_v41, %v1252_v0  ;;  %v1088_v30 = vpop.f32.mrf.mxu1 }
 0x19e   : > { %v1287_v1 = vpack.c.bf16 %v1272_v28, %v1267_v29 }
 0x1a0   : > { %1339 = vmatpush.bf16.msrb.mxu1 %v1285_v31  ;;  %4349 = vmatpush.bf16.msrb.mxu3 %v1285_v31  ;;  %v1112_v39 = vpop.f32.mrf.mxu2 }
 0x1a1   : > { %1358 = vmatpush.bf16.msra.mxu2 %v1286_v32  ;;  %v1217_v46 = vadd.f32 %v5651_v10, %v1112_v39 }
 0x1a3   : > { %3832 = vmatmul.msk.bf16.vlgmr.msrb.gmra.mxu1 %vm1325_vm7, %v5670_v33  ;;  %3833 = vmatmul.msk.bf16.vlgmr.msrb.gmra.mxu3 %vm1325_vm7, %v5675_v38  ;;  %v1257_v57 = vmul.f32 0.2, %v1217_v46  ;;  %vm1237_vm8 = vcmp.gt.f32.partialorder %v1217_v46, 0.0 }
 0x1a4   : > { %3834 = vmatmul.msk.bf16.vlgmr.msra.gmra.mxu2 %vm1325_vm7, %v5670_v33  ;;  %v5683_v44 = vpop.f32.mrf.mxu0 }
 0x1a5   : > { %v1277_v58 = vsel %vm1237_vm8, %v1217_v46, %v1257_v57  ;;  %v1090_v39 = vpop.f32.mrf.mxu1 }
 0x1a8   : > { %v1114_v56 = vpop.f32.mrf.mxu2 }
 0x1a9   : > { %v1222_v60 = vadd.f32 %v5649_v50, %v1114_v56  ;;  %v1136_v62 = vpop.f32.mrf.mxu3 }
 0x1aa   : > { %v1208_v5 = vadd.f32 %v5654_v54, %v1136_v62  ;;  %v5739_v62 = vpop.permute.xlu0 %1312 }
 0x1ab   : > { %vm1242_vm9 = vcmp.gt.f32.partialorder %v1222_v60, 0.0  ;;  %v1262_v47 = vmul.f32 0.2, %v1222_v60 }
 0x1ac   : > { %v5689_v37 = vpop.f32.mrf.mxu0  ;;  %v1248_v8 = vmul.f32 0.2, %v1208_v5  ;;  %vm1228_vm15 = vcmp.gt.f32.partialorder %v1208_v5, 0.0 }
 0x1ad   : > { %v1282_v27 = vsel %vm1242_vm9, %v1222_v60, %v1262_v47  ;;  %v5727_v41 = vpop.f32.mrf.mxu1 }
 0x1ae   : > { %v1292_v48 = vpack.c.bf16 %v1282_v27, %v1277_v58  ;;  %v1268_v15 = vsel %vm1228_vm15, %v1208_v5, %v1248_v8 }
 0x1b0   : > { %1376 = vmatpush.bf16.msra.mxu3 %v1292_v48 }
 0x1b1   : > { %v1138_v49 = vpop.f32.mrf.mxu3 }
 0x1b2   : > { %v1213_v36 = vadd.f32 %v5656_v34, %v1138_v49  ;;  %v5749_v48 = vpop.permute.xlu0 %1428 }
 0x1b3   : > { %v1443_v28 = vadd.f32 %v5749_v48, %v5665_v26 }
 0x1b4   : > { %3835 = vmatmul.msk.bf16.gmra.mxu2 %vm1325_vm7, %v5675_v38  ;;  %v5693_v2 = vpop.f32.mrf.mxu0  ;;  %1377 = vmatpush.bf16.msra.mxu3 %v1287_v1  ;;  %v1253_v7 = vmul.f32 0.2, %v1213_v36  ;;  %vm1233_vm14 = vcmp.gt.f32.partialorder %v1213_v36, 0.0 }
 0x1b5   : > { %v5737_v60 = vpop.f32.mrf.mxu1 }
 0x1b6   : > { %v1273_v14 = vsel %vm1233_vm14, %v1213_v36, %v1253_v7  ;;  %v1444_v36 = vadd.f32 %v5749_v48, %v1088_v30 }
 0x1b7   : > { %3836 = vmatmul.msk.bf16.vlgmr.msra.gmra.mxu3 %vm1325_vm7, %v5670_v33  ;;  %v1288_v16 = vpack.c.bf16 %v1273_v14, %v1268_v15 }
 0x1b9   : > { %v1141_v9 = vpop.f32.mrf.mxu3 }
 0x1ba   : > { %v1218_v4 = vadd.f32 %v5651_v10, %v1141_v9 }
 0x1bc   : > { %v1165_v3 = vpop.f32.mrf.mxu0  ;;  %v1258_v6 = vmul.f32 0.2, %v1218_v4  ;;  %vm1238_vm12 = vcmp.gt.f32.partialorder %v1218_v4, 0.0 }
 0x1bd   : > { %v1209_v35 = vadd.f32 %v5654_v54, %v1165_v3 }
 0x1be   : > { %v1278_v11 = vsel %vm1238_vm12, %v1218_v4, %v1258_v6 }
 0x1bf   : > { %v1249_v23 = vmul.f32 0.2, %v1209_v35  ;;  %vm1229_vm3 = vcmp.gt.f32.partialorder %v1209_v35, 0.0 }
 0x1c1   : > { %v1143_v40 = vpop.f32.mrf.mxu3 }
 0x1c2   : > { %v1223_v55 = vadd.f32 %v5649_v50, %v1143_v40 }
 0x1c4   : > { %vm1243_vm13 = vcmp.gt.f32.partialorder %v1223_v55, 0.0  ;;  %v1263_v59 = vmul.f32 0.2, %v1223_v55  ;;  %v1167_v42 = vpop.f32.mrf.mxu0 }
 0x1c5   : > { %v1214_v19 = vadd.f32 %v5656_v34, %v1167_v42 }
 0x1c6   : > { %v1283_v12 = vsel %vm1243_vm13, %v1223_v55, %v1263_v59 }
 0x1c7   : > { %v1293_v13 = vpack.c.bf16 %v1283_v12, %v1278_v11  ;;  %3837 = vmatmul.msk.bf16.gmra.mxu3 %vm1325_vm7, %v5675_v38  ;;  %v1254_v22 = vmul.f32 0.2, %v1214_v19  ;;  %vm1234_vm2 = vcmp.gt.f32.partialorder %v1214_v19, 0.0 }
 0x1c9   : > { %1395 = vmatpush.bf16.msra.mxu1 %v1293_v13  ;;  %v1274_v53 = vsel %vm1234_vm2, %v1214_v19, %v1254_v22  ;;  %v5719_v31 = vpop.f32.mrf.mxu3 }
 0x1cc   : > { %v1170_v17 = vpop.f32.mrf.mxu0 }
 0x1cd   : > { %1396 = vmatpush.bf16.msra.mxu1 %v1288_v16  ;;  %v1219_v18 = vadd.f32 %v5651_v10, %v1170_v17  ;;  %v1269_v10 = vsel %vm1229_vm3, %v1209_v35, %v1249_v23 }
 0x1ce   : > { %v1289_v34 = vpack.c.bf16 %v1274_v53, %v1269_v10 }
 0x1cf   : > { %v1259_v45 = vmul.f32 0.2, %v1219_v18  ;;  %vm1239_vm0 = vcmp.gt.f32.partialorder %v1219_v18, 0.0 }
 0x1d0   : > { %3838 = vmatmul.msk.bf16.vlgmr.msra.gmra.mxu1 %vm1325_vm7, %v5670_v33 }
 0x1d1   : > { %v1279_v24 = vsel %vm1239_vm0, %v1219_v18, %v1259_v45  ;;  %v5723_v46 = vpop.f32.mrf.mxu3 }
 0x1d4   : > { %v1172_v20 = vpop.f32.mrf.mxu0 }
 0x1d5   : > { %v1224_v21 = vadd.f32 %v5649_v50, %v1172_v20  ;;  %v5713_v50 = vpop.f32.mrf.mxu2 }
 0x1d7   : > { %vm1244_vm1 = vcmp.gt.f32.partialorder %v1224_v21, 0.0  ;;  %v1264_v52 = vmul.f32 0.2, %v1224_v21 }
 0x1d9   : > { %v1284_v25 = vsel %vm1244_vm1, %v1224_v21, %v1264_v52  ;;  %v5731_v56 = vpop.f32.mrf.mxu3 }
 0x1da   : > { %v1294_v61 = vpack.c.bf16 %v1284_v25, %v1279_v24 }
 0x1dc   : > { %1414 = vmatpush.bf16.msrb.mxu2 %v1294_v61 }
 0x1dd   : > { %v5717_v54 = vpop.f32.mrf.mxu2 }
 0x1e0   : > { %1415 = vmatpush.bf16.msrb.mxu2 %v1289_v34  ;;  %3839 = vmatmul.msk.bf16.gmra.mxu1 %vm1325_vm7, %v5675_v38 }
 0x1e1   : > { %v5743_v0 = vpop.f32.mrf.mxu3 }
 0x1e3   : > { %3840 = vmatmul.msk.bf16.vlgmr.msrb.gmra.mxu2 %vm1325_vm7, %v5670_v33  ;;  %v5729_v33 = vpop.permute.xlu1 %1436 }
 0x1e4   : > { %v1453_v12 = vadd.f32 %v5729_v33, %v5689_v37  ;;  %v1454_v34 = vadd.f32 %v5729_v33, %v5727_v41 }
 0x1e5   : > { %v5721_v32 = vpop.f32.mrf.mxu2 }
 0x1eb   : > { %v5741_v63 = vpop.permute.xlu1 %1300 }
 0x1ed   : > { %v5725_v51 = vpop.f32.mrf.mxu2 }
 0x1f3   : > { %3841 = vmatmul.msk.bf16.gmra.mxu2 %vm1325_vm7, %v5675_v38  ;;  %v5735_v38 = vpop.permute.xlu2 %1308  ;;  %v5754_v49 = vpop.permute.xlu1 %1432 }
 0x1f4   : > { %v1448_v6 = vadd.f32 %v5754_v49, %v5683_v44  ;;  %v1449_v20 = vadd.f32 %v5754_v49, %v1090_v39 }
 0x1f5   : > { %v5733_v57 = vpop.f32.mrf.mxu2 }
 0x1fb   : > { %v5747_v58 = vpop.permute.xlu2 %1440 }
 0x1fc   : > { %v1458_v17 = vadd.f32 %v5747_v58, %v5693_v2 }
 0x1fd   : > { %v5745_v47 = vpop.f32.mrf.mxu2 }
 0x203   : > { %v5756_v3 = vpop.permute.xlu2 %1304 }
 0x220   : > { %v1341_v27 = vpop.f32.mrf.mxu1 }
 0x221   : > { %v1342_v29 = vadd.f32 %v1341_v27, %v5741_v63 }
 0x223   : > { %v1463_v1 = vadd.f32 %v1443_v28, %v1342_v29 }
 0x225   : > { %v1503_v7 = vmul.f32 0.2, %v1463_v1  ;;  %vm1483_vm4 = vcmp.gt.f32.partialorder %v1463_v1, 0.0 }
 0x226   : > { %v1346_v9 = vpop.f32.mrf.mxu3 }
 0x227   : > { %v1360_v4 = vpop.f32.mrf.mxu2  ;;  %v1347_v8 = vadd.f32 %v1346_v9, %v5735_v38  ;;  %v1523_v15 = vsel %vm1483_vm4, %v1463_v1, %v1503_v7 }
 0x228   : > { %v1361_v40 = vadd.f32 %v1360_v4, %v5741_v63  ;;  %v1343_v5 = vpop.f32.mrf.mxu1 }
 0x229   : > { %v1344_v55 = vadd.f32 %v1343_v5, %v5756_v3  ;;  %v1473_v37 = vadd.f32 %v1453_v12, %v1347_v8  ;;  %v1450_v8 = vadd.f32 %v5754_v49, %v5717_v54 }
 0x22a   : > { %v1464_v59 = vadd.f32 %v1444_v36, %v1361_v40 }
 0x22b   : > { %v1468_v26 = vadd.f32 %v1448_v6, %v1344_v55  ;;  %v1513_v30 = vmul.f32 0.2, %v1473_v37  ;;  %vm1493_vm10 = vcmp.gt.f32.partialorder %v1473_v37, 0.0  ;;  %v1459_v6 = vadd.f32 %v5747_v58, %v5737_v60 }
 0x22c   : > { %v1504_v42 = vmul.f32 0.2, %v1464_v59  ;;  %vm1484_vm5 = vcmp.gt.f32.partialorder %v1464_v59, 0.0 }
 0x22d   : > { %v4582_v11 = vpack.i.bf16 %v1468_v26, %v1463_v1  ;;  %v1508_v14 = vmul.f32 0.2, %v1468_v26  ;;  %vm1488_vm6 = vcmp.gt.f32.partialorder %v1468_v26, 0.0  ;;  %v1533_v4 = vsel %vm1493_vm10, %v1473_v37, %v1513_v30 }
 0x22e   : > { %v1348_v13 = vpop.f32.mrf.mxu3  ;;  %v1524_v16 = vsel %vm1484_vm5, %v1464_v59, %v1504_v42  ;;  %v1445_v42 = vadd.f32 %v5749_v48, %v5713_v50  ;;  %vm1607_vm10 = vcmp.lt.s32.totalorder %v5352_v43, 125 }
 0x22f   : > { %v1349_v44 = vadd.f32 %v1348_v13, %v5739_v62  ;;  %v1362_v18 = vpop.f32.mrf.mxu2  ;;  %4583 = vrot.lane.b32.xlu0 %v4582_v11, %s5103_s8  ;;  %v1543_v19 = vpack.c.bf16 %v1524_v16, %v1523_v15  ;;  %v1528_v22 = vsel %vm1488_vm6, %v1468_v26, %v1508_v14 }
 0x230   : > { %v1363_v35 = vadd.f32 %v1362_v18, %v5756_v3  ;;  %v4587_v2 = vpack.i.bf16 %v1528_v22, %v1523_v15 }
 0x231   : > { %v1478_v45 = vadd.f32 %v1458_v17, %v1349_v44  ;;  %1555 = vst [vmem:[#allocation2] sm:$0xff] %v1543_v19 }
 0x232   : > { %v1469_v21 = vadd.f32 %v1449_v20, %v1363_v35  ;;  %v1446_v35 = vadd.f32 %v5749_v48, %v5719_v31  ;;  %v1455_v31 = vadd.f32 %v5729_v33, %v5721_v32 }
 0x233   : > { %v4592_v52 = vpack.i.bf16 %v1478_v45, %v1473_v37  ;;  %v1518_v61 = vmul.f32 0.2, %v1478_v45  ;;  %vm1498_vm9 = vcmp.gt.f32.partialorder %v1478_v45, 0.0 }
 0x234   : > { %v4597_v23 = vpack.i.bf16 %v1469_v21, %v1464_v59  ;;  %vm1489_vm8 = vcmp.gt.f32.partialorder %v1469_v21, 0.0  ;;  %v1509_v24 = vmul.f32 0.2, %v1469_v21 }
 0x235   : > { %4593 = vrot.lane.b32.xlu2 %v4592_v52, %s5103_s8  ;;  %v1538_v28 = vsel %vm1498_vm9, %v1478_v45, %v1518_v61 }
 0x236   : > { %4598 = vrot.lane.b32.xlu1 %v4597_v23, %s5103_s8  ;;  %v1529_v25 = vsel %vm1489_vm8, %v1469_v21, %v1509_v24  ;;  %v4602_v36 = vpack.i.bf16 %v1538_v28, %v1533_v4 }
 0x237   : > { %v1365_v53 = vpop.f32.mrf.mxu2  ;;  %4588 = vrot.lane.b32.xlu0 %v4587_v2, %s5104_s9  ;;  %v1546_v10 = vpack.c.bf16 %v1529_v25, %v1528_v22  ;;  %v5778_v9 = vpack.i.bf16 %v1529_v25, %v1524_v16 }
 0x238   : > { %v1366_v39 = vadd.f32 %v1365_v53, %v5735_v38 }
 0x239   : > { %1558 = vst [vmem:[#allocation2 + $0x14] sm:$0xff] %v1546_v10 }
 0x23a   : > { %v1474_v27 = vadd.f32 %v1454_v34, %v1366_v39  ;;  %v1379_v29 = vpop.f32.mrf.mxu3  ;;  %v1451_v39 = vadd.f32 %v5754_v49, %v5723_v46 }
 0x23b   : > { %v1380_v7 = vadd.f32 %v1379_v29, %v5741_v63 }
 0x23c   : > { %v1514_v1 = vmul.f32 0.2, %v1474_v27  ;;  %vm1494_vm11 = vcmp.gt.f32.partialorder %v1474_v27, 0.0 }
 0x23d   : > { %v1465_v14 = vadd.f32 %v1445_v42, %v1380_v7 }
 0x23e   : > { %4608 = vrot.lane.b32.xlu1 %v5778_v9, %s5104_s9  ;;  %v1534_v40 = vsel %vm1494_vm11, %v1474_v27, %v1514_v1  ;;  %vm1692_vm11 = vcmp.lt.s32.totalorder %v5352_v43, 122 }
 0x23f   : > { %v1367_v5 = vpop.f32.mrf.mxu2  ;;  %4603 = vrot.lane.b32.xlu0 %v4602_v36, %s5104_s9  ;;  %v1549_v41 = vpack.c.bf16 %v1534_v40, %v1533_v4  ;;  %v1505_v50 = vmul.f32 0.2, %v1465_v14  ;;  %vm1485_vm14 = vcmp.gt.f32.partialorder %v1465_v14, 0.0 }
 0x240   : > { %v1368_v55 = vadd.f32 %v1367_v5, %v5739_v62 }
 0x241   : > { %1561 = vst [vmem:[#allocation2 + $0x28] sm:$0xff] %v1549_v41  ;;  %v1525_v45 = vsel %vm1485_vm14, %v1465_v14, %v1505_v50 }
 0x242   : > { %v1479_v59 = vadd.f32 %v1459_v6, %v1368_v55  ;;  %v1381_v26 = vpop.f32.mrf.mxu3 }
 0x243   : > { %v1382_v11 = vadd.f32 %v1381_v26, %v5756_v3 }
 0x244   : > { %v4622_v12 = vpack.i.bf16 %v1479_v59, %v1474_v27  ;;  %vm1499_vm12 = vcmp.gt.f32.partialorder %v1479_v59, 0.0  ;;  %v1519_v13 = vmul.f32 0.2, %v1479_v59 }
 0x245   : > { %v1470_v60 = vadd.f32 %v1450_v8, %v1382_v11 }
 0x246   : > { %4623 = vrot.lane.b32.xlu1 %v4622_v12, %s5103_s8  ;;  %v1539_v15 = vsel %vm1499_vm12, %v1479_v59, %v1519_v13  ;;  %v1175_v59 = vpop.f32.mrf.mxu0 }
 0x247   : > { %4613 = vrot.lane.b32.xlu0 %v4602_v36, %s5103_s8  ;;  %v4627_v16 = vpack.i.bf16 %v1470_v60, %v1465_v14  ;;  %v1552_v44 = vpack.c.bf16 %v1539_v15, %v1538_v28  ;;  %v1510_v17 = vmul.f32 0.2, %v1470_v60  ;;  %vm1490_vm13 = vcmp.gt.f32.partialorder %v1470_v60, 0.0 }
 0x248   : > { %v4632_v18 = vpack.i.bf16 %v1539_v15, %v1534_v40  ;;  %v1456_v40 = vadd.f32 %v5729_v33, %v5731_v56  ;;  %v1447_v13 = vadd.f32 %v5749_v48, %v1175_v59 }
 0x249   : > { %4628 = vrot.lane.b32.xlu2 %v4627_v16, %s5103_s8  ;;  %1564 = vst [vmem:[#allocation2 + $0x3c] sm:$0xff] %v1552_v44  ;;  %v1530_v19 = vsel %vm1490_vm13, %v1470_v60, %v1510_v17 }
 0x24a   : > { %v1384_v54 = vpop.f32.mrf.mxu3  ;;  %v5800_v21 = vpack.i.bf16 %v1530_v19, %v1525_v45 }
 0x24b   : > { %v1385_v52 = vadd.f32 %v1384_v54, %v5735_v38 }
 0x24d   : > { %v1398_v20 = vpop.f32.mrf.mxu1  ;;  %v1475_v53 = vadd.f32 %v1455_v31, %v1385_v52  ;;  %v1457_v31 = vadd.f32 %v5729_v33, %v5733_v57  ;;  %v1462_v33 = vadd.f32 %v5747_v58, %v5745_v47 }
 0x24e   : > { %4633 = vrot.lane.b32.xlu1 %v4632_v18, %s5104_s9  ;;  %v1399_v37 = vadd.f32 %v1398_v20, %v5741_v63  ;;  %v1177_v50 = vpop.f32.mrf.mxu0 }
 0x24f   : > { %4618 = vrot.lane.b32.xlu0 %v4587_v2, %s5103_s8  ;;  %v1460_v2 = vadd.f32 %v5747_v58, %v5725_v51  ;;  %v1515_v28 = vmul.f32 0.2, %v1475_v53  ;;  %vm1495_vm2 = vcmp.gt.f32.partialorder %v1475_v53, 0.0 }
 0x250   : > { %v5802_v22 = vadd.f32 %v1446_v35, %v1399_v37 }
 0x251   : > { %4638 = vrot.lane.b32.xlu2 %v5800_v21, %s5104_s9  ;;  %v1535_v41 = vsel %vm1495_vm2, %v1475_v53, %v1515_v28 }
 0x252   : > { %v1506_v23 = vmul.f32 0.2, %v5802_v22  ;;  %v1386_v24 = vpop.f32.mrf.mxu3  ;;  %vm1486_vm15 = vcmp.gt.f32.partialorder %v5802_v22, 0.0 }
 0x253   : > { %v1387_v25 = vadd.f32 %v1386_v24, %v5739_v62 }
 0x254   : > { %v5815_v61 = vsel %vm1486_vm15, %v5802_v22, %v1506_v23 }
 0x255   : > { %v1480_v10 = vadd.f32 %v1460_v2, %v1387_v25  ;;  %v1400_v34 = vpop.f32.mrf.mxu1  ;;  %v1544_v30 = vpack.c.bf16 %v5815_v61, %v1525_v45 }
 0x256   : > { %4643 = vrot.lane.b32.xlu1 %v4632_v18, %s5103_s8  ;;  %v1401_v32 = vadd.f32 %v1400_v34, %v5756_v3 }
 0x257   : > { %v4652_v27 = vpack.i.bf16 %v1480_v10, %v1475_v53  ;;  %1556 = vst [vmem:[#allocation2 + $0x8] sm:$0xff] %v1544_v30  ;;  %v1520_v29 = vmul.f32 0.2, %v1480_v10  ;;  %vm1500_vm0 = vcmp.gt.f32.partialorder %v1480_v10, 0.0 }
 0x258   : > { %v5822_v51 = vadd.f32 %v1451_v39, %v1401_v32 }
 0x259   : > { %4653 = vrot.lane.b32.xlu2 %v4652_v27, %s5103_s8  ;;  %v1540_v4 = vsel %vm1500_vm0, %v1480_v10, %v1520_v29 }
 0x25a   : > { %vm1491_vm1 = vcmp.gt.f32.partialorder %v5822_v51, 0.0  ;;  %v1511_v1 = vmul.f32 0.2, %v5822_v51  ;;  %v4657_v55 = vpack.i.bf16 %v1540_v4, %v1535_v41 }
 0x25c   : > { %v1531_v36 = vsel %vm1491_vm1, %v5822_v51, %v1511_v1 }
 0x25d   : > { %v1403_v46 = vpop.f32.mrf.mxu1  ;;  %v1547_v6 = vpack.c.bf16 %v1531_v36, %v1530_v19  ;;  %v4697_v25 = vpack.i.bf16 %v1531_v36, %v5815_v61 }
 0x25e   : > { %4648 = vrot.lane.b32.xlu1 %v5778_v9, %s5103_s8  ;;  %v1404_v5 = vadd.f32 %v1403_v46, %v5735_v38  ;;  %v1461_v9 = vadd.f32 %v5747_v58, %v5743_v0 }
 0x25f   : > { %1559 = vst [vmem:[#allocation2 + $0x1c] sm:$0xff] %v1547_v6 }
 0x260   : > { %v1476_v7 = vadd.f32 %v1456_v40, %v1404_v5 }
 0x261   : > { %4658 = vrot.lane.b32.xlu2 %v4657_v55, %s5104_s9 }
 0x262   : > { %v1516_v26 = vmul.f32 0.2, %v1476_v7  ;;  %vm1496_vm3 = vcmp.gt.f32.partialorder %v1476_v7, 0.0 }
 0x264   : > { %v5834_v42 = vsel %vm1496_vm3, %v1476_v7, %v1516_v26 }
 0x265   : > { %v1405_v8 = vpop.f32.mrf.mxu1  ;;  %v1550_v56 = vpack.c.bf16 %v5834_v42, %v1535_v41 }
 0x266   : > { %v1417_v11 = vpop.f32.mrf.mxu2  ;;  %v1406_v12 = vadd.f32 %v1405_v8, %v5739_v62 }
 0x267   : > { %v1418_v14 = vadd.f32 %v1417_v11, %v5741_v63  ;;  %1562 = vst [vmem:[#allocation2 + $0x30] sm:$0xff] %v1550_v56  ;;  %v1452_v63 = vadd.f32 %v5754_v49, %v1177_v50 }
 0x268   : > { %v1481_v60 = vadd.f32 %v1461_v9, %v1406_v12 }
 0x269   : > { %v1467_v15 = vadd.f32 %v1447_v13, %v1418_v14  ;;  %4663 = vrot.lane.b32.xlu2 %v4657_v55, %s5103_s8 }
 0x26a   : > { %v4672_v16 = vpack.i.bf16 %v1481_v60, %v1476_v7  ;;  %vm1501_vm4 = vcmp.gt.f32.partialorder %v1481_v60, 0.0  ;;  %v1521_v44 = vmul.f32 0.2, %v1481_v60 }
 0x26b   : > { %v1507_v17 = vmul.f32 0.2, %v1467_v15  ;;  %vm1487_vm5 = vcmp.gt.f32.partialorder %v1467_v15, 0.0 }
 0x26c   : > { %4673 = vrot.lane.b32.xlu0 %v4672_v16, %s5103_s8  ;;  %v1541_v0 = vsel %vm1501_vm4, %v1481_v60, %v1521_v44 }
 0x26d   : > { %v1553_v54 = vpack.c.bf16 %v1541_v0, %v1540_v4  ;;  %v1527_v18 = vsel %vm1487_vm5, %v1467_v15, %v1507_v17  ;;  %v4692_v27 = vpack.i.bf16 %v1541_v0, %v5834_v42 }
 0x26e   : > { %v1419_v19 = vpop.f32.mrf.mxu2  ;;  %v1545_v48 = vpack.c.bf16 %v1527_v18, %v1527_v18 }
 0x26f   : > { %v1420_v20 = vadd.f32 %v1419_v19, %v5756_v3  ;;  %1565 = vst [vmem:[#allocation2 + $0x44] sm:$0xff] %v1553_v54  ;;  %v4677_v3 = vpack.i.bf16 %v5822_v51, %v5802_v22 }
 0x270   : > { %1557 = vst [vmem:[#allocation2 + $0x10] sm:$0xf] %v1545_v48 }
 0x271   : > { %v1472_v35 = vadd.f32 %v1452_v63, %v1420_v20  ;;  %4668 = vrot.lane.b32.xlu2 %v5800_v21, %s5103_s8 }
 0x273   : > { %v4682_v37 = vpack.i.bf16 %v1472_v35, %v1467_v15  ;;  %vm1492_vm6 = vcmp.gt.f32.partialorder %v1472_v35, 0.0  ;;  %v1512_v45 = vmul.f32 0.2, %v1472_v35 }
 0x275   : > { %4683 = vrot.lane.b32.xlu0 %v4682_v37, %s5103_s8  ;;  %v1532_v52 = vsel %vm1492_vm6, %v1472_v35, %v1512_v45 }
 0x276   : > { %v1422_v23 = vpop.f32.mrf.mxu2  ;;  %v1548_v24 = vpack.c.bf16 %v1532_v52, %v1532_v52 }
 0x277   : > { %v1423_v49 = vadd.f32 %v1422_v23, %v5735_v38 }
 0x278   : > { %1560 = vst [vmem:[#allocation2 + $0x24] sm:$0xf] %v1548_v24 }
 0x279   : > { %v1477_v2 = vadd.f32 %v1457_v31, %v1423_v49  ;;  %4678 = vrot.lane.b32.xlu2 %v4677_v3, %s5103_s8 }
 0x27b   : > { %v1517_v21 = vmul.f32 0.2, %v1477_v2  ;;  %vm1497_vm8 = vcmp.gt.f32.partialorder %v1477_v2, 0.0 }
 0x27d   : > { %4698 = vrot.lane.b32.xlu0 %v4697_v25, %s5104_s9  ;;  %v1537_v53 = vsel %vm1497_vm8, %v1477_v2, %v1517_v21 }
 0x27e   : > { %v1424_v10 = vpop.f32.mrf.mxu2  ;;  %v1551_v34 = vpack.c.bf16 %v1537_v53, %v1537_v53 }
 0x27f   : > { %v1425_v57 = vadd.f32 %v1424_v10, %v5739_v62  ;;  %v4702_v62 = vpack.i.bf16 %v1532_v52, %v1527_v18 }
 0x280   : > { %1563 = vst [vmem:[#allocation2 + $0x38] sm:$0xf] %v1551_v34 }
 0x281   : > { %v1482_v38 = vadd.f32 %v1462_v33, %v1425_v57 }
 0x283   : > { %v4687_v22 = vpack.i.bf16 %v1482_v38, %v1477_v2  ;;  %vm1502_vm9 = vcmp.gt.f32.partialorder %v1482_v38, 0.0  ;;  %v1522_v30 = vmul.f32 0.2, %v1482_v38 }
 0x285   : > { %4688 = vrot.lane.b32.xlu1 %v4687_v22, %s5103_s8  ;;  %v1542_v39 = vsel %vm1502_vm9, %v1482_v38, %v1522_v30 }
 0x286   : > { %v4707_v61 = vpack.i.bf16 %v1542_v39, %v1537_v53  ;;  %v1554_v32 = vpack.c.bf16 %v1542_v39, %v1542_v39 }
 0x288   : > { %1566 = vst [vmem:[#allocation2 + $0x4c] sm:$0xf] %v1554_v32  ;;  %4708 = vrot.lane.b32.xlu2 %v4707_v61, %s5104_s9  ;;  %4718 = vrot.lane.b32.xlu0 %v4707_v61, %s5103_s8 }
 0x28d   : > { %4693 = vrot.lane.b32.xlu1 %v4692_v27, %s5104_s9 }
 0x28f   : > { %v5868_v47 = vpop.permute.xlu2 %4593 }
 0x290   : > { %4713 = vrot.lane.b32.xlu2 %v4692_v27, %s5103_s8  ;;  %v4596_v54 = vunpack.i.h.bf16 %v5868_v47  ;;  %v4595_v18 = vunpack.i.l.bf16 %v5868_v47 }
 0x295   : > { %4703 = vrot.lane.b32.xlu1 %v4702_v62, %s5104_s9 }
 0x298   : > { %4728 = vrot.lane.b32.xlu2 %v4702_v62, %s5103_s8 }
 0x29d   : > { %4723 = vrot.lane.b32.xlu1 %v4697_v25, %s5103_s8 }
 0x2a1   : > { %v5871_v58 = vpop.permute.xlu0 %4583 }
 0x2a2   : > { %v4586_v29 = vunpack.i.h.bf16 %v5871_v58  ;;  %v4585_v28 = vunpack.i.l.bf16 %v5871_v58 }
 0x2a3   : > { %v5873_v51 = vpop.permute.xlu2 %4628 }
 0x2a4   : > { %v4631_v4 = vunpack.i.h.bf16 %v5873_v51  ;;  %v4630_v46 = vunpack.i.l.bf16 %v5873_v51 }
 0x2a8   : > { %v4599_v1 = vpop.permute.xlu1 %4598 }
 0x2a9   : > { %v4601_v36 = vunpack.i.h.bf16 %v4599_v1  ;;  %v4600_v40 = vunpack.i.l.bf16 %v4599_v1  ;;  %v5898_v42 = vpop.permute.xlu0 %4588 }
 0x2aa   : > { %v4591_v8 = vunpack.i.h.bf16 %v5898_v42  ;;  %v4590_v56 = vunpack.i.l.bf16 %v5898_v42 }
 0x2ab   : > { %v1785_v5 = vsel %vm1607_vm10, %v4600_v40, %v4630_v46  ;;  %v1786_v41 = vsel %vm1607_vm10, %v4601_v36, %v4631_v4  ;;  %v1789_v6 = vsel %vm1607_vm10, %v4585_v28, %v4600_v40  ;;  %v1790_v55 = vsel %vm1607_vm10, %v4586_v29, %v4601_v36  ;;  %v5896_v7 = vpop.permute.xlu2 %4638 }
 0x2ac   : > { %v1797_v59 = vpack.c.bf16 %v1785_v5, %v1789_v6  ;;  %v1800_v26 = vpack.c.bf16 %v1786_v41, %v1790_v55  ;;  %v4641_v11 = vunpack.i.h.bf16 %v5896_v7  ;;  %v4640_v12 = vunpack.i.l.bf16 %v5896_v7 }
 0x2ae   : > { %1809 = vst [vmem:[#allocation2 + $0xf0] sm:$0xff] %v1797_v59 }
 0x2af   : > { %1812 = vst [vmem:[#allocation2 + $0x104] sm:$0xff] %v1800_v26 }
 0x2b0   : > { %v4609_v9 = vpop.permute.xlu1 %4608 }
 0x2b1   : > { %v4611_v13 = vunpack.i.h.bf16 %v4609_v9  ;;  %v4610_v14 = vunpack.i.l.bf16 %v4609_v9  ;;  %v5925_v48 = vpop.permute.xlu0 %4603 }
 0x2b2   : > { %v4606_v2 = vunpack.i.h.bf16 %v5925_v48  ;;  %v4605_v21 = vunpack.i.l.bf16 %v5925_v48  ;;  %v6056_v48 = vld [vmem:[%s6894_s4 + $0x8] sm:$0xff] }
 0x2b3   : > { %v1701_v60 = vsel %vm1692_vm11, %v4610_v14, %v4640_v12  ;;  %v1702_v15 = vsel %vm1692_vm11, %v4611_v13, %v4641_v11  ;;  %v1705_v16 = vsel %vm1692_vm11, %v4590_v56, %v4610_v14  ;;  %v1706_v44 = vsel %vm1692_vm11, %v4591_v8, %v4611_v13  ;;  %v5921_v17 = vpop.permute.xlu2 %4653 }
 0x2b4   : > { %v1713_v50 = vpack.c.bf16 %v1701_v60, %v1705_v16  ;;  %v1716_v0 = vpack.c.bf16 %v1702_v15, %v1706_v44  ;;  %v4656_v63 = vunpack.i.h.bf16 %v5921_v17  ;;  %v4655_v20 = vunpack.i.l.bf16 %v5921_v17 }
 0x2b5   : > { %v3980_v36 = vld [vmem:[#allocation2 + $0xf0] sm:$0xf]  ;;  %v4285_v40 = vld [vmem:[#allocation2 + $0xf4] sm:$0xf] }
 0x2b6   : > { %1725 = vst [vmem:[#allocation2 + $0xa0] sm:$0xff] %v1713_v50  ;;  %v4287_v59 = vld [vmem:[#allocation2 + $0x100] sm:$0xf0]  ;;  %v3982_v26 = vld [vmem:[#allocation2 + $0x104] sm:$0xf0] }
 0x2b7   : > { %1728 = vst [vmem:[#allocation2 + $0xb4] sm:$0xff] %v1716_v0  ;;  %v3981_v50 = vor.u32 %v4287_v59, %v3980_v36  ;;  %v3985_v0 = vor.u32 %v4285_v40, %v3982_v26 }
 0x2b8   : > { %v4624_v19 = vpop.permute.xlu1 %4623 }
 0x2b9   : > { %v4626_v35 = vunpack.i.h.bf16 %v4624_v19  ;;  %v4625_v37 = vunpack.i.l.bf16 %v4624_v19  ;;  %v5951_v57 = vpop.permute.xlu0 %4613 }
 0x2ba   : > { %v4616_v9 = vunpack.i.h.bf16 %v5951_v57  ;;  %v4615_v13 = vunpack.i.l.bf16 %v5951_v57 }
 0x2bb   : > { %v1787_v45 = vsel %vm1607_vm10, %v4625_v37, %v4655_v20  ;;  %v1788_v52 = vsel %vm1607_vm10, %v4626_v35, %v4656_v63  ;;  %v1791_v23 = vsel %vm1607_vm10, %v4595_v18, %v4625_v37  ;;  %v1792_v24 = vsel %vm1607_vm10, %v4596_v54, %v4626_v35  ;;  %v5945_v31 = vpop.permute.xlu2 %4658 }
 0x2bc   : > { %v1803_v49 = vpack.c.bf16 %v1787_v45, %v1791_v23  ;;  %v1806_v3 = vpack.c.bf16 %v1788_v52, %v1792_v24  ;;  %v4661_v53 = vunpack.i.h.bf16 %v5945_v31  ;;  %v4660_v10 = vunpack.i.l.bf16 %v5945_v31 }
 0x2be   : > { %1815 = vst [vmem:[#allocation2 + $0x118] sm:$0xff] %v1803_v49 }
 0x2bf   : > { %1818 = vst [vmem:[#allocation2 + $0x12c] sm:$0xff] %v1806_v3 }
 0x2c0   : > { %v4634_v25 = vpop.permute.xlu1 %4633 }
 0x2c1   : > { %v4636_v34 = vunpack.i.h.bf16 %v4634_v25  ;;  %v4635_v33 = vunpack.i.l.bf16 %v4634_v25  ;;  %v5991_v24 = vpop.permute.xlu0 %4618  ;;  %v3940_v25 = vld [vmem:[#allocation2 + $0xa0] sm:$0xf] }
 0x2c3   : > { %v1703_v38 = vsel %vm1692_vm11, %v4635_v33, %v4660_v10  ;;  %v1704_v22 = vsel %vm1692_vm11, %v4636_v34, %v4661_v53  ;;  %v1707_v30 = vsel %vm1692_vm11, %v4605_v21, %v4635_v33  ;;  %v1708_v39 = vsel %vm1692_vm11, %v4606_v2, %v4636_v34  ;;  %v5969_v27 = vpop.permute.xlu2 %4663  ;;  %v4275_v34 = vld [vmem:[#allocation2 + $0xa4] sm:$0xf] }
 0x2c4   : > { %v1719_v61 = vpack.c.bf16 %v1703_v38, %v1707_v30  ;;  %v1722_v32 = vpack.c.bf16 %v1704_v22, %v1708_v39  ;;  %v4666_v60 = vunpack.i.h.bf16 %v5969_v27  ;;  %v4665_v15 = vunpack.i.l.bf16 %v5969_v27 }
 0x2c5   : > { %v4000_v62 = vld [vmem:[#allocation2 + $0x118] sm:$0xf]  ;;  %v4290_v1 = vld [vmem:[#allocation2 + $0x11c] sm:$0xf] }
 0x2c6   : > { %1731 = vst [vmem:[#allocation2 + $0xc8] sm:$0xff] %v1719_v61  ;;  %v4292_v5 = vld [vmem:[#allocation2 + $0x128] sm:$0xf0]  ;;  %v4002_v41 = vld [vmem:[#allocation2 + $0x12c] sm:$0xf0] }
 0x2c7   : > { %1734 = vst [vmem:[#allocation2 + $0xdc] sm:$0xff] %v1722_v32  ;;  %v4001_v6 = vor.u32 %v4292_v5, %v4000_v62  ;;  %v4005_v55 = vor.u32 %v4290_v1, %v4002_v41  ;;  %v4277_v61 = vld [vmem:[#allocation2 + $0xb0] sm:$0xf0]  ;;  %v3942_v32 = vld [vmem:[#allocation2 + $0xb4] sm:$0xf0]  ;;  %v4621_v62 = vunpack.i.h.bf16 %v5991_v24  ;;  %v4620_v1 = vunpack.i.l.bf16 %v5991_v24 }
 0x2c8   : > { %v4644_v14 = vpop.permute.xlu1 %4643  ;;  %v3945_v59 = vor.u32 %v4275_v34, %v3942_v32  ;;  %v4262_v32 = vld [vmem:[#allocation2 + $0x38] sm:$0xf0] }
 0x2c9   : > { %v4646_v16 = vunpack.i.h.bf16 %v4644_v14  ;;  %v4645_v44 = vunpack.i.l.bf16 %v4644_v14  ;;  %2110 = vmatpush.bf16.msrb.mxu3 %v4001_v6  ;;  %2139 = vmatpush.bf16.msra.mxu0 %v4005_v55  ;;  %v3941_v55 = vor.u32 %v4277_v61, %v3940_v25  ;;  %v5105_v61 = vmov 3  }
 0x2ca   : > { %4733 = vset.pattern.permute.xlu1 %v5105_v61  ;;  %4732 = vset.pattern.permute.xlu0 %v5105_v61 }
 0x2cb   : > { %v1618_v19 = vsel %vm1607_vm10, %v4645_v44, %v4665_v15  ;;  %v1619_v35 = vsel %vm1607_vm10, %v4646_v16, %v4666_v60  ;;  %v1622_v37 = vsel %vm1607_vm10, %v4615_v13, %v4645_v44  ;;  %v1623_v45 = vsel %vm1607_vm10, %v4616_v9, %v4646_v16  ;;  %v5993_v33 = vpop.permute.xlu2 %4668  ;;  %4734 = vset.pattern.permute.xlu2 %v5105_v61 }
 0x2cc   : > { %v1634_v52 = vpack.c.bf16 %v1618_v19, %v1622_v37  ;;  %v1637_v23 = vpack.c.bf16 %v1619_v35, %v1623_v45  ;;  %v4671_v40 = vunpack.i.h.bf16 %v5993_v33  ;;  %v4670_v5 = vunpack.i.l.bf16 %v5993_v33 }
 0x2cd   : > { %2111 = vmatpush.bf16.msrb.mxu3 %v3981_v50  ;;  %2140 = vmatpush.bf16.msra.mxu0 %v3985_v0  ;;  %v3960_v49 = vld [vmem:[#allocation2 + $0xc8] sm:$0xf]  ;;  %v4280_v3 = vld [vmem:[#allocation2 + $0xcc] sm:$0xf] }
 0x2ce   : > { %1646 = vst [vmem:[#allocation2 + $0x78] sm:$0xff] %v1634_v52  ;;  %v4282_v38 = vld [vmem:[#allocation2 + $0xd8] sm:$0xf0]  ;;  %v3962_v22 = vld [vmem:[#allocation2 + $0xdc] sm:$0xf0] }
 0x2cf   : > { %1649 = vst [vmem:[#allocation2 + $0x8c] sm:$0xff] %v1637_v23  ;;  %v3961_v30 = vor.u32 %v4282_v38, %v3960_v49  ;;  %v3965_v39 = vor.u32 %v4280_v3, %v3962_v22 }
 0x2d0   : > { %v4649_v36 = vpop.permute.xlu1 %4648 }
 0x2d1   : > { %v4651_v41 = vunpack.i.h.bf16 %v4649_v36  ;;  %v4650_v6 = vunpack.i.l.bf16 %v4649_v36  ;;  %2112 = vmatpush.bf16.msrb.mxu3 %v3961_v30  ;;  %2141 = vmatpush.bf16.msra.mxu0 %v3965_v39  ;;  %v3882_v36 = vld [vmem:[#allocation2 + $0x3c] sm:$0xf0] }
 0x2d3   : > { %v1616_v26 = vsel %vm1607_vm10, %v4650_v6, %v4670_v5  ;;  %v1617_v14 = vsel %vm1607_vm10, %v4651_v41, %v4671_v40  ;;  %v1620_v16 = vsel %vm1607_vm10, %v4620_v1, %v4650_v6  ;;  %v1621_v44 = vsel %vm1607_vm10, %v4621_v62, %v4651_v41  ;;  %v4679_v49 = vpop.permute.xlu2 %4678  ;;  %v6020_v41 = vld [vmem:[%s6894_s4 + $0x18] sm:$0xff]  ;;  %v6026_v6 = vld [vmem:[%s6894_s4 + $0x10] sm:$0xff] }
 0x2d4   : > { %v1628_v50 = vpack.c.bf16 %v1616_v26, %v1620_v16  ;;  %v1631_v0 = vpack.c.bf16 %v1617_v14, %v1621_v44  ;;  %2268 = vperm.xlu1 %4733, %v6020_v41   ;;  %2264 = vperm.xlu0 %4732, %v6026_v6   ;;  %v4260_v26 = vld [vmem:[#allocation2 + $0x2c] sm:$0xf] }
 0x2d5   : > { %2113 = vmatpush.bf16.msrb.mxu3 %v3941_v55  ;;  %2142 = vmatpush.bf16.msra.mxu0 %v3945_v59  ;;  %v3920_v19 = vld [vmem:[#allocation2 + $0x78] sm:$0xf]  ;;  %v4270_v35 = vld [vmem:[#allocation2 + $0x7c] sm:$0xf]  ;;  %v3880_v59 = vld [vmem:[#allocation2 + $0x28] sm:$0xf] }
 0x2d6   : > { %1640 = vst [vmem:[#allocation2 + $0x50] sm:$0xff] %v1628_v50  ;;  %v4272_v37 = vld [vmem:[#allocation2 + $0x88] sm:$0xf0]  ;;  %v3922_v45 = vld [vmem:[#allocation2 + $0x8c] sm:$0xf0]  ;;  %v3881_v44 = vor.u32 %v4262_v32, %v3880_v59  ;;  %v3885_v50 = vor.u32 %v4260_v26, %v3882_v36  ;;  %v6051_v36 = vld [vmem:[#allocation8 + $0x20] sm:$0xff] }
 0x2d7   : > { %1643 = vst [vmem:[#allocation2 + $0x64] sm:$0xff] %v1631_v0  ;;  %v3921_v52 = vor.u32 %v4272_v37, %v3920_v19  ;;  %v3925_v23 = vor.u32 %v4270_v35, %v3922_v45  ;;  %v6036_v0 = vld [vmem:[%s6894_s4] sm:$0xff]  ;;  %v4257_v19 = vld [vmem:[#allocation2 + $0x10] sm:$0xf0]  ;;  %v3862_v35 = vld [vmem:[#allocation2 + $0x14] sm:$0xf0]  ;;  %v4680_v37 = vunpack.i.l.bf16 %v4679_v49 }
 0x2d8   : > { %2256 = vperm.xlu2 %4734, %v6036_v0  }
 0x2d9   : > { %2114 = vmatpush.bf16.msrb.mxu3 %v3921_v52  ;;  %2143 = vmatpush.bf16.msra.mxu0 %v3925_v23 }
 0x2dc   : > { %2260 = vperm.xlu1 %4733, %v6056_v48  }
 0x2dd   : > { %v3900_v3 = vld [vmem:[#allocation2 + $0x50] sm:$0xf]  ;;  %v4265_v25 = vld [vmem:[#allocation2 + $0x54] sm:$0xf] }
 0x2de   : > { %v4267_v34 = vld [vmem:[#allocation2 + $0x60] sm:$0xf0]  ;;  %v3902_v38 = vld [vmem:[#allocation2 + $0x64] sm:$0xf0]  ;;  %v6015_v22 = vpop.permute.xlu0 %4673 }
 0x2df   : > { %v3901_v30 = vor.u32 %v4267_v34, %v3900_v3  ;;  %v3905_v39 = vor.u32 %v4265_v25, %v3902_v38  ;;  %v3860_v25 = vld [vmem:[#allocation2] sm:$0xf]  ;;  %v4255_v34 = vld [vmem:[#allocation2 + $0x4] sm:$0xf]  ;;  %v4681_v38 = vunpack.i.h.bf16 %v4679_v49 }
 0x2e1   : > { %2115 = vmatpush.bf16.msrb.mxu3 %v3901_v30  ;;  %2144 = vmatpush.bf16.msra.mxu0 %v3905_v39  ;;  %v3861_v30 = vor.u32 %v4257_v19, %v3860_v25  ;;  %v3865_v39 = vor.u32 %v4255_v34, %v3862_v35 }
 0x2e2   : > { %v6029_v55 = vpop.permute.xlu2 %4708 }
 0x2e3   : > { %v4711_v14 = vunpack.i.h.bf16 %v6029_v55  ;;  %v4710_v16 = vunpack.i.l.bf16 %v6029_v55 }
 0x2e5   : > { %v1712_v45 = vsel %vm1692_vm11, %v4711_v14, %v4606_v2  ;;  %v1711_v52 = vsel %vm1692_vm11, %v4710_v16, %v4605_v21  ;;  %2116 = vmatpush.bf16.msrb.mxu3 %v3881_v44  ;;  %2145 = vmatpush.bf16.msra.mxu0 %v3885_v50  ;;  %v1781_v21 = vsel %vm1607_vm10, %v4630_v46, %v4680_v37 }
 0x2e6   : > { %v1724_v23 = vpack.c.bf16 %v1712_v45, %v1712_v45  ;;  %v1721_v3 = vpack.c.bf16 %v1711_v52, %v1711_v52  ;;  %v1782_v50 = vsel %vm1607_vm10, %v4631_v4, %v4681_v38  ;;  %v4675_v52 = vunpack.i.l.bf16 %v6015_v22 }
 0x2e7   : > { %v4684_v61 = vpop.permute.xlu0 %4683 }
 0x2e8   : > { %1736 = vst [vmem:[#allocation2 + $0xec] sm:$0xf] %v1724_v23  ;;  %v4686_v32 = vunpack.i.h.bf16 %v4684_v61  ;;  %v4685_v2 = vunpack.i.l.bf16 %v4684_v61  ;;  %v6102_v61 = vld [vmem:[#allocation8 + $0x28] sm:$0xff]  ;;  %v1783_v24 = vsel %vm1607_vm10, %v4655_v20, %v4675_v52 }
 0x2e9   : > { %1733 = vst [vmem:[#allocation2 + $0xd8] sm:$0xf] %v1721_v3  ;;  %2117 = vmatpush.bf16.msrb.mxu3 %v3861_v30  ;;  %2146 = vmatpush.bf16.msra.mxu0 %v3865_v39  ;;  %v5106_v30 = vmov 5  }
 0x2ea   : > { %v1794_v49 = vsel %vm1607_vm10, %v4686_v32, %v4586_v29  ;;  %v1777_v59 = vsel %vm1607_vm10, %v4680_v37, %v4685_v2  ;;  %v1778_v26 = vsel %vm1607_vm10, %v4681_v38, %v4686_v32  ;;  %v1793_v44 = vsel %vm1607_vm10, %v4685_v2, %v4585_v28  ;;  %v4714_v46 = vpop.permute.xlu2 %4713  ;;  %4737 = vset.pattern.permute.xlu1 %v5106_v30 }
 0x2eb   : > { %v1802_v19 = vpack.c.bf16 %v1794_v49, %v1794_v49  ;;  %v1798_v35 = vpack.c.bf16 %v1777_v59, %v1781_v21  ;;  %v1799_v29 = vpack.c.bf16 %v1793_v44, %v1793_v44  ;;  %v1801_v45 = vpack.c.bf16 %v1778_v26, %v1782_v50  ;;  %2502 = vperm.xlu1 %4737, %v6026_v6  }
 0x2ec   : > { %2118 = vmatmul.bf16.vlgmr.msrb.gmra.mxu3 %v6051_v36  ;;  %2147 = vmatmul.bf16.vlgmr.msra.gmra.mxu0 %v6051_v36  ;;  %v4676_v37 = vunpack.i.h.bf16 %v6015_v22  ;;  %v4715_v32 = vunpack.i.l.bf16 %v4714_v46 }
 0x2ed   : > { %1814 = vst [vmem:[#allocation2 + $0x114] sm:$0xf] %v1802_v19 }
 0x2ee   : > { %1810 = vst [vmem:[#allocation2 + $0xf8] sm:$0xff] %v1798_v35 }
 0x2ef   : > { %1811 = vst [vmem:[#allocation2 + $0x100] sm:$0xf] %v1799_v29  ;;  %v6081_v58 = vpop.permute.xlu0 %4698 }
 0x2f0   : > { %1813 = vst [vmem:[#allocation2 + $0x10c] sm:$0xff] %v1801_v45  ;;  %v4700_v31 = vunpack.i.l.bf16 %v6081_v58 }
 0x2f2   : > { %v6083_v28 = vpop.permute.xlu2 %4728 }
 0x2f3   : > { %v4731_v51 = vunpack.i.h.bf16 %v6083_v28  ;;  %v4730_v4 = vunpack.i.l.bf16 %v6083_v28 }
 0x2f5   : > { %v1625_v23 = vsel %vm1607_vm10, %v4731_v51, %v4621_v62  ;;  %v1624_v3 = vsel %vm1607_vm10, %v4730_v4, %v4620_v1  ;;  %v1784_v62 = vsel %vm1607_vm10, %v4656_v63, %v4676_v37  ;;  %v4716_v1 = vunpack.i.h.bf16 %v4714_v46 }
 0x2f6   : > { %v1633_v25 = vpack.c.bf16 %v1625_v23, %v1625_v23  ;;  %v1630_v34 = vpack.c.bf16 %v1624_v3, %v1624_v3  ;;  %v5107_v3 = vmov 4  }
 0x2f7   : > { %v4689_v38 = vpop.permute.xlu1 %4688  ;;  %v1615_v47 = vsel %vm1607_vm10, %v4666_v60, %v4716_v1  ;;  %4739 = vset.pattern.permute.xlu1 %v5107_v3  ;;  %4736 = vset.pattern.permute.xlu0 %v5107_v3 }
 0x2f8   : > { %1645 = vst [vmem:[#allocation2 + $0x74] sm:$0xf] %v1633_v25  ;;  %v4691_v22 = vunpack.i.h.bf16 %v4689_v38  ;;  %v4690_v39 = vunpack.i.l.bf16 %v4689_v38  ;;  %2367 = vperm.xlu1 %4739, %v6036_v0   ;;  %2379 = vperm.xlu0 %4736, %v6020_v41  }
 0x2f9   : > { %1642 = vst [vmem:[#allocation2 + $0x60] sm:$0xf] %v1630_v34  ;;  %4735 = vset.pattern.permute.xlu2 %v5107_v3 }
 0x2fa   : > { %v1779_v2 = vsel %vm1607_vm10, %v4675_v52, %v4690_v39  ;;  %v1780_v21 = vsel %vm1607_vm10, %v4676_v37, %v4691_v22  ;;  %v1795_v49 = vsel %vm1607_vm10, %v4690_v39, %v4595_v18  ;;  %v1796_v17 = vsel %vm1607_vm10, %v4691_v22, %v4596_v54  ;;  %v4719_v63 = vpop.permute.xlu0 %4718  ;;  %2375 = vperm.xlu2 %4735, %v6026_v6  }
 0x2fb   : > { %v1804_v20 = vpack.c.bf16 %v1779_v2, %v1783_v24  ;;  %v1805_v59 = vpack.c.bf16 %v1795_v49, %v1795_v49  ;;  %v1807_v26 = vpack.c.bf16 %v1780_v21, %v1784_v62  ;;  %v1808_v44 = vpack.c.bf16 %v1796_v17, %v1796_v17 }
 0x2fc   : > { %v4721_v46 = vunpack.i.h.bf16 %v4719_v63  ;;  %v4720_v50 = vunpack.i.l.bf16 %v4719_v63  ;;  %2123 = vmatmul.bf16.gmra.mxu3 %v6102_v61  ;;  %2152 = vmatmul.bf16.gmra.mxu0 %v6102_v61  ;;  %v1614_v18 = vsel %vm1607_vm10, %v4665_v15, %v4715_v32  ;;  %v6171_v63 = vld [vmem:[#allocation8 + $0x30] sm:$0xff] }
 0x2fd   : > { %1816 = vst [vmem:[#allocation2 + $0x120] sm:$0xff] %v1804_v20  ;;  %v4286_v20 = vld [vmem:[#allocation2 + $0xfc] sm:$0xf] }
 0x2fe   : > { %1817 = vst [vmem:[#allocation2 + $0x128] sm:$0xf] %v1805_v59  ;;  %v1610_v54 = vsel %vm1607_vm10, %v4715_v32, %v4720_v50  ;;  %v1611_v19 = vsel %vm1607_vm10, %v4716_v1, %v4721_v46  ;;  %v1626_v35 = vsel %vm1607_vm10, %v4720_v50, %v4615_v13  ;;  %v1627_v27 = vsel %vm1607_vm10, %v4721_v46, %v4616_v9  ;;  %v3990_v59 = vld [vmem:[#allocation2 + $0x10c] sm:$0xf0]  ;;  %v4289_v46 = vld [vmem:[#allocation2 + $0x110] sm:$0xf0] }
 0x2ff   : > { %1819 = vst [vmem:[#allocation2 + $0x134] sm:$0xff] %v1807_v26  ;;  %v1635_v60 = vpack.c.bf16 %v1610_v54, %v1614_v18  ;;  %v1636_v15 = vpack.c.bf16 %v1626_v35, %v1626_v35  ;;  %v1638_v29 = vpack.c.bf16 %v1611_v19, %v1615_v47  ;;  %v4694_v45 = vpop.permute.xlu1 %4693  ;;  %v1639_v37 = vpack.c.bf16 %v1627_v27, %v1627_v27  ;;  %v4284_v35 = vld [vmem:[#allocation2 + $0xe8] sm:$0xf0] }
 0x300   : > { %1820 = vst [vmem:[#allocation2 + $0x13c] sm:$0xf] %v1808_v44  ;;  %v4696_v52 = vunpack.i.h.bf16 %v4694_v45  ;;  %v4695_v23 = vunpack.i.l.bf16 %v4694_v45  ;;  %v3996_v44 = vld [vmem:[#allocation2 + $0x100] sm:$0xf]  ;;  %v3993_v19 = vor.u32 %v4286_v20, %v3990_v59  ;;  %4742 = vset.pattern.permute.xlu1 %v5106_v30  ;;  %4741 = vset.pattern.permute.xlu0 %v5106_v30 }
 0x301   : > { %1647 = vst [vmem:[#allocation2 + $0x80] sm:$0xff] %v1635_v60  ;;  %v3997_v60 = vor.u32 %v4289_v46, %v3996_v44  ;;  %2498 = vperm.xlu1 %4742, %v6056_v48   ;;  %2494 = vperm.xlu0 %4741, %v6036_v0   ;;  %v3890_v44 = vld [vmem:[#allocation2 + $0x44] sm:$0xf0]  ;;  %v3888_v46 = vld [vmem:[#allocation2 + $0x30] sm:$0xf] }
 0x302   : > { %1648 = vst [vmem:[#allocation2 + $0x88] sm:$0xf] %v1636_v15  ;;  %v1695_v57 = vsel %vm1692_vm11, %v4695_v23, %v4710_v16  ;;  %v1696_v9 = vsel %vm1692_vm11, %v4696_v52, %v4711_v14  ;;  %v1699_v13 = vsel %vm1692_vm11, %v4660_v10, %v4695_v23  ;;  %v1700_v25 = vsel %vm1692_vm11, %v4661_v53, %v4696_v52  ;;  %v3988_v16 = vld [vmem:[#allocation2 + $0xf8] sm:$0xf]  ;;  %v4288_v53 = vld [vmem:[#allocation2 + $0x108] sm:$0xf0] }
 0x303   : > { %1650 = vst [vmem:[#allocation2 + $0x94] sm:$0xff] %v1638_v29  ;;  %v1720_v34 = vpack.c.bf16 %v1695_v57, %v1699_v13  ;;  %v1723_v38 = vpack.c.bf16 %v1696_v9, %v1700_v25  ;;  %v4701_v10 = vunpack.i.h.bf16 %v6081_v58  ;;  %v1697_v58 = vsel %vm1692_vm11, %v4640_v12, %v4700_v31  ;;  %4738 = vset.pattern.permute.xlu2 %v5106_v30 }
 0x304   : > { %1651 = vst [vmem:[#allocation2 + $0x9c] sm:$0xf] %v1639_v37  ;;  %v4008_v55 = vld [vmem:[#allocation2 + $0x120] sm:$0xf]  ;;  %v4291_v14 = vld [vmem:[#allocation2 + $0x124] sm:$0xf]  ;;  %v3989_v26 = vor.u32 %v4288_v53, %v3988_v16  ;;  %2506 = vperm.xlu2 %4738, %v6020_v41  }
 0x305   : > { %1732 = vst [vmem:[#allocation2 + $0xd0] sm:$0xff] %v1720_v34  ;;  %v4016_v22 = vld [vmem:[#allocation2 + $0x128] sm:$0xf]  ;;  %v1698_v6 = vsel %vm1692_vm11, %v4641_v11, %v4701_v10 }
 0x306   : > { %1735 = vst [vmem:[#allocation2 + $0xe4] sm:$0xff] %v1723_v38  ;;  %v4293_v39 = vld [vmem:[#allocation2 + $0x130] sm:$0xf0]  ;;  %v4010_v24 = vld [vmem:[#allocation2 + $0x134] sm:$0xf0] }
 0x307   : > { %v4704_v62 = vpop.permute.xlu1 %4703  ;;  %v4009_v1 = vor.u32 %v4293_v39, %v4008_v55  ;;  %v4013_v32 = vor.u32 %v4291_v14, %v4010_v24  ;;  %v4294_v2 = vld [vmem:[#allocation2 + $0x138] sm:$0xf0] }
 0x308   : > { %v4706_v21 = vunpack.i.h.bf16 %v4704_v62  ;;  %v4705_v49 = vunpack.i.l.bf16 %v4704_v62  ;;  %v4017_v17 = vor.u32 %v4294_v2, %v4016_v22  ;;  %v4271_v53 = vld [vmem:[#allocation2 + $0x84] sm:$0xf] }
 0x309   : > { %2168 = vmatpush.bf16.msrb.mxu1 %v4009_v1  ;;  %2197 = vmatpush.bf16.msra.mxu2 %v4013_v32  ;;  %v3936_v39 = vld [vmem:[#allocation2 + $0x88] sm:$0xf] }
 0x30a   : > { %v1693_v50 = vsel %vm1692_vm11, %v4700_v31, %v4705_v49  ;;  %v1694_v18 = vsel %vm1692_vm11, %v4701_v10, %v4706_v21  ;;  %v1709_v12 = vsel %vm1692_vm11, %v4705_v49, %v4590_v56  ;;  %v1710_v7 = vsel %vm1692_vm11, %v4706_v21, %v4591_v8  ;;  %2226 = vmatpush.bf16.msra.mxu3 %v4017_v17  ;;  %v3976_v56 = vld [vmem:[#allocation2 + $0xd8] sm:$0xf]  ;;  %v4273_v22 = vld [vmem:[#allocation2 + $0x90] sm:$0xf0] }
 0x30b   : > { %v1714_v11 = vpack.c.bf16 %v1693_v50, %v1697_v58  ;;  %v1715_v47 = vpack.c.bf16 %v1709_v12, %v1709_v12  ;;  %v1717_v54 = vpack.c.bf16 %v1694_v18, %v1698_v6  ;;  %v1718_v27 = vpack.c.bf16 %v1710_v7, %v1710_v7  ;;  %v6217_v31 = vld [vmem:[#allocation8 + $0x38] sm:$0xff]  ;;  %v4269_v49 = vld [vmem:[#allocation2 + $0x70] sm:$0xf0] }
 0x30c   : > { %2128 = vmatmul.bf16.gmra.mxu3 %v6171_v63  ;;  %v3968_v15 = vld [vmem:[#allocation2 + $0xd0] sm:$0xf]  ;;  %v4281_v29 = vld [vmem:[#allocation2 + $0xd4] sm:$0xf]  ;;  %v3977_v9 = vor.u32 %v4284_v35, %v3976_v56  ;;  %2157 = vmatmul.bf16.gmra.mxu0 %v6171_v63  ;;  %v4274_v24 = vld [vmem:[#allocation2 + $0x98] sm:$0xf0] }
 0x30d   : > { %1726 = vst [vmem:[#allocation2 + $0xa8] sm:$0xff] %v1714_v11  ;;  %2169 = vmatpush.bf16.msrb.mxu1 %v3989_v26  ;;  %2198 = vmatpush.bf16.msra.mxu2 %v3993_v19  ;;  %v4283_v42 = vld [vmem:[#allocation2 + $0xe0] sm:$0xf0]  ;;  %v3970_v8 = vld [vmem:[#allocation2 + $0xe4] sm:$0xf0]  ;;  %v3937_v32 = vor.u32 %v4274_v24, %v3936_v39 }
 0x30e   : > { %1727 = vst [vmem:[#allocation2 + $0xb0] sm:$0xf] %v1715_v47  ;;  %2227 = vmatpush.bf16.msra.mxu3 %v3997_v60  ;;  %v3969_v45 = vor.u32 %v4283_v42, %v3968_v15  ;;  %v3973_v37 = vor.u32 %v4281_v29, %v3970_v8  ;;  %4740 = vset.pattern.permute.xlu2 %v5107_v3  ;;  %v3916_v3 = vld [vmem:[#allocation2 + $0x60] sm:$0xf]  ;;  %v4263_v26 = vld [vmem:[#allocation2 + $0x40] sm:$0xf0] }
 0x30f   : > { %1729 = vst [vmem:[#allocation2 + $0xbc] sm:$0xff] %v1717_v54  ;;  %v4724_v52 = vpop.permute.xlu1 %4723  ;;  %2371 = vperm.xlu2 %4740, %v6056_v48   ;;  %v3917_v6 = vor.u32 %v4269_v49, %v3916_v3  ;;  %v4264_v48 = vld [vmem:[#allocation2 + $0x48] sm:$0xf0]  ;;  %v4261_v50 = vld [vmem:[#allocation2 + $0x34] sm:$0xf]  ;;  %v3889_v18 = vor.u32 %v4263_v26, %v3888_v46 }
 0x310   : > { %1730 = vst [vmem:[#allocation2 + $0xc4] sm:$0xf] %v1718_v27  ;;  %v4726_v23 = vunpack.i.h.bf16 %v4724_v52  ;;  %v4725_v57 = vunpack.i.l.bf16 %v4724_v52  ;;  %v3893_v12 = vor.u32 %v4261_v50, %v3890_v44  ;;  %v3896_v7 = vld [vmem:[#allocation2 + $0x38] sm:$0xf]  ;;  %v4258_v47 = vld [vmem:[#allocation2 + $0x18] sm:$0xf0] }
 0x311   : > { %2170 = vmatpush.bf16.msrb.mxu1 %v3969_v45  ;;  %2199 = vmatpush.bf16.msra.mxu2 %v3973_v37  ;;  %v3897_v11 = vor.u32 %v4264_v48, %v3896_v7  ;;  %v3870_v54 = vld [vmem:[#allocation2 + $0x1c] sm:$0xf0]  ;;  %v4259_v19 = vld [vmem:[#allocation2 + $0x20] sm:$0xf0]  ;;  %v3868_v35 = vld [vmem:[#allocation2 + $0x8] sm:$0xf] }
 0x312   : > { %v1608_v13 = vsel %vm1607_vm10, %v4725_v57, %v4730_v4  ;;  %v1609_v0 = vsel %vm1607_vm10, %v4726_v23, %v4731_v51  ;;  %v1612_v30 = vsel %vm1607_vm10, %v4670_v5, %v4725_v57  ;;  %v1613_v41 = vsel %vm1607_vm10, %v4671_v40, %v4726_v23  ;;  %2228 = vmatpush.bf16.msra.mxu3 %v3977_v9  ;;  %v3928_v5 = vld [vmem:[#allocation2 + $0x80] sm:$0xf]  ;;  %v3930_v40 = vld [vmem:[#allocation2 + $0x94] sm:$0xf0]  ;;  %v4256_v27 = vld [vmem:[#allocation2 + $0xc] sm:$0xf] }
 0x313   : > { %v1629_v25 = vpack.c.bf16 %v1608_v13, %v1612_v30  ;;  %v1632_v34 = vpack.c.bf16 %v1609_v0, %v1613_v41  ;;  %v3929_v62 = vor.u32 %v4273_v22, %v3928_v5  ;;  %v3933_v1 = vor.u32 %v4271_v53, %v3930_v40  ;;  %v3876_v29 = vld [vmem:[#allocation2 + $0x10] sm:$0xf] }
 0x314   : > { %v3948_v38 = vld [vmem:[#allocation2 + $0xa8] sm:$0xf]  ;;  %v4276_v4 = vld [vmem:[#allocation2 + $0xac] sm:$0xf]  ;;  %v3869_v60 = vor.u32 %v4258_v47, %v3868_v35  ;;  %v3873_v15 = vor.u32 %v4256_v27, %v3870_v54  ;;  %v3877_v56 = vor.u32 %v4259_v19, %v3876_v29 }
 0x315   : > { %1641 = vst [vmem:[#allocation2 + $0x58] sm:$0xff] %v1629_v25  ;;  %v3956_v28 = vld [vmem:[#allocation2 + $0xb0] sm:$0xf] }
 0x316   : > { %1644 = vst [vmem:[#allocation2 + $0x6c] sm:$0xff] %v1632_v34  ;;  %v4278_v55 = vld [vmem:[#allocation2 + $0xb8] sm:$0xf0]  ;;  %v3950_v51 = vld [vmem:[#allocation2 + $0xbc] sm:$0xf0] }
 0x317   : > { %v3949_v14 = vor.u32 %v4278_v55, %v3948_v38  ;;  %v3953_v16 = vor.u32 %v4276_v4, %v3950_v51  ;;  %v4279_v10 = vld [vmem:[#allocation2 + $0xc0] sm:$0xf0] }
 0x318   : > { %v3957_v33 = vor.u32 %v4279_v10, %v3956_v28 }
 0x319   : > { %2171 = vmatpush.bf16.msrb.mxu1 %v3949_v14  ;;  %2200 = vmatpush.bf16.msra.mxu2 %v3953_v16 }
 0x31a   : > { %2229 = vmatpush.bf16.msra.mxu3 %v3957_v33 }
 0x31c   : > { %2133 = vmatmul.bf16.gmra.mxu3 %v6217_v31  ;;  %v3908_v2 = vld [vmem:[#allocation2 + $0x58] sm:$0xf]  ;;  %v4266_v21 = vld [vmem:[#allocation2 + $0x5c] sm:$0xf]  ;;  %2162 = vmatmul.bf16.gmra.mxu0 %v6217_v31 }
 0x31d   : > { %2172 = vmatpush.bf16.msrb.mxu1 %v3929_v62  ;;  %2201 = vmatpush.bf16.msra.mxu2 %v3933_v1  ;;  %v4268_v17 = vld [vmem:[#allocation2 + $0x68] sm:$0xf0]  ;;  %v3910_v20 = vld [vmem:[#allocation2 + $0x6c] sm:$0xf0] }
 0x31e   : > { %2230 = vmatpush.bf16.msra.mxu3 %v3937_v32  ;;  %v3909_v59 = vor.u32 %v4268_v17, %v3908_v2  ;;  %v3913_v58 = vor.u32 %v4266_v21, %v3910_v20  ;;  %v6254_v2 = vld [vmem:[%s6893_s3 + $0x10] sm:$0xff] }
 0x321   : > { %2173 = vmatpush.bf16.msrb.mxu1 %v3909_v59  ;;  %2202 = vmatpush.bf16.msra.mxu2 %v3913_v58  ;;  %v6267_v58 = vld [vmem:[%s6893_s3 + $0x18] sm:$0xff] }
 0x322   : > { %2231 = vmatpush.bf16.msra.mxu3 %v3917_v6 }
 0x325   : > { %2174 = vmatpush.bf16.msrb.mxu1 %v3889_v18  ;;  %2203 = vmatpush.bf16.msra.mxu2 %v3893_v12 }
 0x326   : > { %2232 = vmatpush.bf16.msra.mxu3 %v3897_v11 }
 0x329   : > { %2175 = vmatpush.bf16.msrb.mxu1 %v3869_v60  ;;  %2204 = vmatpush.bf16.msra.mxu2 %v3873_v15 }
 0x32a   : > { %2233 = vmatpush.bf16.msra.mxu3 %v3877_v56 }
 0x32c   : > { %2176 = vmatmul.bf16.vlgmr.msrb.gmra.mxu1 %v6051_v36  ;;  %2205 = vmatmul.bf16.vlgmr.msra.gmra.mxu2 %v6051_v36 }
 0x32d   : > { %2234 = vmatmul.bf16.vlgmr.msra.gmra.mxu3 %v6051_v36 }
 0x332   : > { %v6239_v23 = vpop.permute.xlu2 %2256 }
 0x33c   : > { %2181 = vmatmul.bf16.gmra.mxu1 %v6102_v61  ;;  %2210 = vmatmul.bf16.gmra.mxu2 %v6102_v61 }
 0x33d   : > { %2239 = vmatmul.bf16.gmra.mxu3 %v6102_v61 }
 0x346   : > { %v6235_v45 = vpop.permute.xlu1 %2268  ;;  %v6237_v61 = vpop.permute.xlu0 %2264 }
 0x34c   : > { %2186 = vmatmul.bf16.gmra.mxu1 %v6171_v63  ;;  %2215 = vmatmul.bf16.gmra.mxu2 %v6171_v63 }
 0x34d   : > { %2244 = vmatmul.bf16.gmra.mxu3 %v6171_v63 }
 0x34e   : > { %v6242_v63 = vpop.permute.xlu1 %2260 }
 0x35c   : > { %2191 = vmatmul.bf16.gmra.mxu1 %v6217_v31  ;;  %2220 = vmatmul.bf16.gmra.mxu2 %v6217_v31 }
 0x35d   : > { %2249 = vmatmul.bf16.gmra.mxu3 %v6217_v31 }
 0x369   : > { %v2148_v42 = vpop.f32.mrf.mxu0 }
 0x36a   : > { %v2272_v9 = vadd.f32 %v6239_v23, %v2148_v42 }
 0x36c   : > { %v2312_v25 = vmul.f32 0.2, %v2272_v9  ;;  %vm2292_vm13 = vcmp.gt.f32.partialorder %v2272_v9, 0.0 }
 0x36e   : > { %v2332_v14 = vsel %vm2292_vm13, %v2272_v9, %v2312_v25 }
 0x36f   : > { %v2119_v36 = vpop.f32.mrf.mxu3 }
 0x370   : > { %v2271_v51 = vadd.f32 %v6239_v23, %v2119_v36 }
 0x371   : > { %v2150_v8 = vpop.f32.mrf.mxu0 }
 0x372   : > { %v2277_v13 = vadd.f32 %v6242_v63, %v2150_v8  ;;  %v2311_v39 = vmul.f32 0.2, %v2271_v51  ;;  %vm2291_vm2 = vcmp.gt.f32.partialorder %v2271_v51, 0.0 }
 0x374   : > { %v2317_v4 = vmul.f32 0.2, %v2277_v13  ;;  %vm2297_vm14 = vcmp.gt.f32.partialorder %v2277_v13, 0.0  ;;  %v2331_v49 = vsel %vm2291_vm2, %v2271_v51, %v2311_v39 }
 0x376   : > { %v2337_v5 = vsel %vm2297_vm14, %v2277_v13, %v2317_v4 }
 0x377   : > { %v2121_v37 = vpop.f32.mrf.mxu3  ;;  %v2352_v40 = vpack.c.bf16 %v2337_v5, %v2332_v14 }
 0x378   : > { %v2276_v16 = vadd.f32 %v6242_v63, %v2121_v37 }
 0x379   : > { %v2153_v52 = vpop.f32.mrf.mxu0 }
 0x37a   : > { %v2282_v57 = vadd.f32 %v6237_v61, %v2153_v52  ;;  %v2316_v1 = vmul.f32 0.2, %v2276_v16  ;;  %vm2296_vm3 = vcmp.gt.f32.partialorder %v2276_v16, 0.0 }
 0x37c   : > { %v2322_v30 = vmul.f32 0.2, %v2282_v57  ;;  %vm2302_vm12 = vcmp.gt.f32.partialorder %v2282_v57, 0.0  ;;  %v2336_v17 = vsel %vm2296_vm3, %v2276_v16, %v2316_v1 }
 0x37d   : > { %v2351_v3 = vpack.c.bf16 %v2336_v17, %v2331_v49 }
 0x37e   : > { %v2342_v55 = vsel %vm2302_vm12, %v2282_v57, %v2322_v30 }
 0x37f   : > { %v2124_v0 = vpop.f32.mrf.mxu3 }
 0x380   : > { %v2281_v34 = vadd.f32 %v6237_v61, %v2124_v0 }
 0x381   : > { %v2155_v41 = vpop.f32.mrf.mxu0 }
 0x382   : > { %v2287_v38 = vadd.f32 %v6235_v45, %v2155_v41  ;;  %v2321_v31 = vmul.f32 0.2, %v2281_v34  ;;  %vm2301_vm0 = vcmp.gt.f32.partialorder %v2281_v34, 0.0 }
 0x384   : > { %vm2307_vm15 = vcmp.gt.f32.partialorder %v2287_v38, 0.0  ;;  %v2327_v28 = vmul.f32 0.2, %v2287_v38  ;;  %v2341_v62 = vsel %vm2301_vm0, %v2281_v34, %v2321_v31 }
 0x386   : > { %v2347_v10 = vsel %vm2307_vm15, %v2287_v38, %v2327_v28 }
 0x387   : > { %v2357_v33 = vpack.c.bf16 %v2347_v10, %v2342_v55  ;;  %v2126_v22 = vpop.f32.mrf.mxu3 }
 0x388   : > { %v2286_v53 = vadd.f32 %v6235_v45, %v2126_v22 }
 0x389   : > { %2423 = vmatpush.bf16.msra.mxu1 %v2357_v33  ;;  %v2158_v17 = vpop.f32.mrf.mxu0 }
 0x38a   : > { %vm2306_vm1 = vcmp.gt.f32.partialorder %v2286_v53, 0.0  ;;  %v2326_v24 = vmul.f32 0.2, %v2286_v53 }
 0x38c   : > { %v2346_v32 = vsel %vm2306_vm1, %v2286_v53, %v2326_v24 }
 0x38d   : > { %v2356_v21 = vpack.c.bf16 %v2346_v32, %v2341_v62  ;;  %2424 = vmatpush.bf16.msra.mxu1 %v2352_v40 }
 0x38f   : > { %v6256_v20 = vpop.f32.mrf.mxu3  ;;  %2404 = vmatpush.bf16.msrb.mxu0 %v2356_v21 }
 0x390   : > { %4032 = vmatmul.msk.bf16.vlgmr.msra.gmra.mxu1 %vm1325_vm7, %v6254_v2 }
 0x393   : > { %2405 = vmatpush.bf16.msrb.mxu0 %v2351_v3 }
 0x396   : > { %4030 = vmatmul.msk.bf16.vlgmr.msrb.gmra.mxu0 %vm1325_vm7, %v6254_v2 }
 0x397   : > { %v6262_v59 = vpop.f32.mrf.mxu3 }
 0x39f   : > { %v6269_v6 = vpop.f32.mrf.mxu3 }
 0x3a0   : > { %4033 = vmatmul.msk.bf16.gmra.mxu1 %vm1325_vm7, %v6267_v58 }
 0x3a6   : > { %4031 = vmatmul.msk.bf16.gmra.mxu0 %vm1325_vm7, %v6267_v58 }
 0x3a7   : > { %v6275_v26 = vpop.f32.mrf.mxu3 }
 0x3a9   : > { %v2177_v44 = vpop.f32.mrf.mxu1 }
 0x3aa   : > { %v2273_v54 = vadd.f32 %v6239_v23, %v2177_v44  ;;  %v2160_v44 = vpop.f32.mrf.mxu0 }
 0x3ac   : > { %vm2293_vm4 = vcmp.gt.f32.partialorder %v2273_v54, 0.0  ;;  %v2313_v56 = vmul.f32 0.2, %v2273_v54 }
 0x3ae   : > { %v2333_v25 = vsel %vm2293_vm4, %v2273_v54, %v2313_v56 }
 0x3af   : > { %v2206_v48 = vpop.f32.mrf.mxu2 }
 0x3b0   : > { %v2235_v46 = vpop.f32.mrf.mxu3  ;;  %v2274_v42 = vadd.f32 %v6239_v23, %v2206_v48 }
 0x3b1   : > { %v2179_v50 = vpop.f32.mrf.mxu1  ;;  %v2275_v34 = vadd.f32 %v6239_v23, %v2235_v46  ;;  %v6309_v46 = vpop.permute.xlu1 %2502 }
 0x3b2   : > { %v2278_v11 = vadd.f32 %v6242_v63, %v2179_v50  ;;  %vm2294_vm9 = vcmp.gt.f32.partialorder %v2274_v42, 0.0  ;;  %v2314_v31 = vmul.f32 0.2, %v2274_v42  ;;  %v6311_v50 = vpop.permute.xlu0 %2379 }
 0x3b3   : > { %v2315_v33 = vmul.f32 0.2, %v2275_v34  ;;  %vm2295_vm0 = vcmp.gt.f32.partialorder %v2275_v34, 0.0 }
 0x3b4   : > { %v2318_v60 = vmul.f32 0.2, %v2278_v11  ;;  %vm2298_vm5 = vcmp.gt.f32.partialorder %v2278_v11, 0.0  ;;  %v2334_v62 = vsel %vm2294_vm9, %v2274_v42, %v2314_v31 }
 0x3b5   : > { %v2335_v32 = vsel %vm2295_vm0, %v2275_v34, %v2315_v33 }
 0x3b6   : > { %v2338_v13 = vsel %vm2298_vm5, %v2278_v11, %v2318_v60 }
 0x3b7   : > { %v2208_v18 = vpop.f32.mrf.mxu2  ;;  %v2353_v51 = vpack.c.bf16 %v2338_v13, %v2333_v25 }
 0x3b8   : > { %v2237_v12 = vpop.f32.mrf.mxu3  ;;  %v2279_v52 = vadd.f32 %v6242_v63, %v2208_v18  ;;  %v6313_v18 = vpop.permute.xlu2 %2375 }
 0x3b9   : > { %v2182_v7 = vpop.f32.mrf.mxu1  ;;  %v2280_v0 = vadd.f32 %v6242_v63, %v2237_v12 }
 0x3ba   : > { %v2283_v47 = vadd.f32 %v6237_v61, %v2182_v7  ;;  %v2319_v14 = vmul.f32 0.2, %v2279_v52  ;;  %vm2299_vm13 = vcmp.gt.f32.partialorder %v2279_v52, 0.0  ;;  %v6317_v7 = vpop.permute.xlu1 %2367 }
 0x3bb   : > { %v2320_v16 = vmul.f32 0.2, %v2280_v0  ;;  %vm2300_vm15 = vcmp.gt.f32.partialorder %v2280_v0, 0.0 }
 0x3bc   : > { %v2323_v15 = vmul.f32 0.2, %v2283_v47  ;;  %vm2303_vm6 = vcmp.gt.f32.partialorder %v2283_v47, 0.0  ;;  %v2339_v39 = vsel %vm2299_vm13, %v2279_v52, %v2319_v14 }
 0x3bd   : > { %v2340_v24 = vsel %vm2300_vm15, %v2280_v0, %v2320_v16  ;;  %v2354_v1 = vpack.c.bf16 %v2339_v39, %v2334_v62 }
 0x3be   : > { %v2343_v57 = vsel %vm2303_vm6, %v2283_v47, %v2323_v15  ;;  %v2355_v21 = vpack.c.bf16 %v2340_v24, %v2335_v32  ;;  %v6319_v47 = vpop.permute.xlu0 %2494 }
 0x3bf   : > { %v2211_v19 = vpop.f32.mrf.mxu2  ;;  %v2510_v54 = vadd.f32 %v6319_v47, %v2158_v17 }
 0x3c0   : > { %v2240_v35 = vpop.f32.mrf.mxu3  ;;  %v2284_v36 = vadd.f32 %v6237_v61, %v2211_v19 }
 0x3c1   : > { %v2184_v27 = vpop.f32.mrf.mxu1  ;;  %v2285_v37 = vadd.f32 %v6237_v61, %v2240_v35 }
 0x3c2   : > { %v2288_v29 = vadd.f32 %v6235_v45, %v2184_v27  ;;  %v2324_v38 = vmul.f32 0.2, %v2284_v36  ;;  %vm2304_vm10 = vcmp.gt.f32.partialorder %v2284_v36, 0.0  ;;  %v6325_v60 = vpop.permute.xlu1 %2498 }
 0x3c3   : > { %v2325_v61 = vmul.f32 0.2, %v2285_v37  ;;  %vm2305_vm11 = vcmp.gt.f32.partialorder %v2285_v37, 0.0  ;;  %v2515_v56 = vadd.f32 %v6325_v60, %v2160_v44 }
 0x3c4   : > { %vm2308_vm8 = vcmp.gt.f32.partialorder %v2288_v29, 0.0  ;;  %v2328_v8 = vmul.f32 0.2, %v2288_v29  ;;  %v2344_v23 = vsel %vm2304_vm10, %v2284_v36, %v2324_v38 }
 0x3c5   : > { %v2345_v22 = vsel %vm2305_vm11, %v2285_v37, %v2325_v61 }
 0x3c6   : > { %v2348_v9 = vsel %vm2308_vm8, %v2288_v29, %v2328_v8  ;;  %v2509_v8 = vadd.f32 %v6319_v47, %v6256_v20  ;;  %v2514_v20 = vadd.f32 %v6325_v60, %v6262_v59 }
 0x3c7   : > { %v2358_v30 = vpack.c.bf16 %v2348_v9, %v2343_v57  ;;  %v2213_v41 = vpop.f32.mrf.mxu2 }
 0x3c8   : > { %v2289_v4 = vadd.f32 %v6235_v45, %v2213_v41  ;;  %v2242_v28 = vpop.f32.mrf.mxu3 }
 0x3c9   : > { %v2290_v55 = vadd.f32 %v6235_v45, %v2242_v28  ;;  %2442 = vmatpush.bf16.msrb.mxu2 %v2358_v30  ;;  %v6299_v49 = vpop.f32.mrf.mxu1 }
 0x3ca   : > { %vm2309_vm12 = vcmp.gt.f32.partialorder %v2289_v4, 0.0  ;;  %v2329_v63 = vmul.f32 0.2, %v2289_v4 }
 0x3cb   : > { %vm2310_vm14 = vcmp.gt.f32.partialorder %v2290_v55, 0.0  ;;  %v2330_v10 = vmul.f32 0.2, %v2290_v55 }
 0x3cc   : > { %v2349_v5 = vsel %vm2309_vm12, %v2289_v4, %v2329_v63 }
 0x3cd   : > { %v2359_v53 = vpack.c.bf16 %v2349_v5, %v2344_v23  ;;  %v2350_v40 = vsel %vm2310_vm14, %v2290_v55, %v2330_v10  ;;  %2443 = vmatpush.bf16.msrb.mxu2 %v2353_v51 }
 0x3ce   : > { %v2360_v45 = vpack.c.bf16 %v2350_v40, %v2345_v22  ;;  %v2519_v22 = vadd.f32 %v6309_v46, %v6269_v6 }
 0x3cf   : > { %2461 = vmatpush.bf16.msra.mxu0 %v2359_v53 }
 0x3d0   : > { %2480 = vmatpush.bf16.msrb.mxu1 %v2360_v45  ;;  %4034 = vmatmul.msk.bf16.vlgmr.msrb.gmra.mxu2 %vm1325_vm7, %v6254_v2 }
 0x3d1   : > { %v6305_v3 = vpop.f32.mrf.mxu1 }
 0x3d3   : > { %2462 = vmatpush.bf16.msra.mxu0 %v2354_v1 }
 0x3d4   : > { %2481 = vmatpush.bf16.msrb.mxu1 %v2355_v21 }
 0x3d6   : > { %4036 = vmatmul.msk.bf16.vlgmr.msra.gmra.mxu0 %vm1325_vm7, %v6254_v2 }
 0x3d7   : > { %4038 = vmatmul.msk.bf16.vlgmr.msrb.gmra.mxu1 %vm1325_vm7, %v6254_v2  ;;  %v2163_v2 = vpop.f32.mrf.mxu0 }
 0x3d8   : > { %v2520_v4 = vadd.f32 %v6309_v46, %v2163_v2 }
 0x3d9   : > { %v6307_v48 = vpop.f32.mrf.mxu1 }
 0x3df   : > { %v2165_v11 = vpop.f32.mrf.mxu0 }
 0x3e0   : > { %4035 = vmatmul.msk.bf16.gmra.mxu2 %vm1325_vm7, %v6267_v58 }
 0x3e1   : > { %v6315_v12 = vpop.f32.mrf.mxu1 }
 0x3e6   : > { %4037 = vmatmul.msk.bf16.gmra.mxu0 %vm1325_vm7, %v6267_v58 }
 0x3e7   : > { %4039 = vmatmul.msk.bf16.gmra.mxu1 %vm1325_vm7, %v6267_v58  ;;  %v6321_v58 = vpop.permute.xlu2 %2506 }
 0x3e8   : > { %v2525_v53 = vadd.f32 %v6321_v58, %v2165_v11 }
 0x3ef   : > { %v6327_v29 = vpop.permute.xlu2 %2371 }
 0x40d   : > { %v2426_v19 = vpop.f32.mrf.mxu1 }
 0x40e   : > { %v2427_v35 = vadd.f32 %v2426_v19, %v6317_v7 }
 0x410   : > { %v2530_v27 = vadd.f32 %v2510_v54, %v2427_v35  ;;  %v2524_v54 = vadd.f32 %v6321_v58, %v6275_v26  ;;  %v2216_v35 = vpop.f32.mrf.mxu2 }
 0x412   : > { %v2570_v42 = vmul.f32 0.2, %v2530_v27  ;;  %vm2550_vm1 = vcmp.gt.f32.partialorder %v2530_v27, 0.0 }
 0x413   : > { %v2407_v15 = vpop.f32.mrf.mxu0 }
 0x414   : > { %v2408_v36 = vadd.f32 %v2407_v15, %v6317_v7  ;;  %v2590_v0 = vsel %vm2550_vm1, %v2530_v27, %v2570_v42 }
 0x415   : > { %v2428_v37 = vpop.f32.mrf.mxu1 }
 0x416   : > { %v2529_v52 = vadd.f32 %v2509_v8, %v2408_v36  ;;  %v2429_v57 = vadd.f32 %v2428_v37, %v6327_v29 }
 0x418   : > { %v2569_v9 = vmul.f32 0.2, %v2529_v52  ;;  %v2535_v13 = vadd.f32 %v2515_v56, %v2429_v57  ;;  %vm2549_vm2 = vcmp.gt.f32.partialorder %v2529_v52, 0.0  ;;  %v2218_v26 = vpop.f32.mrf.mxu2 }
 0x41a   : > { %v2575_v30 = vmul.f32 0.2, %v2535_v13  ;;  %v4743_v41 = vpack.i.bf16 %v2535_v13, %v2530_v27  ;;  %vm2555_vm3 = vcmp.gt.f32.partialorder %v2535_v13, 0.0  ;;  %v2589_v25 = vsel %vm2549_vm2, %v2529_v52, %v2569_v9 }
 0x41b   : > { %v2409_v34 = vpop.f32.mrf.mxu0  ;;  %v2609_v38 = vpack.c.bf16 %v2590_v0, %v2589_v25 }
 0x41c   : > { %v2410_v28 = vadd.f32 %v2409_v34, %v6327_v29  ;;  %4744 = vrot.lane.b32.xlu1 %v4743_v41, %s5108_s17  ;;  %v2595_v61 = vsel %vm2555_vm3, %v2535_v13, %v2575_v30  ;;  %v2245_v13 = vpop.f32.mrf.mxu3  ;;  %v2511_v41 = vadd.f32 %v6319_v47, %v6299_v49 }
 0x41d   : > { %v2431_v55 = vpop.f32.mrf.mxu1  ;;  %v4753_v51 = vpack.i.bf16 %v2595_v61, %v2590_v0  ;;  %2621 = vst [vmem:[#allocation2] sm:$0xff] %v2609_v38 }
 0x41e   : > { %v2534_v14 = vadd.f32 %v2514_v20, %v2410_v28  ;;  %v2432_v63 = vadd.f32 %v2431_v55, %v6313_v18  ;;  %v2513_v28 = vadd.f32 %v6319_v47, %v2245_v13 }
 0x41f   : > { %4754 = vrot.lane.b32.xlu2 %v4753_v51, %s5108_s17 }
 0x420   : > { %v2574_v16 = vmul.f32 0.2, %v2534_v14  ;;  %v2540_v10 = vadd.f32 %v2520_v4, %v2432_v63  ;;  %v4758_v31 = vpack.i.bf16 %v2534_v14, %v2529_v52  ;;  %vm2554_vm4 = vcmp.gt.f32.partialorder %v2534_v14, 0.0  ;;  %v2221_v57 = vpop.f32.mrf.mxu2 }
 0x422   : > { %4759 = vrot.lane.b32.xlu0 %v4758_v31, %s5108_s17  ;;  %v2594_v23 = vsel %vm2554_vm4, %v2534_v14, %v2574_v16  ;;  %v2580_v40 = vmul.f32 0.2, %v2540_v10  ;;  %vm2560_vm5 = vcmp.gt.f32.partialorder %v2540_v10, 0.0 }
 0x423   : > { %v2412_v59 = vpop.f32.mrf.mxu0  ;;  %v2612_v5 = vpack.c.bf16 %v2595_v61, %v2594_v23  ;;  %v4763_v33 = vpack.i.bf16 %v2594_v23, %v2589_v25  ;;  %v2512_v25 = vadd.f32 %v6319_v47, %v2216_v35 }
 0x424   : > { %v2413_v45 = vadd.f32 %v2412_v59, %v6313_v18  ;;  %4749 = vrot.lane.b32.xlu1 %v4753_v51, %s5109_s25  ;;  %v2600_v21 = vsel %vm2560_vm5, %v2540_v10, %v2580_v40  ;;  %v2247_v61 = vpop.f32.mrf.mxu3 }
 0x425   : > { %v2433_v39 = vpop.f32.mrf.mxu1  ;;  %2624 = vst [vmem:[#allocation2 + $0x14] sm:$0xff] %v2612_v5 }
 0x426   : > { %v2539_v24 = vadd.f32 %v2519_v22, %v2413_v45  ;;  %v2434_v62 = vadd.f32 %v2433_v39, %v6311_v50  ;;  %v2518_v39 = vadd.f32 %v6325_v60, %v2247_v61 }
 0x428   : > { %v2579_v1 = vmul.f32 0.2, %v2539_v24  ;;  %v2545_v32 = vadd.f32 %v2525_v53, %v2434_v62  ;;  %vm2559_vm6 = vcmp.gt.f32.partialorder %v2539_v24, 0.0  ;;  %v6359_v9 = vpop.f32.mrf.mxu2 }
 0x429   : > { %v2527_v61 = vadd.f32 %v6321_v58, %v6359_v9 }
 0x42a   : > { %v2585_v17 = vmul.f32 0.2, %v2545_v32  ;;  %4764 = vrot.lane.b32.xlu0 %v4763_v33, %s5109_s25  ;;  %vm2565_vm8 = vcmp.gt.f32.partialorder %v2545_v32, 0.0  ;;  %v2599_v6 = vsel %vm2559_vm6, %v2539_v24, %v2579_v1  ;;  %v4773_v36 = vpack.i.bf16 %v2545_v32, %v2540_v10 }
 0x42b   : > { %v2414_v44 = vpop.f32.mrf.mxu0  ;;  %v2615_v2 = vpack.c.bf16 %v2600_v21, %v2599_v6  ;;  %vm2673_vm6 = vcmp.lt.s32.totalorder %v5352_v43, 119 }
 0x42c   : > { %v2415_v11 = vadd.f32 %v2414_v44, %v6311_v50  ;;  %4769 = vrot.lane.b32.xlu1 %v4763_v33, %s5108_s17  ;;  %v2605_v19 = vsel %vm2565_vm8, %v2545_v32, %v2585_v17  ;;  %v2517_v33 = vadd.f32 %v6325_v60, %v2218_v26  ;;  %v2250_v32 = vpop.f32.mrf.mxu3  ;;  %vm2758_vm8 = vcmp.lt.s32.totalorder %v5352_v43, 110 }
 0x42d   : > { %2627 = vst [vmem:[#allocation2 + $0x28] sm:$0xff] %v2615_v2  ;;  %v4783_v15 = vpack.i.bf16 %v2605_v19, %v2600_v21 }
 0x42e   : > { %v2544_v27 = vadd.f32 %v2524_v54, %v2415_v11 }
 0x430   : > { %v2584_v56 = vmul.f32 0.2, %v2544_v27  ;;  %v4788_v42 = vpack.i.bf16 %v2544_v27, %v2539_v24  ;;  %vm2564_vm9 = vcmp.gt.f32.partialorder %v2544_v27, 0.0 }
 0x432   : > { %4789 = vrot.lane.b32.xlu2 %v4788_v42, %s5108_s17  ;;  %4784 = vrot.lane.b32.xlu0 %v4783_v15, %s5108_s17  ;;  %v2604_v8 = vsel %vm2564_vm9, %v2544_v27, %v2584_v56  ;;  %v2522_v27 = vadd.f32 %v6309_v46, %v2221_v57 }
 0x433   : > { %v2618_v37 = vpack.c.bf16 %v2605_v19, %v2604_v8  ;;  %v4798_v52 = vpack.i.bf16 %v2604_v8, %v2599_v6  ;;  %v2523_v8 = vadd.f32 %v6309_v46, %v2250_v32 }
 0x434   : > { %4774 = vrot.lane.b32.xlu1 %v4773_v36, %s5108_s17 }
 0x435   : > { %2630 = vst [vmem:[#allocation2 + $0x3c] sm:$0xff] %v2618_v37 }
 0x43a   : > { %4799 = vrot.lane.b32.xlu2 %v4798_v52, %s5108_s17  ;;  %4794 = vrot.lane.b32.xlu0 %v4798_v52, %s5109_s25 }
 0x43c   : > { %4779 = vrot.lane.b32.xlu1 %v4783_v15, %s5109_s25 }
 0x453   : > { %v2445_v0 = vpop.f32.mrf.mxu2  ;;  %v2464_v30 = vpop.f32.mrf.mxu0 }
 0x454   : > { %v2446_v34 = vadd.f32 %v2445_v0, %v6317_v7  ;;  %v2465_v38 = vadd.f32 %v2464_v30, %v6317_v7  ;;  %v2483_v4 = vpop.f32.mrf.mxu1 }
 0x455   : > { %v2484_v20 = vadd.f32 %v2483_v4, %v6317_v7  ;;  %v2516_v7 = vadd.f32 %v6325_v60, %v6305_v3 }
 0x456   : > { %v2531_v55 = vadd.f32 %v2511_v41, %v2446_v34  ;;  %v6368_v51 = vadd.f32 %v2512_v25, %v2465_v38  ;;  %v2526_v34 = vadd.f32 %v6321_v58, %v6315_v12 }
 0x457   : > { %v6370_v14 = vadd.f32 %v2513_v28, %v2484_v20 }
 0x458   : > { %v2571_v63 = vmul.f32 0.2, %v2531_v55  ;;  %v2572_v49 = vmul.f32 0.2, %v6368_v51  ;;  %vm2551_vm10 = vcmp.gt.f32.partialorder %v2531_v55, 0.0  ;;  %vm2552_vm11 = vcmp.gt.f32.partialorder %v6368_v51, 0.0 }
 0x459   : > { %v2573_v16 = vmul.f32 0.2, %v6370_v14  ;;  %vm2553_vm12 = vcmp.gt.f32.partialorder %v6370_v14, 0.0 }
 0x45a   : > { %v2591_v10 = vsel %vm2551_vm10, %v2531_v55, %v2571_v63  ;;  %v6377_v47 = vsel %vm2552_vm11, %v6368_v51, %v2572_v49 }
 0x45b   : > { %v2447_v31 = vpop.f32.mrf.mxu2  ;;  %v2466_v23 = vpop.f32.mrf.mxu0  ;;  %v2610_v59 = vpack.c.bf16 %v6377_v47, %v2591_v10  ;;  %v6383_v5 = vsel %vm2553_vm12, %v6370_v14, %v2573_v16 }
 0x45c   : > { %v2448_v22 = vadd.f32 %v2447_v31, %v6327_v29  ;;  %v2467_v53 = vadd.f32 %v2466_v23, %v6327_v29  ;;  %v2485_v40 = vpop.f32.mrf.mxu1  ;;  %v2611_v45 = vpack.c.bf16 %v6383_v5, %v6383_v5 }
 0x45d   : > { %v2486_v3 = vadd.f32 %v2485_v40, %v6327_v29  ;;  %2622 = vst [vmem:[#allocation2 + $0x8] sm:$0xff] %v2610_v59  ;;  %v2521_v29 = vadd.f32 %v6309_v46, %v6307_v48  ;;  %v2252_v46 = vpop.f32.mrf.mxu3 }
 0x45e   : > { %v2536_v24 = vadd.f32 %v2516_v7, %v2448_v22  ;;  %v2537_v62 = vadd.f32 %v2517_v33, %v2467_v53  ;;  %2623 = vst [vmem:[#allocation2 + $0x10] sm:$0xf] %v2611_v45  ;;  %v2528_v16 = vadd.f32 %v6321_v58, %v2252_v46 }
 0x45f   : > { %v6392_v1 = vadd.f32 %v2518_v39, %v2486_v3 }
 0x460   : > { %v2576_v21 = vmul.f32 0.2, %v2536_v24  ;;  %v2577_v17 = vmul.f32 0.2, %v2537_v62  ;;  %v4803_v6 = vpack.i.bf16 %v2536_v24, %v2531_v55  ;;  %vm2556_vm13 = vcmp.gt.f32.partialorder %v2536_v24, 0.0 }
 0x461   : > { %v2578_v44 = vmul.f32 0.2, %v6392_v1  ;;  %vm2557_vm14 = vcmp.gt.f32.partialorder %v2537_v62, 0.0  ;;  %vm2558_vm15 = vcmp.gt.f32.partialorder %v6392_v1, 0.0  ;;  %v4808_v13 = vpack.i.bf16 %v2537_v62, %v6368_v51 }
 0x462   : > { %4804 = vrot.lane.b32.xlu2 %v4803_v6, %s5108_s17  ;;  %v2596_v2 = vsel %vm2556_vm13, %v2536_v24, %v2576_v21  ;;  %v6396_v60 = vsel %vm2557_vm14, %v2537_v62, %v2577_v17  ;;  %v4833_v3 = vpack.i.bf16 %v6392_v1, %v6370_v14 }
 0x463   : > { %v2450_v11 = vpop.f32.mrf.mxu2  ;;  %v2469_v54 = vpop.f32.mrf.mxu0  ;;  %v4818_v19 = vpack.i.bf16 %v2596_v2, %v2591_v10  ;;  %v2613_v35 = vpack.c.bf16 %v6396_v60, %v2596_v2  ;;  %v6406_v36 = vsel %vm2558_vm15, %v6392_v1, %v2578_v44  ;;  %v4858_v62 = vpack.i.bf16 %v6396_v60, %v6377_v47 }
 0x464   : > { %v2451_v15 = vadd.f32 %v2450_v11, %v6313_v18  ;;  %v2470_v56 = vadd.f32 %v2469_v54, %v6313_v18  ;;  %v2488_v42 = vpop.f32.mrf.mxu1  ;;  %v2614_v48 = vpack.c.bf16 %v6406_v36, %v6406_v36  ;;  %v4863_v14 = vpack.i.bf16 %v6406_v36, %v6383_v5 }
 0x465   : > { %v2489_v37 = vadd.f32 %v2488_v42, %v6313_v18  ;;  %4819 = vrot.lane.b32.xlu0 %v4818_v19, %s5108_s17  ;;  %2625 = vst [vmem:[#allocation2 + $0x1c] sm:$0xff] %v2613_v35 }
 0x466   : > { %v2541_v52 = vadd.f32 %v2521_v29, %v2451_v15  ;;  %v2542_v26 = vadd.f32 %v2522_v27, %v2470_v56  ;;  %2626 = vst [vmem:[#allocation2 + $0x24] sm:$0xf] %v2614_v48 }
 0x467   : > { %v2543_v57 = vadd.f32 %v2523_v8, %v2489_v37 }
 0x468   : > { %v2581_v0 = vmul.f32 0.2, %v2541_v52  ;;  %v2582_v30 = vmul.f32 0.2, %v2542_v26  ;;  %vm2561_vm0 = vcmp.gt.f32.partialorder %v2541_v52, 0.0  ;;  %vm2562_vm1 = vcmp.gt.f32.partialorder %v2542_v26, 0.0 }
 0x469   : > { %v2583_v41 = vmul.f32 0.2, %v2543_v57  ;;  %vm2563_vm2 = vcmp.gt.f32.partialorder %v2543_v57, 0.0 }
 0x46a   : > { %4809 = vrot.lane.b32.xlu2 %v4808_v13, %s5108_s17  ;;  %v2601_v18 = vsel %vm2561_vm0, %v2541_v52, %v2581_v0  ;;  %v2602_v25 = vsel %vm2562_vm1, %v2542_v26, %v2582_v30 }
 0x46b   : > { %v2452_v38 = vpop.f32.mrf.mxu2  ;;  %v2471_v4 = vpop.f32.mrf.mxu0  ;;  %v2616_v28 = vpack.c.bf16 %v2602_v25, %v2601_v18  ;;  %v2603_v20 = vsel %vm2563_vm2, %v2543_v57, %v2583_v41 }
 0x46c   : > { %v2453_v55 = vadd.f32 %v2452_v38, %v6311_v50  ;;  %v2472_v51 = vadd.f32 %v2471_v4, %v6311_v50  ;;  %v2490_v63 = vpop.f32.mrf.mxu1  ;;  %v2617_v49 = vpack.c.bf16 %v2603_v20, %v2603_v20 }
 0x46d   : > { %v2491_v10 = vadd.f32 %v2490_v63, %v6311_v50  ;;  %2628 = vst [vmem:[#allocation2 + $0x30] sm:$0xff] %v2616_v28 }
 0x46e   : > { %v2546_v7 = vadd.f32 %v2526_v34, %v2453_v55  ;;  %v2547_v12 = vadd.f32 %v2527_v61, %v2472_v51  ;;  %2629 = vst [vmem:[#allocation2 + $0x38] sm:$0xf] %v2617_v49 }
 0x46f   : > { %v2548_v31 = vadd.f32 %v2528_v16, %v2491_v10 }
 0x470   : > { %v2586_v23 = vmul.f32 0.2, %v2546_v7  ;;  %v2587_v59 = vmul.f32 0.2, %v2547_v12  ;;  %v4828_v33 = vpack.i.bf16 %v2547_v12, %v2542_v26  ;;  %vm2566_vm3 = vcmp.gt.f32.partialorder %v2546_v7, 0.0 }
 0x471   : > { %v2588_v9 = vmul.f32 0.2, %v2548_v31  ;;  %v4823_v22 = vpack.i.bf16 %v2546_v7, %v2541_v52  ;;  %vm2567_vm4 = vcmp.gt.f32.partialorder %v2547_v12, 0.0  ;;  %vm2568_vm5 = vcmp.gt.f32.partialorder %v2548_v31, 0.0 }
 0x472   : > { %4814 = vrot.lane.b32.xlu2 %v4818_v19, %s5109_s25  ;;  %4829 = vrot.lane.b32.xlu0 %v4828_v33, %s5108_s17  ;;  %v2606_v53 = vsel %vm2566_vm3, %v2546_v7, %v2586_v23  ;;  %v2607_v58 = vsel %vm2567_vm4, %v2547_v12, %v2587_v59  ;;  %v4848_v24 = vpack.i.bf16 %v2548_v31, %v2543_v57 }
 0x473   : > { %v4843_v50 = vpack.i.bf16 %v2606_v53, %v2601_v18  ;;  %v2619_v40 = vpack.c.bf16 %v2607_v58, %v2606_v53  ;;  %v2608_v45 = vsel %vm2568_vm5, %v2548_v31, %v2588_v9  ;;  %v4853_v32 = vpack.i.bf16 %v2607_v58, %v2602_v25 }
 0x474   : > { %v2620_v39 = vpack.c.bf16 %v2608_v45, %v2608_v45  ;;  %v4868_v21 = vpack.i.bf16 %v2608_v45, %v2603_v20 }
 0x475   : > { %4844 = vrot.lane.b32.xlu1 %v4843_v50, %s5108_s17  ;;  %2631 = vst [vmem:[#allocation2 + $0x44] sm:$0xff] %v2619_v40 }
 0x476   : > { %2632 = vst [vmem:[#allocation2 + $0x4c] sm:$0xf] %v2620_v39 }
 0x479   : > { %v6444_v47 = vpop.permute.xlu2 %4754 }
 0x47a   : > { %4824 = vrot.lane.b32.xlu2 %v4823_v22, %s5108_s17  ;;  %4834 = vrot.lane.b32.xlu0 %v4833_v3, %s5108_s17  ;;  %v4757_v31 = vunpack.i.h.bf16 %v6444_v47  ;;  %v4756_v23 = vunpack.i.l.bf16 %v6444_v47 }
 0x47d   : > { %4849 = vrot.lane.b32.xlu1 %v4848_v24, %s5108_s17 }
 0x482   : > { %4839 = vrot.lane.b32.xlu2 %v4843_v50, %s5109_s25  ;;  %4859 = vrot.lane.b32.xlu0 %v4858_v62, %s5109_s25 }
 0x485   : > { %4854 = vrot.lane.b32.xlu1 %v4853_v32, %s5109_s25 }
 0x48a   : > { %4869 = vrot.lane.b32.xlu2 %v4868_v21, %s5109_s25  ;;  %4879 = vrot.lane.b32.xlu0 %v4868_v21, %s5108_s17 }
 0x48c   : > { %v6446_v1 = vpop.permute.xlu2 %4789 }
 0x48d   : > { %4864 = vrot.lane.b32.xlu1 %v4863_v14, %s5109_s25  ;;  %v4792_v16 = vunpack.i.h.bf16 %v6446_v1  ;;  %v4791_v10 = vunpack.i.l.bf16 %v6446_v1 }
 0x48e   : > { %v4745_v17 = vpop.permute.xlu1 %4744 }
 0x48f   : > { %v4747_v60 = vunpack.i.h.bf16 %v4745_v17  ;;  %v4746_v5 = vunpack.i.l.bf16 %v4745_v17 }
 0x492   : > { %4874 = vrot.lane.b32.xlu2 %v4853_v32, %s5108_s17 }
 0x494   : > { %v6448_v6 = vpop.permute.xlu0 %4759  ;;  %v6450_v44 = vpop.permute.xlu2 %4799 }
 0x495   : > { %4884 = vrot.lane.b32.xlu1 %v4858_v62, %s5108_s17  ;;  %v4762_v29 = vunpack.i.h.bf16 %v6448_v6  ;;  %v4761_v11 = vunpack.i.l.bf16 %v6448_v6 }
 0x496   : > { %v4750_v2 = vpop.permute.xlu1 %4749 }
 0x497   : > { %v2856_v15 = vsel %vm2673_vm6, %v4762_v29, %v4747_v60  ;;  %v2855_v56 = vsel %vm2673_vm6, %v4761_v11, %v4746_v5  ;;  %v4752_v30 = vunpack.i.h.bf16 %v4750_v2  ;;  %v4751_v41 = vunpack.i.l.bf16 %v4750_v2 }
 0x49a   : > { %4889 = vrot.lane.b32.xlu2 %v4863_v14, %s5108_s17  ;;  %s5014_s17 = sshra.s32 %s3511_s13, 4  ;;  %s5015_s17 = int_to_ptr.hbm [resolvable:$true] %s5014_s17 }
 0x49b   : > { %s5016_s25 = scalar_lea.hbm %s5015_s17, 128  ;;  %p5021_p8 = scmp.lt.s32.totalorder %s5015_s17, %s6895_s5 }
 0x49c   : > { %v6454_v54 = vpop.permute.xlu0 %4764  ;;  %p5017_p1 = scmp.ne.s32.totalorder %s5015_s17, %s5016_s25  ;;  %p5022_p12 = scmp.lt.s32.totalorder %s5020_s14, %s5016_s25 }
 0x49d   : > { %v4767_v57 = vunpack.i.h.bf16 %v6454_v54  ;;  %v4766_v13 = vunpack.i.l.bf16 %v6454_v54  ;;  %v6734_v54 = vld [vmem:[#allocation8 + $0x40] sm:$0xff] }
 0x49e   : > { %v6477_v48 = vpop.permute.xlu1 %4769  ;;  %p5018_p2 = pnand %p5017_p1, %p5219_p5  ;;  %p5023_p13 = por %p5022_p12, %p5021_p8 }
 0x49f   : > { %v2772_v34 = vsel %vm2758_vm8, %v4767_v57, %v4752_v30  ;;  %v2771_v38 = vsel %vm2758_vm8, %v4766_v13, %v4751_v41  ;;  %v4772_v59 = vunpack.i.h.bf16 %v6477_v48  ;;  %v4771_v33 = vunpack.i.l.bf16 %v6477_v48 }
 0x4a0   : > { %p5019_p4 = pneg %p5018_p2 }
 0x4a1   : > { %v2687_v62 = vsel %vm2673_vm6, %v4772_v59, %v4757_v31  ;;  %v2686_v32 = vsel %vm2673_vm6, %v4771_v33, %v4756_v23 }
 0x4a2   : > { %p5024_p0 = pnand %p5023_p13, %p5019_p4 }
 0x4a4   : > { %v6481_v26 = vpop.permute.xlu0 %4784 }
 0x4a6   : > { %v4775_v25 = vpop.permute.xlu1 %4774 }
 0x4a7   : > { %v4777_v51 = vunpack.i.h.bf16 %v4775_v25  ;;  %v4776_v63 = vunpack.i.l.bf16 %v4775_v25 }
 0x4a9   : > { %v2858_v9 = vsel %vm2673_vm6, %v4792_v16, %v4777_v51  ;;  %v2857_v22 = vsel %vm2673_vm6, %v4791_v10, %v4776_v63 }
 0x4ac   : > { %v6498_v4 = vpop.permute.xlu0 %4794 }
 0x4ae   : > { %v4780_v40 = vpop.permute.xlu1 %4779 }
 0x4af   : > { %v4782_v47 = vunpack.i.h.bf16 %v4780_v40  ;;  %v4781_v17 = vunpack.i.l.bf16 %v4780_v40 }
 0x4bc   : > { %v6457_v19 = vpop.permute.xlu2 %4804 }
 0x4bd   : > { %v4807_v35 = vunpack.i.h.bf16 %v6457_v19  ;;  %v4806_v27 = vunpack.i.l.bf16 %v6457_v19 }
 0x4bf   : > { %v2852_v42 = vsel %vm2673_vm6, %v4747_v60, %v4807_v35  ;;  %v2851_v36 = vsel %vm2673_vm6, %v4746_v5, %v4806_v27 }
 0x4c0   : > { %v2863_v8 = vpack.c.bf16 %v2851_v36, %v2855_v56  ;;  %v2866_v37 = vpack.c.bf16 %v2852_v42, %v2856_v15  ;;  %v4797_v15 = vunpack.i.h.bf16 %v6498_v4  ;;  %v4796_v56 = vunpack.i.l.bf16 %v6498_v4 }
 0x4c2   : > { %2875 = vst [vmem:[#allocation2 + $0xf0] sm:$0xff] %v2863_v8  ;;  %v2773_v8 = vsel %vm2758_vm8, %v4796_v56, %v4781_v17 }
 0x4c3   : > { %2878 = vst [vmem:[#allocation2 + $0x104] sm:$0xff] %v2866_v37  ;;  %v2774_v37 = vsel %vm2758_vm8, %v4797_v15, %v4782_v47 }
 0x4c4   : > { %v6479_v52 = vpop.permute.xlu2 %4809 }
 0x4cc   : > { %v6486_v0 = vpop.permute.xlu2 %4814 }
 0x4cd   : > { %v4817_v46 = vunpack.i.h.bf16 %v6486_v0  ;;  %v4816_v18 = vunpack.i.l.bf16 %v6486_v0 }
 0x4cf   : > { %v2768_v28 = vsel %vm2758_vm8, %v4752_v30, %v4817_v46  ;;  %v2767_v20 = vsel %vm2758_vm8, %v4751_v41, %v4816_v18 }
 0x4d0   : > { %v2779_v61 = vpack.c.bf16 %v2767_v20, %v2771_v38  ;;  %v2782_v55 = vpack.c.bf16 %v2768_v28, %v2772_v34 }
 0x4d2   : > { %2791 = vst [vmem:[#allocation2 + $0xa0] sm:$0xff] %v2779_v61 }
 0x4d3   : > { %2794 = vst [vmem:[#allocation2 + $0xb4] sm:$0xff] %v2782_v55 }
 0x4d4   : > { %v6508_v49 = vpop.permute.xlu2 %4824 }
 0x4d5   : > { %v4827_v7 = vunpack.i.h.bf16 %v6508_v49  ;;  %v4826_v12 = vunpack.i.l.bf16 %v6508_v49 }
 0x4d7   : > { %v2853_v53 = vsel %vm2673_vm6, %v4776_v63, %v4826_v12  ;;  %v2854_v58 = vsel %vm2673_vm6, %v4777_v51, %v4827_v7  ;;  %v6534_v50 = vpop.permute.xlu0 %4819  ;;  %v4154_v51 = vld [vmem:[#allocation2 + $0xf0] sm:$0xf] }
 0x4d8   : > { %v2869_v45 = vpack.c.bf16 %v2853_v53, %v2857_v22  ;;  %v2872_v39 = vpack.c.bf16 %v2854_v58, %v2858_v9  ;;  %v4822_v3 = vunpack.i.h.bf16 %v6534_v50  ;;  %v4821_v24 = vunpack.i.l.bf16 %v6534_v50  ;;  %v4325_v9 = vld [vmem:[#allocation2 + $0xf4] sm:$0xf]  ;;  %v4156_v22 = vld [vmem:[#allocation2 + $0x104] sm:$0xf0] }
 0x4d9   : > { %v4787_v53 = vunpack.i.h.bf16 %v6481_v26  ;;  %v4786_v58 = vunpack.i.l.bf16 %v6481_v26 }
 0x4da   : > { %2881 = vst [vmem:[#allocation2 + $0x118] sm:$0xff] %v2869_v45  ;;  %v2683_v21 = vsel %vm2673_vm6, %v4757_v31, %v4822_v3  ;;  %v2682_v14 = vsel %vm2673_vm6, %v4756_v23, %v4821_v24  ;;  %v4327_v23 = vld [vmem:[#allocation2 + $0x100] sm:$0xf0] }
 0x4db   : > { %2884 = vst [vmem:[#allocation2 + $0x12c] sm:$0xff] %v2872_v39  ;;  %v2697_v2 = vpack.c.bf16 %v2683_v21, %v2687_v62  ;;  %v2694_v60 = vpack.c.bf16 %v2682_v14, %v2686_v32  ;;  %v4802_v39 = vunpack.i.h.bf16 %v6450_v44  ;;  %v4801_v62 = vunpack.i.l.bf16 %v6450_v44  ;;  %v4301_v44 = vld [vmem:[#allocation2 + $0x4] sm:$0xf] }
 0x4dc   : > { %v6554_v5 = vpop.permute.xlu2 %4839  ;;  %v4155_v14 = vor.u32 %v4327_v23, %v4154_v51  ;;  %v4122_v23 = vld [vmem:[#allocation2 + $0xa0] sm:$0xf] }
 0x4dd   : > { %2709 = vst [vmem:[#allocation2 + $0x64] sm:$0xff] %v2697_v2  ;;  %v4842_v42 = vunpack.i.h.bf16 %v6554_v5  ;;  %v4841_v36 = vunpack.i.l.bf16 %v6554_v5 }
 0x4de   : > { %2706 = vst [vmem:[#allocation2 + $0x50] sm:$0xff] %v2694_v60 }
 0x4df   : > { %v2769_v30 = vsel %vm2758_vm8, %v4781_v17, %v4841_v36  ;;  %v2770_v41 = vsel %vm2758_vm8, %v4782_v47, %v4842_v42  ;;  %v4159_v47 = vor.u32 %v4325_v9, %v4156_v22 }
 0x4e0   : > { %v2785_v25 = vpack.c.bf16 %v2769_v30, %v2773_v8  ;;  %v2788_v34 = vpack.c.bf16 %v2770_v41, %v2774_v37  ;;  %v4812_v41 = vunpack.i.h.bf16 %v6479_v52 }
 0x4e1   : > { %v4170_v38 = vld [vmem:[#allocation2 + $0x118] sm:$0xf]  ;;  %v4329_v4 = vld [vmem:[#allocation2 + $0x11c] sm:$0xf] }
 0x4e2   : > { %2797 = vst [vmem:[#allocation2 + $0xc8] sm:$0xff] %v2785_v25  ;;  %v4331_v28 = vld [vmem:[#allocation2 + $0x128] sm:$0xf0]  ;;  %v4172_v20 = vld [vmem:[#allocation2 + $0x12c] sm:$0xf0]  ;;  %v4811_v25 = vunpack.i.l.bf16 %v6479_v52 }
 0x4e3   : > { %2800 = vst [vmem:[#allocation2 + $0xdc] sm:$0xff] %v2788_v34  ;;  %v4171_v61 = vor.u32 %v4331_v28, %v4170_v38  ;;  %v4175_v55 = vor.u32 %v4329_v4, %v4172_v20  ;;  %v4319_v52 = vld [vmem:[#allocation2 + $0xb0] sm:$0xf0] }
 0x4e4   : > { %v6572_v63 = vpop.permute.xlu2 %4869  ;;  %v6574_v31 = vpop.permute.xlu0 %4829  ;;  %v4092_v1 = vld [vmem:[#allocation2 + $0x64] sm:$0xf0] }
 0x4e5   : > { %v4872_v40 = vunpack.i.h.bf16 %v6572_v63  ;;  %v4871_v45 = vunpack.i.l.bf16 %v6572_v63  ;;  %3112 = vmatpush.bf16.msra.mxu2 %v4171_v61  ;;  %3141 = vmatpush.bf16.msrb.mxu3 %v4175_v55 }
 0x4e7   : > { %v2777_v32 = vsel %vm2758_vm8, %v4871_v45, %v4796_v56  ;;  %v2778_v26 = vsel %vm2758_vm8, %v4872_v40, %v4797_v15  ;;  %v6590_v21 = vpop.permute.xlu1 %4844  ;;  %v2689_v56 = vsel %vm2673_vm6, %v4802_v39, %v4787_v53  ;;  %v2688_v15 = vsel %vm2673_vm6, %v4801_v62, %v4786_v58 }
 0x4e8   : > { %v2787_v17 = vpack.c.bf16 %v2777_v32, %v2777_v32  ;;  %v2790_v2 = vpack.c.bf16 %v2778_v26, %v2778_v26  ;;  %v4847_v60 = vunpack.i.h.bf16 %v6590_v21  ;;  %v4846_v8 = vunpack.i.l.bf16 %v6590_v21  ;;  %v4317_v32 = vld [vmem:[#allocation2 + $0xa4] sm:$0xf]  ;;  %v4124_v26 = vld [vmem:[#allocation2 + $0xb4] sm:$0xf0] }
 0x4e9   : > { %3113 = vmatpush.bf16.msra.mxu2 %v4155_v14  ;;  %3142 = vmatpush.bf16.msrb.mxu3 %v4159_v47  ;;  %v4138_v37 = vld [vmem:[#allocation2 + $0xc8] sm:$0xf]  ;;  %v4321_v30 = vld [vmem:[#allocation2 + $0xcc] sm:$0xf]  ;;  %v2848_v47 = vsel %vm2673_vm6, %v4807_v35, %v4812_v41 }
 0x4ea   : > { %2799 = vst [vmem:[#allocation2 + $0xd8] sm:$0xf] %v2787_v17  ;;  %v2684_v34 = vsel %vm2673_vm6, %v4786_v58, %v4846_v8  ;;  %v2685_v38 = vsel %vm2673_vm6, %v4787_v53, %v4847_v60  ;;  %v4323_v4 = vld [vmem:[#allocation2 + $0xd8] sm:$0xf0]  ;;  %v4140_v28 = vld [vmem:[#allocation2 + $0xdc] sm:$0xf0]  ;;  %v2847_v53 = vsel %vm2673_vm6, %v4806_v27, %v4811_v25  ;;  %v4831_v17 = vunpack.i.l.bf16 %v6574_v31 }
 0x4eb   : > { %2802 = vst [vmem:[#allocation2 + $0xec] sm:$0xf] %v2790_v2  ;;  %v2700_v20 = vpack.c.bf16 %v2684_v34, %v2688_v15  ;;  %v2703_v61 = vpack.c.bf16 %v2685_v38, %v2689_v56  ;;  %v4139_v55 = vor.u32 %v4323_v4, %v4138_v37  ;;  %v4143_v51 = vor.u32 %v4321_v30, %v4140_v28 }
 0x4ec   : > { %v6612_v9 = vpop.permute.xlu2 %4874  ;;  %v4835_v22 = vpop.permute.xlu0 %4834  ;;  %v4123_v2 = vor.u32 %v4319_v52, %v4122_v23  ;;  %v4832_v56 = vunpack.i.h.bf16 %v6574_v31  ;;  %v4127_v30 = vor.u32 %v4317_v32, %v4124_v26  ;;  %v4311_v32 = vld [vmem:[#allocation2 + $0x60] sm:$0xf0] }
 0x4ed   : > { %2712 = vst [vmem:[#allocation2 + $0x78] sm:$0xff] %v2700_v20  ;;  %v4837_v58 = vunpack.i.h.bf16 %v4835_v22  ;;  %v4836_v14 = vunpack.i.l.bf16 %v4835_v22  ;;  %3114 = vmatpush.bf16.msra.mxu2 %v4139_v55  ;;  %3143 = vmatpush.bf16.msrb.mxu3 %v4143_v51 }
 0x4ee   : > { %2715 = vst [vmem:[#allocation2 + $0x8c] sm:$0xff] %v2703_v61 }
 0x4ef   : > { %v2844_v15 = vsel %vm2673_vm6, %v4812_v41, %v4837_v58  ;;  %v2860_v37 = vsel %vm2673_vm6, %v4837_v58, %v4762_v29  ;;  %v4850_v27 = vpop.permute.xlu1 %4849  ;;  %v2843_v35 = vsel %vm2673_vm6, %v4811_v25, %v4836_v14  ;;  %v2859_v31 = vsel %vm2673_vm6, %v4836_v14, %v4761_v11 }
 0x4f0   : > { %v2867_v19 = vpack.c.bf16 %v2844_v15, %v2848_v47  ;;  %v2868_v34 = vpack.c.bf16 %v2860_v37, %v2860_v37  ;;  %v2864_v38 = vpack.c.bf16 %v2843_v35, %v2847_v53  ;;  %v2865_v4 = vpack.c.bf16 %v2859_v31, %v2859_v31  ;;  %v4090_v47 = vld [vmem:[#allocation2 + $0x50] sm:$0xf] }
 0x4f1   : > { %v4852_v41 = vunpack.i.h.bf16 %v4850_v27  ;;  %v4851_v28 = vunpack.i.l.bf16 %v4850_v27  ;;  %3115 = vmatpush.bf16.msra.mxu2 %v4123_v2  ;;  %3144 = vmatpush.bf16.msrb.mxu3 %v4127_v30  ;;  %v2849_v29 = vsel %vm2673_vm6, %v4826_v12, %v4831_v17  ;;  %v2850_v12 = vsel %vm2673_vm6, %v4827_v7, %v4832_v56 }
 0x4f2   : > { %2879 = vst [vmem:[#allocation2 + $0x10c] sm:$0xff] %v2867_v19  ;;  %v4876_v35 = vunpack.i.l.bf16 %v6612_v9 }
 0x4f3   : > { %2880 = vst [vmem:[#allocation2 + $0x114] sm:$0xf] %v2868_v34  ;;  %v2862_v6 = vsel %vm2673_vm6, %v4852_v41, %v4792_v16  ;;  %v2845_v11 = vsel %vm2673_vm6, %v4831_v17, %v4851_v28  ;;  %v2846_v25 = vsel %vm2673_vm6, %v4832_v56, %v4852_v41  ;;  %v2861_v20 = vsel %vm2673_vm6, %v4851_v28, %v4791_v10  ;;  %v4309_v17 = vld [vmem:[#allocation2 + $0x54] sm:$0xf]  ;;  %v4076_v41 = vld [vmem:[#allocation2 + $0x3c] sm:$0xf0] }
 0x4f4   : > { %2876 = vst [vmem:[#allocation2 + $0xf8] sm:$0xff] %v2864_v38  ;;  %v2874_v61 = vpack.c.bf16 %v2862_v6, %v2862_v6  ;;  %v2870_v55 = vpack.c.bf16 %v2845_v11, %v2849_v29  ;;  %v2871_v16 = vpack.c.bf16 %v2861_v20, %v2861_v20  ;;  %v6656_v51 = vpop.permute.xlu2 %4889  ;;  %v6658_v23 = vpop.permute.xlu0 %4859  ;;  %v4106_v52 = vld [vmem:[#allocation2 + $0x78] sm:$0xf]  ;;  %v4313_v22 = vld [vmem:[#allocation2 + $0x7c] sm:$0xf]  ;;  %v2873_v26 = vpack.c.bf16 %v2846_v25, %v2850_v12 }
 0x4f5   : > { %2877 = vst [vmem:[#allocation2 + $0x100] sm:$0xf] %v2865_v4  ;;  %v4892_v10 = vunpack.i.h.bf16 %v6656_v51  ;;  %v4891_v49 = vunpack.i.l.bf16 %v6656_v51  ;;  %v4315_v58 = vld [vmem:[#allocation2 + $0x88] sm:$0xf0]  ;;  %v4108_v7 = vld [vmem:[#allocation2 + $0x8c] sm:$0xf0]  ;;  %v4877_v34 = vunpack.i.h.bf16 %v6612_v9  ;;  %v4095_v48 = vor.u32 %v4309_v17, %v4092_v1 }
 0x4f6   : > { %2886 = vst [vmem:[#allocation2 + $0x13c] sm:$0xf] %v2874_v61  ;;  %v4107_v14 = vor.u32 %v4315_v58, %v4106_v52  ;;  %v4111_v53 = vor.u32 %v4313_v22, %v4108_v7  ;;  %v4307_v4 = vld [vmem:[#allocation2 + $0x38] sm:$0xf0]  ;;  %v4074_v6 = vld [vmem:[#allocation2 + $0x28] sm:$0xf]  ;;  %v2680_v5 = vsel %vm2673_vm6, %v4846_v8, %v4876_v35  ;;  %v4862_v20 = vunpack.i.h.bf16 %v6658_v23 }
 0x4f7   : > { %2882 = vst [vmem:[#allocation2 + $0x120] sm:$0xff] %v2870_v55  ;;  %v2690_v2 = vsel %vm2673_vm6, %v4891_v49, %v4771_v33  ;;  %v2691_v56 = vsel %vm2673_vm6, %v4892_v10, %v4772_v59  ;;  %v4855_v15 = vpop.permute.xlu1 %4854  ;;  %v4091_v33 = vor.u32 %v4311_v32, %v4090_v47  ;;  %v4075_v25 = vor.u32 %v4307_v4, %v4074_v6  ;;  %v4303_v52 = vld [vmem:[#allocation2 + $0x10] sm:$0xf0]  ;;  %v4060_v22 = vld [vmem:[#allocation2 + $0x14] sm:$0xf0]  ;;  %v6769_v51 = vld [vmem:[%s6894_s4] sm:$0xff] }
 0x4f8   : > { %2883 = vst [vmem:[#allocation2 + $0x128] sm:$0xf] %v2871_v16  ;;  %v2696_v37 = vpack.c.bf16 %v2690_v2, %v2690_v2  ;;  %v2699_v27 = vpack.c.bf16 %v2691_v56, %v2691_v56  ;;  %v4857_v30 = vunpack.i.h.bf16 %v4855_v15  ;;  %v4856_v19 = vunpack.i.l.bf16 %v4855_v15  ;;  %3116 = vmatpush.bf16.msra.mxu2 %v4107_v14  ;;  %3145 = vmatpush.bf16.msrb.mxu3 %v4111_v53  ;;  %v4058_v2 = vld [vmem:[#allocation2] sm:$0xf] }
 0x4f9   : > { %2885 = vst [vmem:[#allocation2 + $0x134] sm:$0xff] %v2873_v26  ;;  %v4861_v12 = vunpack.i.l.bf16 %v6658_v23  ;;  %v4059_v15 = vor.u32 %v4303_v52, %v4058_v2 }
 0x4fa   : > { %2708 = vst [vmem:[#allocation2 + $0x60] sm:$0xf] %v2696_v37  ;;  %v2762_v59 = vsel %vm2758_vm8, %v4857_v30, %v4872_v40  ;;  %v2766_v31 = vsel %vm2758_vm8, %v4842_v42, %v4857_v30  ;;  %v2761_v38 = vsel %vm2758_vm8, %v4856_v19, %v4871_v45  ;;  %v2765_v9 = vsel %vm2758_vm8, %v4841_v36, %v4856_v19  ;;  %v4305_v42 = vld [vmem:[#allocation2 + $0x2c] sm:$0xf]  ;;  %v4164_v19 = vld [vmem:[#allocation2 + $0x10c] sm:$0xf0] }
 0x4fb   : > { %2711 = vst [vmem:[#allocation2 + $0x74] sm:$0xf] %v2699_v27  ;;  %v2789_v28 = vpack.c.bf16 %v2762_v59, %v2766_v31  ;;  %v2786_v40 = vpack.c.bf16 %v2761_v38, %v2765_v9  ;;  %v4079_v45 = vor.u32 %v4305_v42, %v4076_v41  ;;  %v2681_v36 = vsel %vm2673_vm6, %v4847_v60, %v4877_v34  ;;  %v4326_v59 = vld [vmem:[#allocation2 + $0xfc] sm:$0xf] }
 0x4fc   : > { %3117 = vmatpush.bf16.msra.mxu2 %v4091_v33  ;;  %3146 = vmatpush.bf16.msrb.mxu3 %v4095_v48  ;;  %v4880_v29 = vpop.permute.xlu0 %4879  ;;  %v2763_v56 = vsel %vm2758_vm8, %v4816_v18, %v4861_v12  ;;  %v4063_v37 = vor.u32 %v4301_v44, %v4060_v22  ;;  %v4328_v18 = vld [vmem:[#allocation2 + $0x108] sm:$0xf0]  ;;  %v4162_v48 = vld [vmem:[#allocation2 + $0xf8] sm:$0xf]  ;;  %v4167_v41 = vor.u32 %v4326_v59, %v4164_v19 }
 0x4fd   : > { %2801 = vst [vmem:[#allocation2 + $0xe4] sm:$0xff] %v2789_v28  ;;  %v4882_v63 = vunpack.i.h.bf16 %v4880_v29  ;;  %v4881_v11 = vunpack.i.l.bf16 %v4880_v29  ;;  %v4163_v4 = vor.u32 %v4328_v18, %v4162_v48  ;;  %v6739_v42 = vld [vmem:[%s6894_s4 + $0x18] sm:$0xff]  ;;  %v5112_v48 = vmov 8  }
 0x4fe   : > { %2798 = vst [vmem:[#allocation2 + $0xd0] sm:$0xff] %v2786_v40  ;;  %v4178_v61 = vld [vmem:[#allocation2 + $0x120] sm:$0xf]  ;;  %v4330_v55 = vld [vmem:[#allocation2 + $0x124] sm:$0xf]  ;;  %v5110_v40 = vmov 6  }
 0x4ff   : > { %v2677_v16 = vsel %vm2673_vm6, %v4877_v34, %v4882_v63  ;;  %v2693_v8 = vsel %vm2673_vm6, %v4882_v63, %v4802_v39  ;;  %v2676_v21 = vsel %vm2673_vm6, %v4876_v35, %v4881_v11  ;;  %v2692_v60 = vsel %vm2673_vm6, %v4881_v11, %v4801_v62  ;;  %v4865_v23 = vpop.permute.xlu1 %4864  ;;  %4894 = vset.pattern.permute.xlu1 %v5110_v40  ;;  %v6745_v63 = vld [vmem:[%s6894_s4 + $0x10] sm:$0xff] }
 0x500   : > { %v2704_v32 = vpack.c.bf16 %v2677_v16, %v2681_v36  ;;  %v2705_v1 = vpack.c.bf16 %v2693_v8, %v2693_v8  ;;  %v2701_v26 = vpack.c.bf16 %v2676_v21, %v2680_v5  ;;  %v2702_v58 = vpack.c.bf16 %v2692_v60, %v2692_v60  ;;  %3118 = vmatpush.bf16.msra.mxu2 %v4075_v25  ;;  %v4332_v7 = vld [vmem:[#allocation2 + $0x130] sm:$0xf0]  ;;  %v4180_v14 = vld [vmem:[#allocation2 + $0x134] sm:$0xf0]  ;;  %v6775_v16 = vld [vmem:[%s6894_s4 + $0x8] sm:$0xff] }
 0x501   : > { %v4867_v53 = vunpack.i.h.bf16 %v4865_v23  ;;  %v4866_v39 = vunpack.i.l.bf16 %v4865_v23  ;;  %3147 = vmatpush.bf16.msrb.mxu3 %v4079_v45  ;;  %v4179_v47 = vor.u32 %v4332_v7, %v4178_v61  ;;  %v4183_v17 = vor.u32 %v4330_v55, %v4180_v14  ;;  %4893 = vset.pattern.permute.xlu0 %v5110_v40 }
 0x502   : > { %v2764_v62 = vsel %vm2758_vm8, %v4817_v46, %v4862_v20  ;;  %2716 = vst [vmem:[#allocation2 + $0x94] sm:$0xff] %v2704_v32  ;;  %3241 = vperm.xlu1 %4894, %v6739_v42   ;;  %3237 = vperm.xlu0 %4893, %v6745_v63  }
 0x503   : > { %2717 = vst [vmem:[#allocation2 + $0x9c] sm:$0xf] %v2705_v1  ;;  %v2759_v27 = vsel %vm2758_vm8, %v4861_v12, %v4866_v39  ;;  %v2760_v30 = vsel %vm2758_vm8, %v4862_v20, %v4867_v53  ;;  %v2775_v46 = vsel %vm2758_vm8, %v4866_v39, %v4766_v13  ;;  %v2776_v0 = vsel %vm2758_vm8, %v4867_v53, %v4767_v57  ;;  %v4308_v53 = vld [vmem:[#allocation2 + $0x40] sm:$0xf0]  ;;  %v4084_v39 = vld [vmem:[#allocation2 + $0x44] sm:$0xf0] }
 0x504   : > { %2713 = vst [vmem:[#allocation2 + $0x80] sm:$0xff] %v2701_v26  ;;  %v2780_v34 = vpack.c.bf16 %v2759_v27, %v2763_v56  ;;  %v2781_v35 = vpack.c.bf16 %v2775_v46, %v2775_v46  ;;  %v2783_v33 = vpack.c.bf16 %v2760_v30, %v2764_v62  ;;  %v2784_v31 = vpack.c.bf16 %v2776_v0, %v2776_v0  ;;  %v4324_v38 = vld [vmem:[#allocation2 + $0xe0] sm:$0xf0]  ;;  %v4148_v9 = vld [vmem:[#allocation2 + $0xe4] sm:$0xf0]  ;;  %v4335_v46 = vld [vmem:[#allocation8 + $0x50] sm:$0xff] }
 0x505   : > { %2714 = vst [vmem:[#allocation2 + $0x88] sm:$0xf] %v2702_v58  ;;  %3170 = vmatpush.bf16.msrb.mxu0 %v4179_v47  ;;  %3199 = vmatpush.bf16.msra.mxu1 %v4183_v17  ;;  %v4146_v57 = vld [vmem:[#allocation2 + $0xd0] sm:$0xf]  ;;  %v4322_v13 = vld [vmem:[#allocation2 + $0xd4] sm:$0xf] }
 0x506   : > { %2792 = vst [vmem:[#allocation2 + $0xa8] sm:$0xff] %v2780_v34  ;;  %3119 = vmatpush.bf16.msra.mxu2 %v4059_v15  ;;  %3148 = vmatpush.bf16.msrb.mxu3 %v4063_v37  ;;  %v4147_v11 = vor.u32 %v4324_v38, %v4146_v57  ;;  %v4151_v25 = vor.u32 %v4322_v13, %v4148_v9  ;;  %v4334_v58 = vld [vmem:[#allocation8 + $0x48] sm:$0xff]  ;;  %v4082_v47 = vld [vmem:[#allocation2 + $0x30] sm:$0xf]  ;;  %v4306_v17 = vld [vmem:[#allocation2 + $0x34] sm:$0xf] }
 0x507   : > { %2793 = vst [vmem:[#allocation2 + $0xb0] sm:$0xf] %v2781_v35  ;;  %v4885_v28 = vpop.permute.xlu1 %4884  ;;  %4895 = vset.pattern.permute.xlu2 %v5110_v40  ;;  %v4083_v2 = vor.u32 %v4308_v53, %v4082_v47  ;;  %v4087_v44 = vor.u32 %v4306_v17, %v4084_v39  ;;  %v4304_v62 = vld [vmem:[#allocation2 + $0x18] sm:$0xf0]  ;;  %v4068_v56 = vld [vmem:[#allocation2 + $0x1c] sm:$0xf0] }
 0x508   : > { %2795 = vst [vmem:[#allocation2 + $0xbc] sm:$0xff] %v2783_v33  ;;  %v4887_v29 = vunpack.i.h.bf16 %v4885_v28  ;;  %v4886_v6 = vunpack.i.l.bf16 %v4885_v28  ;;  %3229 = vperm.xlu2 %4895, %v6769_v51   ;;  %v4066_v15 = vld [vmem:[#allocation2 + $0x8] sm:$0xf]  ;;  %v4302_v37 = vld [vmem:[#allocation2 + $0xc] sm:$0xf]  ;;  %v4336_v0 = vld [vmem:[#allocation8 + $0x58] sm:$0xff] }
 0x509   : > { %2796 = vst [vmem:[#allocation2 + $0xc4] sm:$0xf] %v2784_v31  ;;  %3171 = vmatpush.bf16.msrb.mxu0 %v4163_v4  ;;  %3200 = vmatpush.bf16.msra.mxu1 %v4167_v41  ;;  %v4316_v55 = vld [vmem:[#allocation2 + $0x90] sm:$0xf0]  ;;  %v4116_v60 = vld [vmem:[#allocation2 + $0x94] sm:$0xf0]  ;;  %v4067_v27 = vor.u32 %v4304_v62, %v4066_v15  ;;  %v4071_v30 = vor.u32 %v4302_v37, %v4068_v56 }
 0x50a   : > { %3120 = vmatmul.bf16.vlgmr.msra.gmra.mxu2 %v6734_v54  ;;  %3149 = vmatmul.bf16.vlgmr.msrb.gmra.mxu3 %v6734_v54  ;;  %v2675_v45 = vsel %vm2673_vm6, %v4887_v29, %v4892_v10  ;;  %v2674_v5 = vsel %vm2673_vm6, %v4886_v6, %v4891_v49  ;;  %v2678_v36 = vsel %vm2673_vm6, %v4821_v24, %v4886_v6  ;;  %v5111_v34 = vmov 7  }
 0x50b   : > { %v2679_v20 = vsel %vm2673_vm6, %v4822_v3, %v4887_v29  ;;  %v2695_v12 = vpack.c.bf16 %v2674_v5, %v2678_v36  ;;  %3233 = vperm.xlu1 %4894, %v6775_v16   ;;  %v4114_v8 = vld [vmem:[#allocation2 + $0x80] sm:$0xf]  ;;  %v4314_v21 = vld [vmem:[#allocation2 + $0x84] sm:$0xf]  ;;  %4897 = vset.pattern.permute.xlu0 %v5111_v34 }
 0x50c   : > { %v2698_v61 = vpack.c.bf16 %v2675_v45, %v2679_v20  ;;  %v4115_v23 = vor.u32 %v4316_v55, %v4114_v8  ;;  %v4119_v52 = vor.u32 %v4314_v21, %v4116_v60  ;;  %3326 = vperm.xlu0 %4897, %v6775_v16  }
 0x50d   : > { %2707 = vst [vmem:[#allocation2 + $0x58] sm:$0xff] %v2695_v12  ;;  %3172 = vmatpush.bf16.msrb.mxu0 %v4147_v11  ;;  %3201 = vmatpush.bf16.msra.mxu1 %v4151_v25  ;;  %v4130_v10 = vld [vmem:[#allocation2 + $0xa8] sm:$0xf]  ;;  %v4318_v24 = vld [vmem:[#allocation2 + $0xac] sm:$0xf] }
 0x50e   : > { %2710 = vst [vmem:[#allocation2 + $0x6c] sm:$0xff] %v2698_v61 }
 0x50f   : > { %v4320_v50 = vld [vmem:[#allocation2 + $0xb8] sm:$0xf0]  ;;  %v4132_v49 = vld [vmem:[#allocation2 + $0xbc] sm:$0xf0] }
 0x510   : > { %v4131_v43 = vor.u32 %v4320_v50, %v4130_v10  ;;  %v4135_v3 = vor.u32 %v4318_v24, %v4132_v49  ;;  %4896 = vset.pattern.permute.xlu2 %v5111_v34 }
 0x511   : > { %3322 = vperm.xlu2 %4896, %v6769_v51  }
 0x512   : > { %3173 = vmatpush.bf16.msrb.mxu0 %v4131_v43  ;;  %3202 = vmatpush.bf16.msra.mxu1 %v4135_v3 }
 0x513   : > { %4898 = vset.pattern.permute.xlu1 %v5111_v34 }
 0x514   : > { %v4098_v22 = vld [vmem:[#allocation2 + $0x58] sm:$0xf]  ;;  %v4310_v32 = vld [vmem:[#allocation2 + $0x5c] sm:$0xf]  ;;  %3330 = vperm.xlu1 %4898, %v6745_v63   ;;  %4901 = vset.pattern.permute.xlu0 %v5112_v48 }
 0x515   : > { %v4312_v1 = vld [vmem:[#allocation2 + $0x68] sm:$0xf0]  ;;  %v4100_v26 = vld [vmem:[#allocation2 + $0x6c] sm:$0xf0]  ;;  %3438 = vperm.xlu0 %4901, %v6745_v63  }
 0x516   : > { %3174 = vmatpush.bf16.msrb.mxu0 %v4115_v23  ;;  %3203 = vmatpush.bf16.msra.mxu1 %v4119_v52  ;;  %v4099_v7 = vor.u32 %v4312_v1, %v4098_v22  ;;  %v4103_v14 = vor.u32 %v4310_v32, %v4100_v26  ;;  %v4337_v26 = vld [vmem:[%s6893_s3 + $0x20] sm:$0xff] }
 0x519   : > { %3334 = vperm.xlu2 %4896, %v6739_v42  }
 0x51a   : > { %3125 = vmatmul.bf16.gmra.mxu2 %v4334_v58  ;;  %3154 = vmatmul.bf16.gmra.mxu3 %v4334_v58 }
 0x51b   : > { %3175 = vmatpush.bf16.msrb.mxu0 %v4099_v7  ;;  %3204 = vmatpush.bf16.msra.mxu1 %v4103_v14 }
 0x51c   : > { %4899 = vset.pattern.permute.xlu1 %v5112_v48 }
 0x51d   : > { %3430 = vperm.xlu1 %4899, %v6769_v51  }
 0x51f   : > { %3176 = vmatpush.bf16.msrb.mxu0 %v4083_v2  ;;  %3205 = vmatpush.bf16.msra.mxu1 %v4087_v44 }
 0x521   : > { %4900 = vset.pattern.permute.xlu2 %v5112_v48 }
 0x522   : > { %3434 = vperm.xlu2 %4900, %v6775_v16  }
 0x523   : > { %3177 = vmatpush.bf16.msrb.mxu0 %v4067_v27  ;;  %3206 = vmatpush.bf16.msra.mxu1 %v4071_v30 }
 0x525   : > { %3442 = vperm.xlu1 %4899, %v6739_v42  }
 0x526   : > { %3178 = vmatmul.bf16.vlgmr.msrb.gmra.mxu0 %v6734_v54  ;;  %3207 = vmatmul.bf16.vlgmr.msra.gmra.mxu1 %v6734_v54 }
 0x52a   : > { %3130 = vmatmul.bf16.gmra.mxu2 %v4335_v46  ;;  %3159 = vmatmul.bf16.gmra.mxu3 %v4335_v46 }
 0x536   : > { %3183 = vmatmul.bf16.gmra.mxu0 %v4334_v58  ;;  %3212 = vmatmul.bf16.gmra.mxu1 %v4334_v58 }
 0x53a   : > { %3135 = vmatmul.bf16.gmra.mxu2 %v4336_v0  ;;  %3164 = vmatmul.bf16.gmra.mxu3 %v4336_v0 }
 0x546   : > { %3188 = vmatmul.bf16.gmra.mxu0 %v4335_v46  ;;  %3217 = vmatmul.bf16.gmra.mxu1 %v4335_v46 }
 0x556   : > { %3193 = vmatmul.bf16.gmra.mxu0 %v4336_v0  ;;  %3222 = vmatmul.bf16.gmra.mxu1 %v4336_v0 }
 0x562   : > { %v3230_v54 = vpop.permute.xlu2 %3229 }
 0x574   : > { %v6783_v59 = vpop.permute.xlu1 %3241  ;;  %v3238_v31 = vpop.permute.xlu0 %3237 }
 0x57d   : > { %v3234_v4 = vpop.permute.xlu1 %3233 }
 0x58d   : > { %v3121_v18 = vpop.f32.mrf.mxu2  ;;  %v3150_v19 = vpop.f32.mrf.mxu3 }
 0x58e   : > { %v3244_v41 = vadd.f32 %v3230_v54, %v3121_v18  ;;  %v3245_v28 = vadd.f32 %v3230_v54, %v3150_v19 }
 0x590   : > { %v3276_v20 = vmul.f32 0.2, %v3244_v41  ;;  %v3277_v12 = vmul.f32 0.2, %v3245_v28  ;;  %vm3260_vm13 = vcmp.gt.f32.partialorder %v3244_v41, 0.0  ;;  %vm3261_vm15 = vcmp.gt.f32.partialorder %v3245_v28, 0.0 }
 0x592   : > { %v3292_v60 = vsel %vm3260_vm13, %v3244_v41, %v3276_v20  ;;  %v3293_v52 = vsel %vm3261_vm15, %v3245_v28, %v3277_v12  ;;  %v6808_v12 = vpop.permute.xlu1 %3330 }
 0x595   : > { %v3123_v35 = vpop.f32.mrf.mxu2  ;;  %v3152_v33 = vpop.f32.mrf.mxu3 }
 0x596   : > { %v3248_v6 = vadd.f32 %v3234_v4, %v3123_v35  ;;  %v3249_v63 = vadd.f32 %v3234_v4, %v3152_v33 }
 0x598   : > { %v3280_v10 = vmul.f32 0.2, %v3248_v6  ;;  %v3281_v24 = vmul.f32 0.2, %v3249_v63  ;;  %vm3264_vm14 = vcmp.gt.f32.partialorder %v3248_v6, 0.0  ;;  %vm3265_vm0 = vcmp.gt.f32.partialorder %v3249_v63, 0.0 }
 0x59a   : > { %v3296_v23 = vsel %vm3264_vm14, %v3248_v6, %v3280_v10  ;;  %v3297_v22 = vsel %vm3265_vm0, %v3249_v63, %v3281_v24 }
 0x59b   : > { %v3308_v32 = vpack.c.bf16 %v3296_v23, %v3292_v60  ;;  %v3309_v1 = vpack.c.bf16 %v3297_v22, %v3293_v52  ;;  %v3327_v52 = vpop.permute.xlu0 %3326 }
 0x59d   : > { %v3126_v38 = vpop.f32.mrf.mxu2  ;;  %v3155_v9 = vpop.f32.mrf.mxu3 }
 0x59e   : > { %v3252_v57 = vadd.f32 %v3238_v31, %v3126_v38  ;;  %v3253_v13 = vadd.f32 %v3238_v31, %v3155_v9  ;;  %v4338_v9 = vld [vmem:[%s6893_s3 + $0x28] sm:$0xff] }
 0x5a0   : > { %v3284_v11 = vmul.f32 0.2, %v3252_v57  ;;  %v3285_v25 = vmul.f32 0.2, %v3253_v13  ;;  %vm3268_vm9 = vcmp.gt.f32.partialorder %v3252_v57, 0.0  ;;  %vm3269_vm10 = vcmp.gt.f32.partialorder %v3253_v13, 0.0 }
 0x5a2   : > { %v3300_v61 = vsel %vm3268_vm9, %v3252_v57, %v3284_v11  ;;  %v3301_v51 = vsel %vm3269_vm10, %v3253_v13, %v3285_v25 }
 0x5a3   : > { %v3179_v40 = vpop.f32.mrf.mxu0  ;;  %v3208_v29 = vpop.f32.mrf.mxu1 }
 0x5a4   : > { %v3246_v17 = vadd.f32 %v3230_v54, %v3179_v40  ;;  %v3247_v2 = vadd.f32 %v3230_v54, %v3208_v29 }
 0x5a5   : > { %v3128_v45 = vpop.f32.mrf.mxu2  ;;  %v3157_v5 = vpop.f32.mrf.mxu3 }
 0x5a6   : > { %v3256_v42 = vadd.f32 %v6783_v59, %v3128_v45  ;;  %v3257_v36 = vadd.f32 %v6783_v59, %v3157_v5  ;;  %v3278_v19 = vmul.f32 0.2, %v3246_v17  ;;  %v3279_v34 = vmul.f32 0.2, %v3247_v2 }
 0x5a7   : > { %vm3262_vm8 = vcmp.gt.f32.partialorder %v3246_v17, 0.0  ;;  %vm3263_vm9 = vcmp.gt.f32.partialorder %v3247_v2, 0.0 }
 0x5a8   : > { %vm3272_vm11 = vcmp.gt.f32.partialorder %v3256_v42, 0.0  ;;  %v3288_v50 = vmul.f32 0.2, %v3256_v42  ;;  %vm3273_vm12 = vcmp.gt.f32.partialorder %v3257_v36, 0.0  ;;  %v3289_v49 = vmul.f32 0.2, %v3257_v36 }
 0x5a9   : > { %v3294_v13 = vsel %vm3262_vm8, %v3246_v17, %v3278_v19 }
 0x5aa   : > { %v3304_v43 = vsel %vm3272_vm11, %v3256_v42, %v3288_v50  ;;  %v3305_v3 = vsel %vm3273_vm12, %v3257_v36, %v3289_v49  ;;  %v3323_v42 = vpop.permute.xlu2 %3322  ;;  %v3431_v49 = vpop.permute.xlu1 %3430 }
 0x5ab   : > { %v3181_v55 = vpop.f32.mrf.mxu0  ;;  %v3210_v16 = vpop.f32.mrf.mxu1  ;;  %v3312_v8 = vpack.c.bf16 %v3304_v43, %v3300_v61  ;;  %v3313_v21 = vpack.c.bf16 %v3305_v3, %v3301_v51 }
 0x5ac   : > { %v3250_v39 = vadd.f32 %v3234_v4, %v3181_v55  ;;  %v3251_v47 = vadd.f32 %v3234_v4, %v3210_v16  ;;  %v3295_v4 = vsel %vm3263_vm9, %v3247_v2, %v3279_v34  ;;  %v3439_v2 = vpop.permute.xlu0 %3438 }
 0x5ad   : > { %3359 = vmatpush.bf16.msrb.mxu2 %v3312_v8  ;;  %3378 = vmatpush.bf16.msra.mxu3 %v3313_v21  ;;  %v3131_v40 = vpop.f32.mrf.mxu2  ;;  %v3160_v29 = vpop.f32.mrf.mxu3 }
 0x5ae   : > { %v3282_v30 = vmul.f32 0.2, %v3250_v39  ;;  %v3283_v46 = vmul.f32 0.2, %v3251_v47  ;;  %vm3266_vm5 = vcmp.gt.f32.partialorder %v3250_v39, 0.0  ;;  %vm3267_vm6 = vcmp.gt.f32.partialorder %v3251_v47, 0.0 }
 0x5af   : > { %v3445_v8 = vadd.f32 %v3431_v49, %v3131_v40  ;;  %v3446_v21 = vadd.f32 %v3431_v49, %v3160_v29 }
 0x5b0   : > { %v3298_v54 = vsel %vm3266_vm5, %v3250_v39, %v3282_v30  ;;  %v3299_v57 = vsel %vm3267_vm6, %v3251_v47, %v3283_v46 }
 0x5b1   : > { %3360 = vmatpush.bf16.msrb.mxu2 %v3308_v32  ;;  %3379 = vmatpush.bf16.msra.mxu3 %v3309_v1  ;;  %v3310_v41 = vpack.c.bf16 %v3298_v54, %v3294_v13  ;;  %v3311_v28 = vpack.c.bf16 %v3299_v57, %v3295_v4 }
 0x5b2   : > { %v6810_v10 = vpop.permute.xlu2 %3334 }
 0x5b3   : > { %v3184_v58 = vpop.f32.mrf.mxu0  ;;  %v3213_v7 = vpop.f32.mrf.mxu1 }
 0x5b4   : > { %4196 = vmatmul.msk.bf16.vlgmr.msrb.gmra.mxu2 %vm1325_vm7, %v4337_v26  ;;  %4198 = vmatmul.msk.bf16.vlgmr.msra.gmra.mxu3 %vm1325_vm7, %v4337_v26  ;;  %v3254_v14 = vadd.f32 %v3238_v31, %v3184_v58  ;;  %v3255_v53 = vadd.f32 %v3238_v31, %v3213_v7 }
 0x5b5   : > { %v3133_v6 = vpop.f32.mrf.mxu2  ;;  %v3162_v63 = vpop.f32.mrf.mxu3 }
 0x5b6   : > { %v3286_v56 = vmul.f32 0.2, %v3254_v14  ;;  %v3287_v15 = vmul.f32 0.2, %v3255_v53  ;;  %vm3270_vm1 = vcmp.gt.f32.partialorder %v3254_v14, 0.0  ;;  %vm3271_vm2 = vcmp.gt.f32.partialorder %v3255_v53, 0.0 }
 0x5b8   : > { %v3302_v35 = vsel %vm3270_vm1, %v3254_v14, %v3286_v56  ;;  %v3303_v33 = vsel %vm3271_vm2, %v3255_v53, %v3287_v15 }
 0x5ba   : > { %v3435_v22 = vpop.permute.xlu2 %3434 }
 0x5bb   : > { %v3186_v44 = vpop.f32.mrf.mxu0  ;;  %v3215_v62 = vpop.f32.mrf.mxu1  ;;  %v3449_v7 = vadd.f32 %v3435_v22, %v3133_v6  ;;  %v3450_v14 = vadd.f32 %v3435_v22, %v3162_v63 }
 0x5bc   : > { %v3258_v37 = vadd.f32 %v6783_v59, %v3186_v44  ;;  %v3259_v27 = vadd.f32 %v6783_v59, %v3215_v62 }
 0x5bd   : > { %v3136_v45 = vpop.f32.mrf.mxu2  ;;  %v3165_v5 = vpop.f32.mrf.mxu3 }
 0x5be   : > { %vm3274_vm3 = vcmp.gt.f32.partialorder %v3258_v37, 0.0  ;;  %v3290_v0 = vmul.f32 0.2, %v3258_v37  ;;  %vm3275_vm4 = vcmp.gt.f32.partialorder %v3259_v27, 0.0  ;;  %v3291_v18 = vmul.f32 0.2, %v3259_v27 }
 0x5bf   : > { %v3453_v19 = vadd.f32 %v3439_v2, %v3136_v45  ;;  %v3454_v34 = vadd.f32 %v3439_v2, %v3165_v5 }
 0x5c0   : > { %v3306_v48 = vsel %vm3274_vm3, %v3258_v37, %v3290_v0  ;;  %v3307_v31 = vsel %vm3275_vm4, %v3259_v27, %v3291_v18 }
 0x5c1   : > { %v3314_v38 = vpack.c.bf16 %v3306_v48, %v3302_v35  ;;  %v3315_v59 = vpack.c.bf16 %v3307_v31, %v3303_v33 }
 0x5c3   : > { %3397 = vmatpush.bf16.msra.mxu0 %v3314_v38  ;;  %3416 = vmatpush.bf16.msrb.mxu1 %v3315_v59  ;;  %v3189_v11 = vpop.f32.mrf.mxu0  ;;  %v3218_v25 = vpop.f32.mrf.mxu1 }
 0x5c4   : > { %4197 = vmatmul.msk.bf16.gmra.mxu2 %vm1325_vm7, %v4338_v9  ;;  %4199 = vmatmul.msk.bf16.gmra.mxu3 %vm1325_vm7, %v4338_v9  ;;  %v3447_v37 = vadd.f32 %v3431_v49, %v3189_v11  ;;  %v3448_v27 = vadd.f32 %v3431_v49, %v3218_v25  ;;  %v3443_v38 = vpop.permute.xlu1 %3442 }
 0x5c5   : > { %v3138_v61 = vpop.f32.mrf.mxu2  ;;  %v3167_v51 = vpop.f32.mrf.mxu3 }
 0x5c6   : > { %v3457_v40 = vadd.f32 %v3443_v38, %v3138_v61  ;;  %v3458_v29 = vadd.f32 %v3443_v38, %v3167_v51 }
 0x5c7   : > { %3398 = vmatpush.bf16.msra.mxu0 %v3310_v41  ;;  %3417 = vmatpush.bf16.msrb.mxu1 %v3311_v28 }
 0x5ca   : > { %4200 = vmatmul.msk.bf16.vlgmr.msra.gmra.mxu0 %vm1325_vm7, %v4337_v26  ;;  %4202 = vmatmul.msk.bf16.vlgmr.msrb.gmra.mxu1 %vm1325_vm7, %v4337_v26 }
 0x5cb   : > { %v3191_v36 = vpop.f32.mrf.mxu0  ;;  %v3220_v20 = vpop.f32.mrf.mxu1 }
 0x5cc   : > { %v3451_v54 = vadd.f32 %v3435_v22, %v3191_v36  ;;  %v3452_v57 = vadd.f32 %v3435_v22, %v3220_v20 }
 0x5d3   : > { %v6812_v24 = vpop.f32.mrf.mxu0  ;;  %v6814_v50 = vpop.f32.mrf.mxu1 }
 0x5d4   : > { %v3455_v51 = vadd.f32 %v3439_v2, %v6812_v24  ;;  %v3456_v49 = vadd.f32 %v3439_v2, %v6814_v50 }
 0x5da   : > { %4201 = vmatmul.msk.bf16.gmra.mxu0 %vm1325_vm7, %v4338_v9  ;;  %4203 = vmatmul.msk.bf16.gmra.mxu1 %vm1325_vm7, %v4338_v9 }
 0x5db   : > { %v6821_v32 = vpop.f32.mrf.mxu0  ;;  %v6823_v1 = vpop.f32.mrf.mxu1 }
 0x5dc   : > { %v3460_v24 = vadd.f32 %v3443_v38, %v6823_v1 }
 0x637   : > { %v3362_v43 = vpop.f32.mrf.mxu2  ;;  %v3381_v3 = vpop.f32.mrf.mxu3 }
 0x638   : > { %v3363_v55 = vadd.f32 %v3362_v43, %v3323_v42  ;;  %v3382_v16 = vadd.f32 %v3381_v3, %v3323_v42 }
 0x63a   : > { %v3461_v60 = vadd.f32 %v3445_v8, %v3363_v55  ;;  %v3462_v23 = vadd.f32 %v3446_v21, %v3382_v16 }
 0x63c   : > { %3477 = vst [vmem:[%s6817_s2] sm:$0xff] %v3461_v60 }
 0x63d   : > { %3478 = vst [vmem:[%s6817_s2 + $0x8] sm:$0xff] %v3462_v23 }
 0x63f   : > { %v3364_v26 = vpop.f32.mrf.mxu2  ;;  %v3383_v58 = vpop.f32.mrf.mxu3 }
 0x640   : > { %v3365_v53 = vadd.f32 %v3364_v26, %v3327_v52  ;;  %v3384_v39 = vadd.f32 %v3383_v58, %v3327_v52 }
 0x642   : > { %v3465_v47 = vadd.f32 %v3449_v7, %v3365_v53  ;;  %v3466_v17 = vadd.f32 %v3450_v14, %v3384_v39 }
 0x644   : > { %3481 = vst [vmem:[%s6817_s2 + $0x20] sm:$0xff] %v3465_v47 }
 0x645   : > { %3482 = vst [vmem:[%s6817_s2 + $0x28] sm:$0xff] %v3466_v17 }
 0x647   : > { %v3400_v44 = vpop.f32.mrf.mxu0  ;;  %v3419_v62 = vpop.f32.mrf.mxu1 }
 0x648   : > { %v3401_v56 = vadd.f32 %v3400_v44, %v3323_v42  ;;  %v3420_v15 = vadd.f32 %v3419_v62, %v3323_v42  ;;  %v3367_v30 = vpop.f32.mrf.mxu2  ;;  %v3386_v46 = vpop.f32.mrf.mxu3 }
 0x649   : > { %v3368_v0 = vadd.f32 %v3367_v30, %v6808_v12  ;;  %v3387_v18 = vadd.f32 %v3386_v46, %v6808_v12 }
 0x64a   : > { %v3463_v35 = vadd.f32 %v3447_v37, %v3401_v56  ;;  %v3464_v33 = vadd.f32 %v3448_v27, %v3420_v15 }
 0x64b   : > { %v3469_v48 = vadd.f32 %v3453_v19, %v3368_v0  ;;  %v3470_v31 = vadd.f32 %v3454_v34, %v3387_v18 }
 0x64c   : > { %3479 = vst [vmem:[%s6817_s2 + $0x10] sm:$0xff] %v3463_v35 }
 0x64d   : > { %3480 = vst [vmem:[%s6817_s2 + $0x18] sm:$0xff] %v3464_v33 }
 0x64e   : > { %3485 = vst [vmem:[%s6817_s2 + $0x40] sm:$0xff] %v3469_v48 }
 0x64f   : > { %v3402_v59 = vpop.f32.mrf.mxu0  ;;  %v3421_v9 = vpop.f32.mrf.mxu1  ;;  %3486 = vst [vmem:[%s6817_s2 + $0x48] sm:$0xff] %v3470_v31 }
 0x650   : > { %v3403_v13 = vadd.f32 %v3402_v59, %v3327_v52  ;;  %v3422_v4 = vadd.f32 %v3421_v9, %v3327_v52  ;;  %v3369_v41 = vpop.f32.mrf.mxu2  ;;  %v3388_v28 = vpop.f32.mrf.mxu3 }
 0x651   : > { %v3370_v6 = vadd.f32 %v3369_v41, %v6810_v10  ;;  %v3389_v63 = vadd.f32 %v3388_v28, %v6810_v10 }
 0x652   : > { %v3467_v11 = vadd.f32 %v3451_v54, %v3403_v13  ;;  %v3468_v25 = vadd.f32 %v3452_v57, %v3422_v4 }
 0x653   : > { %v3473_v45 = vadd.f32 %v3457_v40, %v3370_v6  ;;  %v3474_v5 = vadd.f32 %v3458_v29, %v3389_v63 }
 0x654   : > { %3483 = vst [vmem:[%s6817_s2 + $0x30] sm:$0xff] %v3467_v11 }
 0x655   : > { %3484 = vst [vmem:[%s6817_s2 + $0x38] sm:$0xff] %v3468_v25 }
 0x656   : > { %3489 = vst [vmem:[%s6817_s2 + $0x60] sm:$0xff] %v3473_v45 }
 0x657   : > { %v3405_v42 = vpop.f32.mrf.mxu0  ;;  %v3424_v36 = vpop.f32.mrf.mxu1  ;;  %3490 = vst [vmem:[%s6817_s2 + $0x68] sm:$0xff] %v3474_v5 }
 0x658   : > { %v3406_v20 = vadd.f32 %v3405_v42, %v6808_v12  ;;  %v3425_v61 = vadd.f32 %v3424_v36, %v6808_v12  ;;  %v3459_v12 = vadd.f32 %v3443_v38, %v6821_v32 }
 0x65a   : > { %v3471_v43 = vadd.f32 %v3455_v51, %v3406_v20  ;;  %v3472_v3 = vadd.f32 %v3456_v49, %v3425_v61 }
 0x65c   : > { %3487 = vst [vmem:[%s6817_s2 + $0x50] sm:$0xff] %v3471_v43 }
 0x65d   : > { %3488 = vst [vmem:[%s6817_s2 + $0x58] sm:$0xff] %v3472_v3 }
 0x65f   : > { %v3407_v55 = vpop.f32.mrf.mxu0  ;;  %v3426_v16 = vpop.f32.mrf.mxu1 }
 0x660   : > { %v3408_v50 = vadd.f32 %v3407_v55, %v6810_v10  ;;  %v3427_v8 = vadd.f32 %v3426_v16, %v6810_v10 }
 0x662   : > { %v3475_v21 = vadd.f32 %v3459_v12, %v3408_v50  ;;  %v3476_v60 = vadd.f32 %v3460_v24, %v3427_v8 }
 0x664   : > { %3491 = vst [vmem:[%s6817_s2 + $0x70] sm:$0xff] %v3475_v21 }
 0x665   : > { %3492 = vst [vmem:[%s6817_s2 + $0x78] sm:$0xff] %v3476_v60 }
 0x666   : > { %5027 = shalt.err (!%p5024_p0)
}
 0x667   : > { %s5113_s10 = smov 512   ;;  %s5114_s28 = smov 32  }
 0x668   : > { %4359 = dma.vmem_to_hbm [thread:$0]  (%p5219_p5), %s3509_s11, 2048, %s3511_s13, %s3494_s21, %s5113_s10, %s5113_s10, %s5114_s28  }
 0x669 PF: > { %s6928_s7 = sld [smem:[#allocation14_spill]]  ;;  %p4373_p3 = pnand %p3638_p11, %p5190_p6 }
 0x66b   : > { %p4374_p7 = pneg %p4373_p3 }
 0x66f   : > { %s3525_s9 = sand.u32 1, %s6928_s7  }
 0x670   : > { %s3526_s22 = scalar_lea.sflag [#allocation5], %s3525_s9 }
 0x671   : > { %5065 = dma.done.wait (%p4374_p7), %s3526_s22, 2048  }
 0x672   : > { %5067 = vsyncadd (%p4374_p7), %s3526_s22, 4294965248  ;;  %s24_s23 = sadd.s32 1, %s5090_s23   ;;  %s6930_s27 = sld [smem:[#allocation15_spill]] }
 0x673   : > { %p21_p9 = scmp.ge.s32.totalorder %s24_s23, 4   ;;  %s6931_s20 = sld [smem:[#allocation20_spill]] }
 0x674   : > { %s6932_s21 = sld [smem:[#allocation16_spill]]  ;;  %s6934_s18 = smov %s5074_s19 }
 0x675   : > { %s6933_s22 = sld [smem:[#allocation18_spill]]  ;;  %23 = sbr.rel (!%p21_p9) target bundleno = 11 (0xb), region = 106 }
 0x678   : > { %s6935_s19 = smov %s6930_s27 }
 0x67a   :  { %3532 = vsyncpa [#allocation4], 1 }
 0x67b   :  { %3534 = vsyncpa [#allocation4 + $0x1], 1 }
 0x67c   :  { %3535 = vsyncpa [#allocation7], 1 }
 0x67d   :  { %3537 = vsyncpa [#allocation7 + $0x1], 1 }
 0x67e   :  { %3538 = vsyncpa [#allocation5], 1 }
 0x67f   :  { %3540 = vsyncpa [#allocation5 + $0x1], 1 }

</bundles_post_ra>
